<compile_context>
chip_gen: v7x
topology: tpu7x:2x2x1
jax: 0.10.0
libtpu: 0.0.40
codegen_flags: <defaults>
</compile_context>

<pallas_src>
import functools
import math

import numpy as np
import jax
import jax.numpy as jnp
from jax.experimental import pallas as pl
from jax.experimental.pallas import tpu as pltpu

EPS = 1e-9
_LANES = 128
_PI_2 = math.pi / 2.0
_PI_4 = math.pi / 4.0
_TAN_PI_8 = 0.41421356237309503
_TAN_3PI_8 = 2.414213562373095


def _atan(x):
    """Cephes-style single-precision arctan using only ops that lower cleanly
    in Mosaic; divides replaced by EUP approx reciprocals."""
    sign = jnp.where(x < 0.0, -1.0, jnp.where(x > 0.0, 1.0, 0.0))
    xa = jnp.abs(x)
    big = xa > _TAN_3PI_8
    mid = jnp.logical_and(xa > _TAN_PI_8, jnp.logical_not(big))
    safe = jnp.where(big, xa, 1.0)
    xr_big = -pl.reciprocal(safe, approx=True)
    xr_mid = (xa - 1.0) * pl.reciprocal(xa + 1.0, approx=True)
    xr = jnp.where(big, xr_big, jnp.where(mid, xr_mid, xa))
    off = jnp.where(big, _PI_2, jnp.where(mid, _PI_4, 0.0))
    z = xr * xr
    y = ((((8.05374449538e-2 * z - 1.38776856032e-1) * z
           + 1.99777106478e-1) * z - 3.33329491539e-1) * z * xr + xr)
    return sign * (y + off)


def _bce_with_logits(x, y):
    # torch.nn.BCEWithLogitsLoss(reduction='none')
    return jnp.maximum(x, 0.0) - x * y + jnp.log1p(jnp.exp(-jnp.abs(x)))


# ----------------------------------------------------------------------------
# Pallas kernel
# ----------------------------------------------------------------------------
def _yolov9_loss_kernel(hv_ref, cls_p_ref, cls_t_ref, anc_ref, pk_ref,
                        anch_ref, out_ref, *, reg_max, tile_sublanes,
                        num_anchors):
    f32 = jnp.float32
    b = pl.program_id(0)
    t = pl.program_id(1)

    # --- pad mask built in-kernel from the global anchor index ---------------
    sub = jax.lax.broadcasted_iota(jnp.int32, (tile_sublanes, _LANES), 0)
    lane = jax.lax.broadcasted_iota(jnp.int32, (tile_sublanes, _LANES), 1)
    gidx = (t * tile_sublanes + sub) * _LANES + lane
    pad = (gidx < num_anchors).astype(f32)

    # --- classification BCE + box_norm / cls_norm, vectorized over classes ---
    xp = cls_p_ref[0]                                   # [C, ts, 128]
    yt = cls_t_ref[0]                                   # [C, ts, 128]
    bce = _bce_with_logits(xp, yt)
    bce_pa = jnp.sum(bce, axis=0)                       # [ts, 128]
    box_norm = jnp.sum(yt, axis=0)                      # [ts, 128] (0 on pad)

    bce_lane = jnp.sum(bce_pa * pad, axis=0, keepdims=True)    # [1, 128]
    norm_lane = jnp.sum(box_norm, axis=0, keepdims=True)       # [1, 128]
    zero_lane = jnp.zeros_like(bce_lane)
    out_ref[0, 0] = jnp.concatenate(
        [bce_lane, zero_lane, zero_lane, norm_lane], axis=0)    # [4, 128]

    # --- CIoU + DFL only for tiles that contain at least one valid anchor ----
    @pl.when(hv_ref[b, t] > 0)
    def _():
        # packed channels: 0-3 pred box xyxy, 4-7 target box xyxy (both
        # pre-scaled by 1/scaler), 8 valid mask.
        px1 = pk_ref[0, 0]
        py1 = pk_ref[0, 1]
        px2 = pk_ref[0, 2]
        py2 = pk_ref[0, 3]
        tx1 = pk_ref[0, 4]
        ty1 = pk_ref[0, 5]
        tx2 = pk_ref[0, 6]
        ty2 = pk_ref[0, 7]
        valid = pk_ref[0, 8]
        ax = anch_ref[0]
        ay = anch_ref[1]
        w = box_norm * valid

        # elementwise CIoU (approx reciprocals; EUP is the saturated slot)
        inter = (jnp.maximum(jnp.minimum(px2, tx2) - jnp.maximum(px1, tx1), 0.0) *
                 jnp.maximum(jnp.minimum(py2, ty2) - jnp.maximum(py1, ty1), 0.0))
        area_p = (px2 - px1) * (py2 - py1)
        area_t = (tx2 - tx1) * (ty2 - ty1)
        union = area_p + area_t - inter
        iou = inter * pl.reciprocal(union + EPS, approx=True)
        cent = (((px1 + px2) - (tx1 + tx2)) * 0.5) ** 2 + \
               (((py1 + py2) - (ty1 + ty2)) * 0.5) ** 2
        cw = jnp.maximum(px2, tx2) - jnp.minimum(px1, tx1)
        ch = jnp.maximum(py2, ty2) - jnp.minimum(py1, ty1)
        diag = cw * cw + ch * ch + EPS
        diou = iou - cent * pl.reciprocal(diag, approx=True)
        arct = (_atan((px2 - px1) * pl.reciprocal(py2 - py1 + EPS, approx=True)) -
                _atan((tx2 - tx1) * pl.reciprocal(ty2 - ty1 + EPS, approx=True)))
        v = (4.0 / (math.pi ** 2)) * arct * arct
        alpha = v * pl.reciprocal(v - iou + 1.0 + EPS, approx=True)
        ciou = diou - alpha * v
        iou_lane = jnp.sum((1.0 - ciou) * w, axis=0, keepdims=True)

        # DFL: bins vectorized over the reg_max axis.
        tdists = (ax - tx1, ay - ty1, tx2 - ax, ty2 - ay)
        riota = jax.lax.broadcasted_iota(
            jnp.int32, (reg_max, tile_sublanes, _LANES), 0)
        dfl_sum = jnp.zeros_like(valid)
        for c in range(4):
            td = jnp.clip(tdists[c], 0.0, reg_max - 1.01)
            lab_l = jnp.floor(td)
            w_l = (lab_l + 1.0) - td
            w_r = td - lab_l
            lab_i = lab_l.astype(jnp.int32)
            logits = anc_ref[0, c * reg_max:(c + 1) * reg_max]   # [R, ts, 128]
            m = jnp.max(logits, axis=0)                          # [ts, 128]
            esum = jnp.sum(jnp.exp(logits - m[None]), axis=0)
            lse = m + jnp.log(esum)
            logit_l = jnp.sum(jnp.where(riota == lab_i[None], logits, 0.0), 0)
            logit_r = jnp.sum(jnp.where(riota == (lab_i + 1)[None], logits, 0.0), 0)
            dfl_sum = dfl_sum + (lse - logit_l) * w_l + (lse - logit_r) * w_r
        dfl_lane = jnp.sum(dfl_sum * 0.25 * w, axis=0, keepdims=True)

        out_ref[0, 0] = jnp.concatenate(
            [bce_lane, iou_lane, dfl_lane, norm_lane], axis=0)


def _cdiv(a, b):
    return -(-a // b)


def yolov9_loss(predicts, align_targets, valid_masks, anchor_grid, scaler,
                class_num, reg_max, anchor_tile_sublanes=16):
    """Returns (loss_iou, loss_dfl, loss_cls), matching YOLOV9Loss.forward."""
    predicts_cls, predicts_anc, predicts_box = predicts
    B, A, C = predicts_cls.shape
    assert C == class_num
    assert anchor_tile_sublanes % 8 == 0

    f32 = jnp.float32
    s_raw = _cdiv(A, _LANES)
    ts = anchor_tile_sublanes if s_raw >= anchor_tile_sublanes else s_raw
    s_total = _cdiv(s_raw, ts) * ts
    a_pad = s_total * _LANES
    nat = s_total // ts
    pad_amt = a_pad - A

    inv_scaler = 1.0 / scaler.astype(f32)                         # [A]
    targets_cls = align_targets[..., :class_num].astype(f32)      # [B,A,C]
    targets_box = align_targets[..., class_num:].astype(f32)      # [B,A,4]

    def lane_major(x):
        # [B, A, F] -> [B, F, s_total, 128], anchors zero-padded to a_pad.
        x = jnp.pad(x, ((0, 0), (0, pad_amt), (0, 0)))
        x = jnp.transpose(x, (0, 2, 1))
        return x.reshape(B, x.shape[1], s_total, _LANES)

    cls_p_lm = lane_major(predicts_cls.astype(f32))                      # [B,C,S,128]
    cls_t_lm = lane_major(targets_cls)                                   # [B,C,S,128]
    anc_lm = lane_major(predicts_anc.astype(f32).reshape(B, A, 4 * reg_max))

    box_p = predicts_box.astype(f32) * inv_scaler[None, :, None]         # [B,A,4]
    box_t = targets_box * inv_scaler[None, :, None]                      # [B,A,4]
    valid_f = valid_masks.astype(f32)                                    # [B,A]
    packed = jnp.concatenate([box_p, box_t, valid_f[..., None]], axis=-1)
    packed_lm = lane_major(packed)                                       # [B,9,S,128]

    anchors_norm = anchor_grid.astype(f32) * inv_scaler[:, None]         # [A,2]
    anch_lm = jnp.transpose(
        jnp.pad(anchors_norm, ((0, pad_amt), (0, 0))), (1, 0)
    ).reshape(2, s_total, _LANES)                                        # [2,S,128]

    # Per-(batch, anchor-tile) "has any valid anchor" flag -> SMEM prefetch.
    has_valid = (jnp.pad(valid_f, ((0, 0), (0, pad_amt)))
                 .reshape(B, nat, ts * _LANES).sum(-1) > 0.0).astype(jnp.int32)

    kernel = functools.partial(_yolov9_loss_kernel, reg_max=reg_max,
                               tile_sublanes=ts, num_anchors=A)

    # Explicit scoped-VMEM budget (v5e defaults to 16 MiB scoped).
    block_bytes = (2 * C + 4 * reg_max + 9 + 2) * ts * _LANES * 4
    vmem_limit = int(min(64 * 1024 * 1024,
                         max(32 * 1024 * 1024, 4 * block_bytes + (4 << 20))))

    grid_spec = pltpu.PrefetchScalarGridSpec(
        num_scalar_prefetch=1,
        grid=(B, nat),
        in_specs=[
            pl.BlockSpec((1, C, ts, _LANES), lambda b, t, hv: (b, 0, t, 0)),
            pl.BlockSpec((1, C, ts, _LANES), lambda b, t, hv: (b, 0, t, 0)),
            pl.BlockSpec((1, 4 * reg_max, ts, _LANES), lambda b, t, hv: (b, 0, t, 0)),
            pl.BlockSpec((1, 9, ts, _LANES), lambda b, t, hv: (b, 0, t, 0)),
            pl.BlockSpec((2, ts, _LANES), lambda b, t, hv: (0, t, 0)),
        ],
        out_specs=pl.BlockSpec((1, 1, 4, _LANES), lambda b, t, hv: (b, t, 0, 0)),
    )

    out = pl.pallas_call(
        kernel,
        out_shape=jax.ShapeDtypeStruct((B, nat, 4, _LANES), f32),
        grid_spec=grid_spec,
        compiler_params=pltpu.CompilerParams(
            dimension_semantics=("parallel", "parallel"),
            vmem_limit_bytes=vmem_limit),
    )(has_valid, cls_p_lm, cls_t_lm, anc_lm, packed_lm, anch_lm)

    # rows: 0 bce, 1 iou, 2 dfl, 3 cls_norm (each a 128-lane partial).
    parts = jnp.sum(out, axis=(0, 1, 3))                 # [4]
    bce_s, iou_s, dfl_s, norm_s = parts[0], parts[1], parts[2], parts[3]
    # Deliberate divergence from the reference: guard empty batches instead of
    # returning inf/NaN when there are zero positive targets.
    cls_norm = jnp.maximum(norm_s, 1e-9)
    loss_cls = bce_s / cls_norm
    loss_iou = iou_s / cls_norm
    loss_dfl = dfl_s / cls_norm
    return loss_iou, loss_dfl, loss_cls


# ----------------------------------------------------------------------------
# Pure-JAX reference (mirrors the PyTorch math; boolean indexing replaced by
# equivalent masking).
# ----------------------------------------------------------------------------
def _ciou_lastdim(b1, b2, atan_fn):
    x1a, y1a, x2a, y2a = (b1[..., 0:1], b1[..., 1:2], b1[..., 2:3], b1[..., 3:4])
    x1b, y1b, x2b, y2b = (b2[..., 0:1], b2[..., 1:2], b2[..., 2:3], b2[..., 3:4])
    inter = (jnp.maximum(jnp.minimum(x2a, x2b) - jnp.maximum(x1a, x1b), 0.0) *
             jnp.maximum(jnp.minimum(y2a, y2b) - jnp.maximum(y1a, y1b), 0.0))
    area_a = (x2a - x1a) * (y2a - y1a)
    area_b = (x2b - x1b) * (y2b - y1b)
    union = area_a + area_b - inter
    iou = inter / (union + EPS)
    cent = ((x2a + x1a) * 0.5 - (x2b + x1b) * 0.5) ** 2 + \
           ((y2a + y1a) * 0.5 - (y2b + y1b) * 0.5) ** 2
    cw = jnp.maximum(x2a, x2b) - jnp.minimum(x1a, x1b)
    ch = jnp.maximum(y2a, y2b) - jnp.minimum(y1a, y1b)
    diag = cw ** 2 + ch ** 2 + EPS
    diou = iou - cent / diag
    arct = (atan_fn((x2a - x1a) / (y2a - y1a + EPS)) -
            atan_fn((x2b - x1b) / (y2b - y1b + EPS)))
    v = (4.0 / (math.pi ** 2)) * arct ** 2
    alpha = v / (v - iou + 1.0 + EPS)
    return diou - alpha * v


def yolov9_loss_ref(predicts, align_targets, valid_masks, anchor_grid, scaler,
                    class_num, reg_max):
    predicts_cls, predicts_anc, predicts_box = predicts
    targets_cls = align_targets[..., :class_num]
    targets_bbox = align_targets[..., class_num:] / scaler[None, :, None]
    pbox = predicts_box / scaler[None, :, None]
    anchors_norm = (anchor_grid / scaler[:, None])[None]                 # [1,A,2]
    valid = valid_masks.astype(jnp.float32)

    cls_norm = targets_cls.sum()
    box_norm = targets_cls.sum(-1)                                       # [B,A]

    loss_cls = _bce_with_logits(predicts_cls, targets_cls).sum() / cls_norm

    ciou = _ciou_lastdim(pbox, targets_bbox, jnp.arctan)[..., 0]         # [B,A]
    loss_iou = ((1.0 - ciou) * box_norm * valid).sum() / cls_norm

    lt, rb = targets_bbox[..., :2], targets_bbox[..., 2:]
    tdist = jnp.clip(jnp.concatenate([anchors_norm - lt, rb - anchors_norm], -1),
                     0.0, reg_max - 1.01)
    lab_l = jnp.floor(tdist)
    w_l = lab_l + 1.0 - tdist
    w_r = tdist - lab_l
    m = jnp.max(predicts_anc, axis=-1, keepdims=True)
    lse = (m + jnp.log(jnp.sum(jnp.exp(predicts_anc - m),
                               axis=-1, keepdims=True)))[..., 0]
    iota = jnp.arange(reg_max, dtype=jnp.float32)
    logit_l = jnp.sum(jnp.where(iota == lab_l[..., None], predicts_anc, 0.0), -1)
    logit_r = jnp.sum(jnp.where(iota == (lab_l + 1.0)[..., None],
                                predicts_anc, 0.0), -1)
    dfl = ((lse - logit_l) * w_l + (lse - logit_r) * w_r).mean(-1)       # [B,A]
    loss_dfl = (dfl * box_norm * valid).sum() / cls_norm
    return loss_iou, loss_dfl, loss_cls


def make_anchors(image_size, strides):
    """Vec2Box-style anchor grid + per-anchor stride scaler."""
    W, H = image_size
    anchors, scalers = [], []
    for s in strides:
        shift = s // 2
        hs = np.arange(0, H, s) + shift
        ws = np.arange(0, W, s) + shift
        ah, aw = np.meshgrid(hs, ws, indexing="ij")
        anchors.append(np.stack([aw.ravel(), ah.ravel()], axis=-1))
        scalers.append(np.full((anchors[-1].shape[0],), s))
    return (np.concatenate(anchors, 0).astype(np.float32),
            np.concatenate(scalers, 0).astype(np.float32))


if __name__ == "__main__":
    B, C, R = 2, 16, 16
    image_size, strides = (64, 64), (8, 16)
    anchor_grid_np, scaler_np = make_anchors(image_size, strides)
    A = anchor_grid_np.shape[0]            # 80 anchors
    anchor_grid = jnp.asarray(anchor_grid_np)
    scaler = jnp.asarray(scaler_np)

    key = jax.random.PRNGKey(0)
    ks = jax.random.split(key, 6)
    ax = anchor_grid[None, :, 0]
    ay = anchor_grid[None, :, 1]

    predicts_cls = jax.random.normal(ks[0], (B, A, C), jnp.float32)
    predicts_anc = jax.random.normal(ks[1], (B, A, 4, R), jnp.float32)
    ext_p = jax.random.uniform(ks[2], (B, A, 4), minval=2.0, maxval=24.0)
    predicts_box = jnp.stack([ax - ext_p[..., 0], ay - ext_p[..., 1],
                              ax + ext_p[..., 2], ay + ext_p[..., 3]], axis=-1)

    # Synthetic matcher outputs (see TODO(synk) above).
    valid_masks = jax.random.uniform(ks[3], (B, A)) < 0.4
    targets_cls = (jax.random.uniform(ks[4], (B, A, C)) *
                   valid_masks[..., None].astype(jnp.float32))
    ext_t = jax.random.uniform(ks[5], (B, A, 4), minval=2.0, maxval=24.0)
    targets_box = jnp.stack([ax - ext_t[..., 0], ay - ext_t[..., 1],
                             ax + ext_t[..., 2], ay + ext_t[..., 3]], axis=-1)
    align_targets = jnp.concatenate([targets_cls, targets_box], axis=-1)

    predicts = (predicts_cls, predicts_anc, predicts_box)
    losses = yolov9_loss(predicts, align_targets, valid_masks,
                         anchor_grid, scaler, class_num=C, reg_max=R)
    losses = jax.block_until_ready(losses)

    ref = yolov9_loss_ref(predicts, align_targets, valid_masks,
                          anchor_grid, scaler, class_num=C, reg_max=R)
    # Slightly wider tolerance than before: CIoU/atan now use EUP approx
    # reciprocals (relative error ~1e-4) instead of exact divides.
    for got, want in zip(losses, ref):
        assert bool(jnp.allclose(got, want, rtol=2e-3, atol=2e-3)), (got, want)

    print("KERNEL_OK")
</pallas_src>

<mosaic_0001>
module attributes {stable_mosaic.version = 11 : i64} {
  func.func @_yolov9_loss_kernel(%arg0: i32, %arg1: i32, %arg2: memref<2x1xi32, #tpu.memory_space<smem>>, %arg3: memref<1x16x1x128xf32, #tpu.memory_space<vmem>>, %arg4: memref<1x16x1x128xf32, #tpu.memory_space<vmem>>, %arg5: memref<1x64x1x128xf32, #tpu.memory_space<vmem>>, %arg6: memref<1x9x1x128xf32, #tpu.memory_space<vmem>>, %arg7: memref<2x1x128xf32, #tpu.memory_space<vmem>>, %arg8: memref<1x1x4x128xf32, #tpu.memory_space<vmem>>) attributes {dimension_semantics = [#tpu.dimension_semantics<parallel>, #tpu.dimension_semantics<parallel>], iteration_bounds = array<i64: 2, 1>, scalar_prefetch = 1 : i64, scratch_operands = 0 : i64, tpu.core_type = #tpu.core_type<tc>, window_params = [{transform_indices = @transform_0, window_bounds = array<i64: 1, 16, 1, 128>}, {transform_indices = @transform_1, window_bounds = array<i64: 1, 16, 1, 128>}, {transform_indices = @transform_2, window_bounds = array<i64: 1, 64, 1, 128>}, {transform_indices = @transform_3, window_bounds = array<i64: 1, 9, 1, 128>}, {transform_indices = @transform_4, window_bounds = array<i64: 2, 1, 128>}, {transform_indices = @transform_5, window_bounds = array<i64: 1, 1, 4, 128>}]} {
    %0 = tpu.iota {dimensions = array<i32: 0>} : vector<1x128xi32>
    %1 = tpu.iota {dimensions = array<i32: 1>} : vector<1x128xi32>
    %c1_i32 = arith.constant 1 : i32
    %2 = arith.muli %arg1, %c1_i32 : i32
    %3 = vector.broadcast %2 : i32 to vector<1x128xi32>
    %4 = arith.addi %3, %0 : vector<1x128xi32>
    %c128_i32 = arith.constant 128 : i32
    %5 = vector.broadcast %c128_i32 : i32 to vector<1x128xi32>
    %6 = arith.muli %4, %5 : vector<1x128xi32>
    %7 = arith.addi %6, %1 : vector<1x128xi32>
    %c80_i32 = arith.constant 80 : i32
    %8 = vector.broadcast %c80_i32 : i32 to vector<1x128xi32>
    %9 = arith.cmpi slt, %7, %8 : vector<1x128xi32>
    %10 = arith.extui %9 : vector<1x128xi1> to vector<1x128xi32>
    %11 = arith.sitofp %10 : vector<1x128xi32> to vector<1x128xf32>
    %c0 = arith.constant 0 : index
    %c0_0 = arith.constant 0 : index
    %c0_1 = arith.constant 0 : index
    %c0_2 = arith.constant 0 : index
    %12 = vector.load %arg3[%c0, %c0_0, %c0_1, %c0_2] : memref<1x16x1x128xf32, #tpu.memory_space<vmem>>, vector<1x16x1x128xf32>
    %13 = vector.shape_cast %12 : vector<1x16x1x128xf32> to vector<16x1x128xf32>
    %c0_3 = arith.constant 0 : index
    %c0_4 = arith.constant 0 : index
    %c0_5 = arith.constant 0 : index
    %c0_6 = arith.constant 0 : index
    %14 = vector.load %arg4[%c0_3, %c0_4, %c0_5, %c0_6] : memref<1x16x1x128xf32, #tpu.memory_space<vmem>>, vector<1x16x1x128xf32>
    %15 = vector.shape_cast %14 : vector<1x16x1x128xf32> to vector<16x1x128xf32>
    %cst = arith.constant 0.000000e+00 : f32
    %16 = vector.broadcast %cst : f32 to vector<16x1x128xf32>
    %17 = arith.maximumf %13, %16 : vector<16x1x128xf32>
    %18 = arith.mulf %13, %15 : vector<16x1x128xf32>
    %19 = arith.subf %17, %18 : vector<16x1x128xf32>
    %20 = math.absf %13 : vector<16x1x128xf32>
    %cst_7 = arith.constant 0.000000e+00 : f32
    %21 = vector.broadcast %cst_7 : f32 to vector<16x1x128xf32>
    %22 = arith.subf %21, %20 : vector<16x1x128xf32>
    %23 = math.exp %22 : vector<16x1x128xf32>
    %24 = math.log1p %23 : vector<16x1x128xf32>
    %25 = arith.addf %19, %24 : vector<16x1x128xf32>
    %cst_8 = arith.constant dense<0.000000e+00> : vector<1x128xf32>
    %26 = vector.multi_reduction <add>, %25, %cst_8 [0] : vector<16x1x128xf32> to vector<1x128xf32>
    %cst_9 = arith.constant dense<0.000000e+00> : vector<1x128xf32>
    %27 = vector.multi_reduction <add>, %15, %cst_9 [0] : vector<16x1x128xf32> to vector<1x128xf32>
    %28 = arith.mulf %26, %11 : vector<1x128xf32>
    %cst_10 = arith.constant dense<0.000000e+00> : vector<128xf32>
    %29 = vector.multi_reduction <add>, %28, %cst_10 [0] : vector<1x128xf32> to vector<128xf32>
    %30 = vector.shape_cast %29 : vector<128xf32> to vector<1x128xf32>
    %cst_11 = arith.constant dense<0.000000e+00> : vector<128xf32>
    %31 = vector.multi_reduction <add>, %27, %cst_11 [0] : vector<1x128xf32> to vector<128xf32>
    %32 = vector.shape_cast %31 : vector<128xf32> to vector<1x128xf32>
    %cst_12 = arith.constant 0.000000e+00 : f32
    %33 = vector.broadcast %cst_12 : f32 to vector<1x128xf32>
    %34 = tpu.concatenate %30, %33, %33, %32 in 0 : vector<1x128xf32>, vector<1x128xf32>, vector<1x128xf32>, vector<1x128xf32> -> vector<4x128xf32>
    %c0_13 = arith.constant 0 : index
    %c0_14 = arith.constant 0 : index
    %c0_15 = arith.constant 0 : index
    %c0_16 = arith.constant 0 : index
    %35 = vector.load %arg8[%c0_13, %c0_14, %c0_15, %c0_16] : memref<1x1x4x128xf32, #tpu.memory_space<vmem>>, vector<1x1x4x128xf32>
    %36 = vector.shape_cast %35 : vector<1x1x4x128xf32> to vector<4x128xf32>
    %37 = vector.shape_cast %34 : vector<4x128xf32> to vector<1x1x4x128xf32>
    tpu.vector_store %arg8[%c0_13, %c0_14, %c0_15, %c0_16], %37 {strides = array<i32>} : memref<1x1x4x128xf32, #tpu.memory_space<vmem>>, vector<1x1x4x128xf32>,
    %38 = arith.index_cast %arg0 : i32 to index
    %39 = arith.index_cast %arg1 : i32 to index
    %40 = memref.load %arg2[%38, %39] : memref<2x1xi32, #tpu.memory_space<smem>>
    %c0_i32 = arith.constant 0 : i32
    %41 = arith.cmpi sgt, %40, %c0_i32 : i32
    %42 = arith.extui %41 : i1 to i32
    %c0_i32_17 = arith.constant 0 : i32
    %43 = arith.cmpi ne, %42, %c0_i32_17 : i32
    scf.if %43 {
      %c0_18 = arith.constant 0 : index
      %c0_19 = arith.constant 0 : index
      %c0_20 = arith.constant 0 : index
      %c0_21 = arith.constant 0 : index
      %44 = vector.load %arg6[%c0_18, %c0_19, %c0_20, %c0_21] : memref<1x9x1x128xf32, #tpu.memory_space<vmem>>, vector<1x1x1x128xf32>
      %45 = vector.shape_cast %44 : vector<1x1x1x128xf32> to vector<1x128xf32>
      %c0_22 = arith.constant 0 : index
      %c1 = arith.constant 1 : index
      %c0_23 = arith.constant 0 : index
      %c0_24 = arith.constant 0 : index
      %46 = vector.load %arg6[%c0_22, %c1, %c0_23, %c0_24] : memref<1x9x1x128xf32, #tpu.memory_space<vmem>>, vector<1x1x1x128xf32>
      %47 = vector.shape_cast %46 : vector<1x1x1x128xf32> to vector<1x128xf32>
      %c0_25 = arith.constant 0 : index
      %c2 = arith.constant 2 : index
      %c0_26 = arith.constant 0 : index
      %c0_27 = arith.constant 0 : index
      %48 = vector.load %arg6[%c0_25, %c2, %c0_26, %c0_27] : memref<1x9x1x128xf32, #tpu.memory_space<vmem>>, vector<1x1x1x128xf32>
      %49 = vector.shape_cast %48 : vector<1x1x1x128xf32> to vector<1x128xf32>
      %c0_28 = arith.constant 0 : index
      %c3 = arith.constant 3 : index
      %c0_29 = arith.constant 0 : index
      %c0_30 = arith.constant 0 : index
      %50 = vector.load %arg6[%c0_28, %c3, %c0_29, %c0_30] : memref<1x9x1x128xf32, #tpu.memory_space<vmem>>, vector<1x1x1x128xf32>
      %51 = vector.shape_cast %50 : vector<1x1x1x128xf32> to vector<1x128xf32>
      %c0_31 = arith.constant 0 : index
      %c4 = arith.constant 4 : index
      %c0_32 = arith.constant 0 : index
      %c0_33 = arith.constant 0 : index
      %52 = vector.load %arg6[%c0_31, %c4, %c0_32, %c0_33] : memref<1x9x1x128xf32, #tpu.memory_space<vmem>>, vector<1x1x1x128xf32>
      %53 = vector.shape_cast %52 : vector<1x1x1x128xf32> to vector<1x128xf32>
      %c0_34 = arith.constant 0 : index
      %c5 = arith.constant 5 : index
      %c0_35 = arith.constant 0 : index
      %c0_36 = arith.constant 0 : index
      %54 = vector.load %arg6[%c0_34, %c5, %c0_35, %c0_36] : memref<1x9x1x128xf32, #tpu.memory_space<vmem>>, vector<1x1x1x128xf32>
      %55 = vector.shape_cast %54 : vector<1x1x1x128xf32> to vector<1x128xf32>
      %c0_37 = arith.constant 0 : index
      %c6 = arith.constant 6 : index
      %c0_38 = arith.constant 0 : index
      %c0_39 = arith.constant 0 : index
      %56 = vector.load %arg6[%c0_37, %c6, %c0_38, %c0_39] : memref<1x9x1x128xf32, #tpu.memory_space<vmem>>, vector<1x1x1x128xf32>
      %57 = vector.shape_cast %56 : vector<1x1x1x128xf32> to vector<1x128xf32>
      %c0_40 = arith.constant 0 : index
      %c7 = arith.constant 7 : index
      %c0_41 = arith.constant 0 : index
      %c0_42 = arith.constant 0 : index
      %58 = vector.load %arg6[%c0_40, %c7, %c0_41, %c0_42] : memref<1x9x1x128xf32, #tpu.memory_space<vmem>>, vector<1x1x1x128xf32>
      %59 = vector.shape_cast %58 : vector<1x1x1x128xf32> to vector<1x128xf32>
      %c0_43 = arith.constant 0 : index
      %c8 = arith.constant 8 : index
      %c0_44 = arith.constant 0 : index
      %c0_45 = arith.constant 0 : index
      %60 = vector.load %arg6[%c0_43, %c8, %c0_44, %c0_45] : memref<1x9x1x128xf32, #tpu.memory_space<vmem>>, vector<1x1x1x128xf32>
      %61 = vector.shape_cast %60 : vector<1x1x1x128xf32> to vector<1x128xf32>
      %c0_46 = arith.constant 0 : index
      %c0_47 = arith.constant 0 : index
      %c0_48 = arith.constant 0 : index
      %62 = vector.load %arg7[%c0_46, %c0_47, %c0_48] : memref<2x1x128xf32, #tpu.memory_space<vmem>>, vector<1x1x128xf32>
      %63 = vector.shape_cast %62 : vector<1x1x128xf32> to vector<1x128xf32>
      %c1_49 = arith.constant 1 : index
      %c0_50 = arith.constant 0 : index
      %c0_51 = arith.constant 0 : index
      %64 = vector.load %arg7[%c1_49, %c0_50, %c0_51] : memref<2x1x128xf32, #tpu.memory_space<vmem>>, vector<1x1x128xf32>
      %65 = vector.shape_cast %64 : vector<1x1x128xf32> to vector<1x128xf32>
      %66 = arith.mulf %27, %61 : vector<1x128xf32>
      %67 = arith.minimumf %49, %57 : vector<1x128xf32>
      %68 = arith.maximumf %45, %53 : vector<1x128xf32>
      %69 = arith.subf %67, %68 : vector<1x128xf32>
      %cst_52 = arith.constant 0.000000e+00 : f32
      %70 = vector.broadcast %cst_52 : f32 to vector<1x128xf32>
      %71 = arith.maximumf %69, %70 : vector<1x128xf32>
      %72 = arith.minimumf %51, %59 : vector<1x128xf32>
      %73 = arith.maximumf %47, %55 : vector<1x128xf32>
      %74 = arith.subf %72, %73 : vector<1x128xf32>
      %cst_53 = arith.constant 0.000000e+00 : f32
      %75 = vector.broadcast %cst_53 : f32 to vector<1x128xf32>
      %76 = arith.maximumf %74, %75 : vector<1x128xf32>
      %77 = arith.mulf %71, %76 : vector<1x128xf32>
      %78 = arith.subf %49, %45 : vector<1x128xf32>
      %79 = arith.subf %51, %47 : vector<1x128xf32>
      %80 = arith.mulf %78, %79 : vector<1x128xf32>
      %81 = arith.subf %57, %53 : vector<1x128xf32>
      %82 = arith.subf %59, %55 : vector<1x128xf32>
      %83 = arith.mulf %81, %82 : vector<1x128xf32>
      %84 = arith.addf %80, %83 : vector<1x128xf32>
      %85 = arith.subf %84, %77 : vector<1x128xf32>
      %cst_54 = arith.constant 9.99999971E-10 : f32
      %86 = vector.broadcast %cst_54 : f32 to vector<1x128xf32>
      %87 = arith.addf %85, %86 : vector<1x128xf32>
      %88 = tpu.reciprocal %87 {approx = true} : vector<1x128xf32> -> vector<1x128xf32>
      %89 = arith.mulf %77, %88 : vector<1x128xf32>
      %90 = arith.addf %45, %49 : vector<1x128xf32>
      %91 = arith.addf %53, %57 : vector<1x128xf32>
      %92 = arith.subf %90, %91 : vector<1x128xf32>
      %cst_55 = arith.constant 5.000000e-01 : f32
      %93 = vector.broadcast %cst_55 : f32 to vector<1x128xf32>
      %94 = arith.mulf %92, %93 : vector<1x128xf32>
      %95 = arith.mulf %94, %94 : vector<1x128xf32>
      %96 = arith.addf %47, %51 : vector<1x128xf32>
      %97 = arith.addf %55, %59 : vector<1x128xf32>
      %98 = arith.subf %96, %97 : vector<1x128xf32>
      %cst_56 = arith.constant 5.000000e-01 : f32
      %99 = vector.broadcast %cst_56 : f32 to vector<1x128xf32>
      %100 = arith.mulf %98, %99 : vector<1x128xf32>
      %101 = arith.mulf %100, %100 : vector<1x128xf32>
      %102 = arith.addf %95, %101 : vector<1x128xf32>
      %103 = arith.maximumf %49, %57 : vector<1x128xf32>
      %104 = arith.minimumf %45, %53 : vector<1x128xf32>
      %105 = arith.subf %103, %104 : vector<1x128xf32>
      %106 = arith.maximumf %51, %59 : vector<1x128xf32>
      %107 = arith.minimumf %47, %55 : vector<1x128xf32>
      %108 = arith.subf %106, %107 : vector<1x128xf32>
      %109 = arith.mulf %105, %105 : vector<1x128xf32>
      %110 = arith.mulf %108, %108 : vector<1x128xf32>
      %111 = arith.addf %109, %110 : vector<1x128xf32>
      %cst_57 = arith.constant 9.99999971E-10 : f32
      %112 = vector.broadcast %cst_57 : f32 to vector<1x128xf32>
      %113 = arith.addf %111, %112 : vector<1x128xf32>
      %114 = tpu.reciprocal %113 {approx = true} : vector<1x128xf32> -> vector<1x128xf32>
      %115 = arith.mulf %102, %114 : vector<1x128xf32>
      %116 = arith.subf %89, %115 : vector<1x128xf32>
      %117 = arith.subf %49, %45 : vector<1x128xf32>
      %118 = arith.subf %51, %47 : vector<1x128xf32>
      %cst_58 = arith.constant 9.99999971E-10 : f32
      %119 = vector.broadcast %cst_58 : f32 to vector<1x128xf32>
      %120 = arith.addf %118, %119 : vector<1x128xf32>
      %121 = tpu.reciprocal %120 {approx = true} : vector<1x128xf32> -> vector<1x128xf32>
      %122 = arith.mulf %117, %121 : vector<1x128xf32>
      %cst_59 = arith.constant 0.000000e+00 : f32
      %123 = vector.broadcast %cst_59 : f32 to vector<1x128xf32>
      %124 = arith.cmpf olt, %122, %123 : vector<1x128xf32>
      %cst_60 = arith.constant 0.000000e+00 : f32
      %125 = vector.broadcast %cst_60 : f32 to vector<1x128xf32>
      %126 = arith.cmpf ogt, %122, %125 : vector<1x128xf32>
      %cst_61 = arith.constant 1.000000e+00 : f32
      %cst_62 = arith.constant 0.000000e+00 : f32
      %127 = vector.broadcast %cst_61 : f32 to vector<1x128xf32>
      %128 = vector.broadcast %cst_62 : f32 to vector<1x128xf32>
      %129 = arith.select %126, %127, %128 : vector<1x128xi1>, vector<1x128xf32>
      %cst_63 = arith.constant -1.000000e+00 : f32
      %130 = vector.broadcast %cst_63 : f32 to vector<1x128xf32>
      %131 = arith.select %124, %130, %129 : vector<1x128xi1>, vector<1x128xf32>
      %132 = math.absf %122 : vector<1x128xf32>
      %cst_64 = arith.constant 2.41421366 : f32
      %133 = vector.broadcast %cst_64 : f32 to vector<1x128xf32>
      %134 = arith.cmpf ogt, %132, %133 : vector<1x128xf32>
      %cst_65 = arith.constant 0.414213568 : f32
      %135 = vector.broadcast %cst_65 : f32 to vector<1x128xf32>
      %136 = arith.cmpf ogt, %132, %135 : vector<1x128xf32>
      %cst_66 = arith.constant dense<true> : vector<1x128xi1>
      %137 = arith.xori %134, %cst_66 : vector<1x128xi1>
      %138 = arith.andi %136, %137 : vector<1x128xi1>
      %cst_67 = arith.constant 1.000000e+00 : f32
      %139 = vector.broadcast %cst_67 : f32 to vector<1x128xf32>
      %140 = arith.select %134, %132, %139 : vector<1x128xi1>, vector<1x128xf32>
      %141 = tpu.reciprocal %140 {approx = true} : vector<1x128xf32> -> vector<1x128xf32>
      %cst_68 = arith.constant 0.000000e+00 : f32
      %142 = vector.broadcast %cst_68 : f32 to vector<1x128xf32>
      %143 = arith.subf %142, %141 : vector<1x128xf32>
      %cst_69 = arith.constant 1.000000e+00 : f32
      %144 = vector.broadcast %cst_69 : f32 to vector<1x128xf32>
      %145 = arith.subf %132, %144 : vector<1x128xf32>
      %cst_70 = arith.constant 1.000000e+00 : f32
      %146 = vector.broadcast %cst_70 : f32 to vector<1x128xf32>
      %147 = arith.addf %132, %146 : vector<1x128xf32>
      %148 = tpu.reciprocal %147 {approx = true} : vector<1x128xf32> -> vector<1x128xf32>
      %149 = arith.mulf %145, %148 : vector<1x128xf32>
      %150 = arith.select %138, %149, %132 : vector<1x128xi1>, vector<1x128xf32>
      %151 = arith.select %134, %143, %150 : vector<1x128xi1>, vector<1x128xf32>
      %cst_71 = arith.constant 0.785398185 : f32
      %cst_72 = arith.constant 0.000000e+00 : f32
      %152 = vector.broadcast %cst_71 : f32 to vector<1x128xf32>
      %153 = vector.broadcast %cst_72 : f32 to vector<1x128xf32>
      %154 = arith.select %138, %152, %153 : vector<1x128xi1>, vector<1x128xf32>
      %cst_73 = arith.constant 1.57079637 : f32
      %155 = vector.broadcast %cst_73 : f32 to vector<1x128xf32>
      %156 = arith.select %134, %155, %154 : vector<1x128xi1>, vector<1x128xf32>
      %157 = arith.mulf %151, %151 : vector<1x128xf32>
      %cst_74 = arith.constant 0.0805374458 : f32
      %158 = vector.broadcast %cst_74 : f32 to vector<1x128xf32>
      %159 = arith.mulf %158, %157 : vector<1x128xf32>
      %cst_75 = arith.constant 0.138776854 : f32
      %160 = vector.broadcast %cst_75 : f32 to vector<1x128xf32>
      %161 = arith.subf %159, %160 : vector<1x128xf32>
      %162 = arith.mulf %161, %157 : vector<1x128xf32>
      %cst_76 = arith.constant 0.199777111 : f32
      %163 = vector.broadcast %cst_76 : f32 to vector<1x128xf32>
      %164 = arith.addf %162, %163 : vector<1x128xf32>
      %165 = arith.mulf %164, %157 : vector<1x128xf32>
      %cst_77 = arith.constant 0.333329499 : f32
      %166 = vector.broadcast %cst_77 : f32 to vector<1x128xf32>
      %167 = arith.subf %165, %166 : vector<1x128xf32>
      %168 = arith.mulf %167, %157 : vector<1x128xf32>
      %169 = arith.mulf %168, %151 : vector<1x128xf32>
      %170 = arith.addf %169, %151 : vector<1x128xf32>
      %171 = arith.addf %170, %156 : vector<1x128xf32>
      %172 = arith.mulf %131, %171 : vector<1x128xf32>
      %173 = arith.subf %57, %53 : vector<1x128xf32>
      %174 = arith.subf %59, %55 : vector<1x128xf32>
      %cst_78 = arith.constant 9.99999971E-10 : f32
      %175 = vector.broadcast %cst_78 : f32 to vector<1x128xf32>
      %176 = arith.addf %174, %175 : vector<1x128xf32>
      %177 = tpu.reciprocal %176 {approx = true} : vector<1x128xf32> -> vector<1x128xf32>
      %178 = arith.mulf %173, %177 : vector<1x128xf32>
      %cst_79 = arith.constant 0.000000e+00 : f32
      %179 = vector.broadcast %cst_79 : f32 to vector<1x128xf32>
      %180 = arith.cmpf olt, %178, %179 : vector<1x128xf32>
      %cst_80 = arith.constant 0.000000e+00 : f32
      %181 = vector.broadcast %cst_80 : f32 to vector<1x128xf32>
      %182 = arith.cmpf ogt, %178, %181 : vector<1x128xf32>
      %cst_81 = arith.constant 1.000000e+00 : f32
      %cst_82 = arith.constant 0.000000e+00 : f32
      %183 = vector.broadcast %cst_81 : f32 to vector<1x128xf32>
      %184 = vector.broadcast %cst_82 : f32 to vector<1x128xf32>
      %185 = arith.select %182, %183, %184 : vector<1x128xi1>, vector<1x128xf32>
      %cst_83 = arith.constant -1.000000e+00 : f32
      %186 = vector.broadcast %cst_83 : f32 to vector<1x128xf32>
      %187 = arith.select %180, %186, %185 : vector<1x128xi1>, vector<1x128xf32>
      %188 = math.absf %178 : vector<1x128xf32>
      %cst_84 = arith.constant 2.41421366 : f32
      %189 = vector.broadcast %cst_84 : f32 to vector<1x128xf32>
      %190 = arith.cmpf ogt, %188, %189 : vector<1x128xf32>
      %cst_85 = arith.constant 0.414213568 : f32
      %191 = vector.broadcast %cst_85 : f32 to vector<1x128xf32>
      %192 = arith.cmpf ogt, %188, %191 : vector<1x128xf32>
      %cst_86 = arith.constant dense<true> : vector<1x128xi1>
      %193 = arith.xori %190, %cst_86 : vector<1x128xi1>
      %194 = arith.andi %192, %193 : vector<1x128xi1>
      %cst_87 = arith.constant 1.000000e+00 : f32
      %195 = vector.broadcast %cst_87 : f32 to vector<1x128xf32>
      %196 = arith.select %190, %188, %195 : vector<1x128xi1>, vector<1x128xf32>
      %197 = tpu.reciprocal %196 {approx = true} : vector<1x128xf32> -> vector<1x128xf32>
      %cst_88 = arith.constant 0.000000e+00 : f32
      %198 = vector.broadcast %cst_88 : f32 to vector<1x128xf32>
      %199 = arith.subf %198, %197 : vector<1x128xf32>
      %cst_89 = arith.constant 1.000000e+00 : f32
      %200 = vector.broadcast %cst_89 : f32 to vector<1x128xf32>
      %201 = arith.subf %188, %200 : vector<1x128xf32>
      %cst_90 = arith.constant 1.000000e+00 : f32
      %202 = vector.broadcast %cst_90 : f32 to vector<1x128xf32>
      %203 = arith.addf %188, %202 : vector<1x128xf32>
      %204 = tpu.reciprocal %203 {approx = true} : vector<1x128xf32> -> vector<1x128xf32>
      %205 = arith.mulf %201, %204 : vector<1x128xf32>
      %206 = arith.select %194, %205, %188 : vector<1x128xi1>, vector<1x128xf32>
      %207 = arith.select %190, %199, %206 : vector<1x128xi1>, vector<1x128xf32>
      %cst_91 = arith.constant 0.785398185 : f32
      %cst_92 = arith.constant 0.000000e+00 : f32
      %208 = vector.broadcast %cst_91 : f32 to vector<1x128xf32>
      %209 = vector.broadcast %cst_92 : f32 to vector<1x128xf32>
      %210 = arith.select %194, %208, %209 : vector<1x128xi1>, vector<1x128xf32>
      %cst_93 = arith.constant 1.57079637 : f32
      %211 = vector.broadcast %cst_93 : f32 to vector<1x128xf32>
      %212 = arith.select %190, %211, %210 : vector<1x128xi1>, vector<1x128xf32>
      %213 = arith.mulf %207, %207 : vector<1x128xf32>
      %cst_94 = arith.constant 0.0805374458 : f32
      %214 = vector.broadcast %cst_94 : f32 to vector<1x128xf32>
      %215 = arith.mulf %214, %213 : vector<1x128xf32>
      %cst_95 = arith.constant 0.138776854 : f32
      %216 = vector.broadcast %cst_95 : f32 to vector<1x128xf32>
      %217 = arith.subf %215, %216 : vector<1x128xf32>
      %218 = arith.mulf %217, %213 : vector<1x128xf32>
      %cst_96 = arith.constant 0.199777111 : f32
      %219 = vector.broadcast %cst_96 : f32 to vector<1x128xf32>
      %220 = arith.addf %218, %219 : vector<1x128xf32>
      %221 = arith.mulf %220, %213 : vector<1x128xf32>
      %cst_97 = arith.constant 0.333329499 : f32
      %222 = vector.broadcast %cst_97 : f32 to vector<1x128xf32>
      %223 = arith.subf %221, %222 : vector<1x128xf32>
      %224 = arith.mulf %223, %213 : vector<1x128xf32>
      %225 = arith.mulf %224, %207 : vector<1x128xf32>
      %226 = arith.addf %225, %207 : vector<1x128xf32>
      %227 = arith.addf %226, %212 : vector<1x128xf32>
      %228 = arith.mulf %187, %227 : vector<1x128xf32>
      %229 = arith.subf %172, %228 : vector<1x128xf32>
      %cst_98 = arith.constant 0.405284733 : f32
      %230 = vector.broadcast %cst_98 : f32 to vector<1x128xf32>
      %231 = arith.mulf %230, %229 : vector<1x128xf32>
      %232 = arith.mulf %231, %229 : vector<1x128xf32>
      %233 = arith.subf %232, %89 : vector<1x128xf32>
      %cst_99 = arith.constant 1.000000e+00 : f32
      %234 = vector.broadcast %cst_99 : f32 to vector<1x128xf32>
      %235 = arith.addf %233, %234 : vector<1x128xf32>
      %cst_100 = arith.constant 9.99999971E-10 : f32
      %236 = vector.broadcast %cst_100 : f32 to vector<1x128xf32>
      %237 = arith.addf %235, %236 : vector<1x128xf32>
      %238 = tpu.reciprocal %237 {approx = true} : vector<1x128xf32> -> vector<1x128xf32>
      %239 = arith.mulf %232, %238 : vector<1x128xf32>
      %240 = arith.mulf %239, %232 : vector<1x128xf32>
      %241 = arith.subf %116, %240 : vector<1x128xf32>
      %cst_101 = arith.constant 1.000000e+00 : f32
      %242 = vector.broadcast %cst_101 : f32 to vector<1x128xf32>
      %243 = arith.subf %242, %241 : vector<1x128xf32>
      %244 = arith.mulf %243, %66 : vector<1x128xf32>
      %cst_102 = arith.constant dense<0.000000e+00> : vector<128xf32>
      %245 = vector.multi_reduction <add>, %244, %cst_102 [0] : vector<1x128xf32> to vector<128xf32>
      %246 = vector.shape_cast %245 : vector<128xf32> to vector<1x128xf32>
      %247 = arith.subf %63, %53 : vector<1x128xf32>
      %248 = arith.subf %65, %55 : vector<1x128xf32>
      %249 = arith.subf %57, %63 : vector<1x128xf32>
      %250 = arith.subf %59, %65 : vector<1x128xf32>
      %251 = tpu.iota {dimensions = array<i32: 0>} : vector<16x1x128xi32>
      %cst_103 = arith.constant 0.000000e+00 : f32
      %252 = vector.broadcast %cst_103 : f32 to vector<1x128xf32>
      %cst_104 = arith.constant 0.000000e+00 : f32
      %cst_105 = arith.constant 1.499000e+01 : f32
      %253 = vector.broadcast %cst_104 : f32 to vector<1x128xf32>
      %254 = arith.maximumf %253, %247 : vector<1x128xf32>
      %255 = vector.broadcast %cst_105 : f32 to vector<1x128xf32>
      %256 = arith.minimumf %255, %254 : vector<1x128xf32>
      %257 = math.floor %256 : vector<1x128xf32>
      %cst_106 = arith.constant 1.000000e+00 : f32
      %258 = vector.broadcast %cst_106 : f32 to vector<1x128xf32>
      %259 = arith.addf %257, %258 : vector<1x128xf32>
      %260 = arith.subf %259, %256 : vector<1x128xf32>
      %261 = arith.subf %256, %257 : vector<1x128xf32>
      %262 = arith.fptosi %257 : vector<1x128xf32> to vector<1x128xi32>
      %c0_107 = arith.constant 0 : index
      %c0_108 = arith.constant 0 : index
      %c0_109 = arith.constant 0 : index
      %c0_110 = arith.constant 0 : index
      %263 = vector.load %arg5[%c0_107, %c0_108, %c0_109, %c0_110] : memref<1x64x1x128xf32, #tpu.memory_space<vmem>>, vector<1x16x1x128xf32>
      %264 = vector.shape_cast %263 : vector<1x16x1x128xf32> to vector<16x1x128xf32>
      %cst_111 = arith.constant dense<0xFF800000> : vector<1x128xf32>
      %265 = vector.multi_reduction <maximumf>, %264, %cst_111 [0] : vector<16x1x128xf32> to vector<1x128xf32>
      %266 = vector.shape_cast %265 : vector<1x128xf32> to vector<1x1x128xf32>
      %267 = vector.broadcast %266 : vector<1x1x128xf32> to vector<16x1x128xf32>
      %268 = arith.subf %264, %267 : vector<16x1x128xf32>
      %269 = math.exp %268 : vector<16x1x128xf32>
      %cst_112 = arith.constant dense<0.000000e+00> : vector<1x128xf32>
      %270 = vector.multi_reduction <add>, %269, %cst_112 [0] : vector<16x1x128xf32> to vector<1x128xf32>
      %271 = math.log %270 : vector<1x128xf32>
      %272 = arith.addf %265, %271 : vector<1x128xf32>
      %273 = vector.shape_cast %262 : vector<1x128xi32> to vector<1x1x128xi32>
      %274 = vector.broadcast %273 : vector<1x1x128xi32> to vector<16x1x128xi32>
      %275 = arith.cmpi eq, %251, %274 : vector<16x1x128xi32>
      %cst_113 = arith.constant 0.000000e+00 : f32
      %276 = vector.broadcast %cst_113 : f32 to vector<16x1x128xf32>
      %277 = arith.select %275, %264, %276 : vector<16x1x128xi1>, vector<16x1x128xf32>
      %cst_114 = arith.constant dense<0.000000e+00> : vector<1x128xf32>
      %278 = vector.multi_reduction <add>, %277, %cst_114 [0] : vector<16x1x128xf32> to vector<1x128xf32>
      %c1_i32_115 = arith.constant 1 : i32
      %279 = vector.broadcast %c1_i32_115 : i32 to vector<1x128xi32>
      %280 = arith.addi %262, %279 : vector<1x128xi32>
      %281 = vector.shape_cast %280 : vector<1x128xi32> to vector<1x1x128xi32>
      %282 = vector.broadcast %281 : vector<1x1x128xi32> to vector<16x1x128xi32>
      %283 = arith.cmpi eq, %251, %282 : vector<16x1x128xi32>
      %cst_116 = arith.constant 0.000000e+00 : f32
      %284 = vector.broadcast %cst_116 : f32 to vector<16x1x128xf32>
      %285 = arith.select %283, %264, %284 : vector<16x1x128xi1>, vector<16x1x128xf32>
      %cst_117 = arith.constant dense<0.000000e+00> : vector<1x128xf32>
      %286 = vector.multi_reduction <add>, %285, %cst_117 [0] : vector<16x1x128xf32> to vector<1x128xf32>
      %287 = arith.subf %272, %278 : vector<1x128xf32>
      %288 = arith.mulf %287, %260 : vector<1x128xf32>
      %289 = arith.addf %252, %288 : vector<1x128xf32>
      %290 = arith.subf %272, %286 : vector<1x128xf32>
      %291 = arith.mulf %290, %261 : vector<1x128xf32>
      %292 = arith.addf %289, %291 : vector<1x128xf32>
      %cst_118 = arith.constant 0.000000e+00 : f32
      %cst_119 = arith.constant 1.499000e+01 : f32
      %293 = vector.broadcast %cst_118 : f32 to vector<1x128xf32>
      %294 = arith.maximumf %293, %248 : vector<1x128xf32>
      %295 = vector.broadcast %cst_119 : f32 to vector<1x128xf32>
      %296 = arith.minimumf %295, %294 : vector<1x128xf32>
      %297 = math.floor %296 : vector<1x128xf32>
      %cst_120 = arith.constant 1.000000e+00 : f32
      %298 = vector.broadcast %cst_120 : f32 to vector<1x128xf32>
      %299 = arith.addf %297, %298 : vector<1x128xf32>
      %300 = arith.subf %299, %296 : vector<1x128xf32>
      %301 = arith.subf %296, %297 : vector<1x128xf32>
      %302 = arith.fptosi %297 : vector<1x128xf32> to vector<1x128xi32>
      %c0_121 = arith.constant 0 : index
      %c16 = arith.constant 16 : index
      %c0_122 = arith.constant 0 : index
      %c0_123 = arith.constant 0 : index
      %303 = vector.load %arg5[%c0_121, %c16, %c0_122, %c0_123] : memref<1x64x1x128xf32, #tpu.memory_space<vmem>>, vector<1x16x1x128xf32>
      %304 = vector.shape_cast %303 : vector<1x16x1x128xf32> to vector<16x1x128xf32>
      %cst_124 = arith.constant dense<0xFF800000> : vector<1x128xf32>
      %305 = vector.multi_reduction <maximumf>, %304, %cst_124 [0] : vector<16x1x128xf32> to vector<1x128xf32>
      %306 = vector.shape_cast %305 : vector<1x128xf32> to vector<1x1x128xf32>
      %307 = vector.broadcast %306 : vector<1x1x128xf32> to vector<16x1x128xf32>
      %308 = arith.subf %304, %307 : vector<16x1x128xf32>
      %309 = math.exp %308 : vector<16x1x128xf32>
      %cst_125 = arith.constant dense<0.000000e+00> : vector<1x128xf32>
      %310 = vector.multi_reduction <add>, %309, %cst_125 [0] : vector<16x1x128xf32> to vector<1x128xf32>
      %311 = math.log %310 : vector<1x128xf32>
      %312 = arith.addf %305, %311 : vector<1x128xf32>
      %313 = vector.shape_cast %302 : vector<1x128xi32> to vector<1x1x128xi32>
      %314 = vector.broadcast %313 : vector<1x1x128xi32> to vector<16x1x128xi32>
      %315 = arith.cmpi eq, %251, %314 : vector<16x1x128xi32>
      %cst_126 = arith.constant 0.000000e+00 : f32
      %316 = vector.broadcast %cst_126 : f32 to vector<16x1x128xf32>
      %317 = arith.select %315, %304, %316 : vector<16x1x128xi1>, vector<16x1x128xf32>
      %cst_127 = arith.constant dense<0.000000e+00> : vector<1x128xf32>
      %318 = vector.multi_reduction <add>, %317, %cst_127 [0] : vector<16x1x128xf32> to vector<1x128xf32>
      %c1_i32_128 = arith.constant 1 : i32
      %319 = vector.broadcast %c1_i32_128 : i32 to vector<1x128xi32>
      %320 = arith.addi %302, %319 : vector<1x128xi32>
      %321 = vector.shape_cast %320 : vector<1x128xi32> to vector<1x1x128xi32>
      %322 = vector.broadcast %321 : vector<1x1x128xi32> to vector<16x1x128xi32>
      %323 = arith.cmpi eq, %251, %322 : vector<16x1x128xi32>
      %cst_129 = arith.constant 0.000000e+00 : f32
      %324 = vector.broadcast %cst_129 : f32 to vector<16x1x128xf32>
      %325 = arith.select %323, %304, %324 : vector<16x1x128xi1>, vector<16x1x128xf32>
      %cst_130 = arith.constant dense<0.000000e+00> : vector<1x128xf32>
      %326 = vector.multi_reduction <add>, %325, %cst_130 [0] : vector<16x1x128xf32> to vector<1x128xf32>
      %327 = arith.subf %312, %318 : vector<1x128xf32>
      %328 = arith.mulf %327, %300 : vector<1x128xf32>
      %329 = arith.addf %292, %328 : vector<1x128xf32>
      %330 = arith.subf %312, %326 : vector<1x128xf32>
      %331 = arith.mulf %330, %301 : vector<1x128xf32>
      %332 = arith.addf %329, %331 : vector<1x128xf32>
      %cst_131 = arith.constant 0.000000e+00 : f32
      %cst_132 = arith.constant 1.499000e+01 : f32
      %333 = vector.broadcast %cst_131 : f32 to vector<1x128xf32>
      %334 = arith.maximumf %333, %249 : vector<1x128xf32>
      %335 = vector.broadcast %cst_132 : f32 to vector<1x128xf32>
      %336 = arith.minimumf %335, %334 : vector<1x128xf32>
      %337 = math.floor %336 : vector<1x128xf32>
      %cst_133 = arith.constant 1.000000e+00 : f32
      %338 = vector.broadcast %cst_133 : f32 to vector<1x128xf32>
      %339 = arith.addf %337, %338 : vector<1x128xf32>
      %340 = arith.subf %339, %336 : vector<1x128xf32>
      %341 = arith.subf %336, %337 : vector<1x128xf32>
      %342 = arith.fptosi %337 : vector<1x128xf32> to vector<1x128xi32>
      %c0_134 = arith.constant 0 : index
      %c32 = arith.constant 32 : index
      %c0_135 = arith.constant 0 : index
      %c0_136 = arith.constant 0 : index
      %343 = vector.load %arg5[%c0_134, %c32, %c0_135, %c0_136] : memref<1x64x1x128xf32, #tpu.memory_space<vmem>>, vector<1x16x1x128xf32>
      %344 = vector.shape_cast %343 : vector<1x16x1x128xf32> to vector<16x1x128xf32>
      %cst_137 = arith.constant dense<0xFF800000> : vector<1x128xf32>
      %345 = vector.multi_reduction <maximumf>, %344, %cst_137 [0] : vector<16x1x128xf32> to vector<1x128xf32>
      %346 = vector.shape_cast %345 : vector<1x128xf32> to vector<1x1x128xf32>
      %347 = vector.broadcast %346 : vector<1x1x128xf32> to vector<16x1x128xf32>
      %348 = arith.subf %344, %347 : vector<16x1x128xf32>
      %349 = math.exp %348 : vector<16x1x128xf32>
      %cst_138 = arith.constant dense<0.000000e+00> : vector<1x128xf32>
      %350 = vector.multi_reduction <add>, %349, %cst_138 [0] : vector<16x1x128xf32> to vector<1x128xf32>
      %351 = math.log %350 : vector<1x128xf32>
      %352 = arith.addf %345, %351 : vector<1x128xf32>
      %353 = vector.shape_cast %342 : vector<1x128xi32> to vector<1x1x128xi32>
      %354 = vector.broadcast %353 : vector<1x1x128xi32> to vector<16x1x128xi32>
      %355 = arith.cmpi eq, %251, %354 : vector<16x1x128xi32>
      %cst_139 = arith.constant 0.000000e+00 : f32
      %356 = vector.broadcast %cst_139 : f32 to vector<16x1x128xf32>
      %357 = arith.select %355, %344, %356 : vector<16x1x128xi1>, vector<16x1x128xf32>
      %cst_140 = arith.constant dense<0.000000e+00> : vector<1x128xf32>
      %358 = vector.multi_reduction <add>, %357, %cst_140 [0] : vector<16x1x128xf32> to vector<1x128xf32>
      %c1_i32_141 = arith.constant 1 : i32
      %359 = vector.broadcast %c1_i32_141 : i32 to vector<1x128xi32>
      %360 = arith.addi %342, %359 : vector<1x128xi32>
      %361 = vector.shape_cast %360 : vector<1x128xi32> to vector<1x1x128xi32>
      %362 = vector.broadcast %361 : vector<1x1x128xi32> to vector<16x1x128xi32>
      %363 = arith.cmpi eq, %251, %362 : vector<16x1x128xi32>
      %cst_142 = arith.constant 0.000000e+00 : f32
      %364 = vector.broadcast %cst_142 : f32 to vector<16x1x128xf32>
      %365 = arith.select %363, %344, %364 : vector<16x1x128xi1>, vector<16x1x128xf32>
      %cst_143 = arith.constant dense<0.000000e+00> : vector<1x128xf32>
      %366 = vector.multi_reduction <add>, %365, %cst_143 [0] : vector<16x1x128xf32> to vector<1x128xf32>
      %367 = arith.subf %352, %358 : vector<1x128xf32>
      %368 = arith.mulf %367, %340 : vector<1x128xf32>
      %369 = arith.addf %332, %368 : vector<1x128xf32>
      %370 = arith.subf %352, %366 : vector<1x128xf32>
      %371 = arith.mulf %370, %341 : vector<1x128xf32>
      %372 = arith.addf %369, %371 : vector<1x128xf32>
      %cst_144 = arith.constant 0.000000e+00 : f32
      %cst_145 = arith.constant 1.499000e+01 : f32
      %373 = vector.broadcast %cst_144 : f32 to vector<1x128xf32>
      %374 = arith.maximumf %373, %250 : vector<1x128xf32>
      %375 = vector.broadcast %cst_145 : f32 to vector<1x128xf32>
      %376 = arith.minimumf %375, %374 : vector<1x128xf32>
      %377 = math.floor %376 : vector<1x128xf32>
      %cst_146 = arith.constant 1.000000e+00 : f32
      %378 = vector.broadcast %cst_146 : f32 to vector<1x128xf32>
      %379 = arith.addf %377, %378 : vector<1x128xf32>
      %380 = arith.subf %379, %376 : vector<1x128xf32>
      %381 = arith.subf %376, %377 : vector<1x128xf32>
      %382 = arith.fptosi %377 : vector<1x128xf32> to vector<1x128xi32>
      %c0_147 = arith.constant 0 : index
      %c48 = arith.constant 48 : index
      %c0_148 = arith.constant 0 : index
      %c0_149 = arith.constant 0 : index
      %383 = vector.load %arg5[%c0_147, %c48, %c0_148, %c0_149] : memref<1x64x1x128xf32, #tpu.memory_space<vmem>>, vector<1x16x1x128xf32>
      %384 = vector.shape_cast %383 : vector<1x16x1x128xf32> to vector<16x1x128xf32>
      %cst_150 = arith.constant dense<0xFF800000> : vector<1x128xf32>
      %385 = vector.multi_reduction <maximumf>, %384, %cst_150 [0] : vector<16x1x128xf32> to vector<1x128xf32>
      %386 = vector.shape_cast %385 : vector<1x128xf32> to vector<1x1x128xf32>
      %387 = vector.broadcast %386 : vector<1x1x128xf32> to vector<16x1x128xf32>
      %388 = arith.subf %384, %387 : vector<16x1x128xf32>
      %389 = math.exp %388 : vector<16x1x128xf32>
      %cst_151 = arith.constant dense<0.000000e+00> : vector<1x128xf32>
      %390 = vector.multi_reduction <add>, %389, %cst_151 [0] : vector<16x1x128xf32> to vector<1x128xf32>
      %391 = math.log %390 : vector<1x128xf32>
      %392 = arith.addf %385, %391 : vector<1x128xf32>
      %393 = vector.shape_cast %382 : vector<1x128xi32> to vector<1x1x128xi32>
      %394 = vector.broadcast %393 : vector<1x1x128xi32> to vector<16x1x128xi32>
      %395 = arith.cmpi eq, %251, %394 : vector<16x1x128xi32>
      %cst_152 = arith.constant 0.000000e+00 : f32
      %396 = vector.broadcast %cst_152 : f32 to vector<16x1x128xf32>
      %397 = arith.select %395, %384, %396 : vector<16x1x128xi1>, vector<16x1x128xf32>
      %cst_153 = arith.constant dense<0.000000e+00> : vector<1x128xf32>
      %398 = vector.multi_reduction <add>, %397, %cst_153 [0] : vector<16x1x128xf32> to vector<1x128xf32>
      %c1_i32_154 = arith.constant 1 : i32
      %399 = vector.broadcast %c1_i32_154 : i32 to vector<1x128xi32>
      %400 = arith.addi %382, %399 : vector<1x128xi32>
      %401 = vector.shape_cast %400 : vector<1x128xi32> to vector<1x1x128xi32>
      %402 = vector.broadcast %401 : vector<1x1x128xi32> to vector<16x1x128xi32>
      %403 = arith.cmpi eq, %251, %402 : vector<16x1x128xi32>
      %cst_155 = arith.constant 0.000000e+00 : f32
      %404 = vector.broadcast %cst_155 : f32 to vector<16x1x128xf32>
      %405 = arith.select %403, %384, %404 : vector<16x1x128xi1>, vector<16x1x128xf32>
      %cst_156 = arith.constant dense<0.000000e+00> : vector<1x128xf32>
      %406 = vector.multi_reduction <add>, %405, %cst_156 [0] : vector<16x1x128xf32> to vector<1x128xf32>
      %407 = arith.subf %392, %398 : vector<1x128xf32>
      %408 = arith.mulf %407, %380 : vector<1x128xf32>
      %409 = arith.addf %372, %408 : vector<1x128xf32>
      %410 = arith.subf %392, %406 : vector<1x128xf32>
      %411 = arith.mulf %410, %381 : vector<1x128xf32>
      %412 = arith.addf %409, %411 : vector<1x128xf32>
      %cst_157 = arith.constant 2.500000e-01 : f32
      %413 = vector.broadcast %cst_157 : f32 to vector<1x128xf32>
      %414 = arith.mulf %412, %413 : vector<1x128xf32>
      %415 = arith.mulf %414, %66 : vector<1x128xf32>
      %cst_158 = arith.constant dense<0.000000e+00> : vector<128xf32>
      %416 = vector.multi_reduction <add>, %415, %cst_158 [0] : vector<1x128xf32> to vector<128xf32>
      %417 = vector.shape_cast %416 : vector<128xf32> to vector<1x128xf32>
      %418 = tpu.concatenate %30, %246, %417, %32 in 0 : vector<1x128xf32>, vector<1x128xf32>, vector<1x128xf32>, vector<1x128xf32> -> vector<4x128xf32>
      %c0_159 = arith.constant 0 : index
      %c0_160 = arith.constant 0 : index
      %c0_161 = arith.constant 0 : index
      %c0_162 = arith.constant 0 : index
      %419 = vector.load %arg8[%c0_159, %c0_160, %c0_161, %c0_162] : memref<1x1x4x128xf32, #tpu.memory_space<vmem>>, vector<1x1x4x128xf32>
      %420 = vector.shape_cast %419 : vector<1x1x4x128xf32> to vector<4x128xf32>
      %421 = vector.shape_cast %418 : vector<4x128xf32> to vector<1x1x4x128xf32>
      tpu.vector_store %arg8[%c0_159, %c0_160, %c0_161, %c0_162], %421 {strides = array<i32>} : memref<1x1x4x128xf32, #tpu.memory_space<vmem>>, vector<1x1x4x128xf32>,
    } else {
    }
    return
  }
  func.func @transform_0(%arg0: i32, %arg1: i32, %arg2: memref<2x1xi32, #tpu.memory_space<smem>>) -> (i32, i32, i32, i32) {
    %c0_i32 = arith.constant 0 : i32
    %c0_i32_0 = arith.constant 0 : i32
    %c0_i32_1 = arith.constant 0 : i32
    return %arg0, %c0_i32, %arg1, %c0_i32_0 : i32, i32, i32, i32
  }
  func.func @transform_1(%arg0: i32, %arg1: i32, %arg2: memref<2x1xi32, #tpu.memory_space<smem>>) -> (i32, i32, i32, i32) {
    %c0_i32 = arith.constant 0 : i32
    %c0_i32_0 = arith.constant 0 : i32
    %c0_i32_1 = arith.constant 0 : i32
    return %arg0, %c0_i32, %arg1, %c0_i32_0 : i32, i32, i32, i32
  }
  func.func @transform_2(%arg0: i32, %arg1: i32, %arg2: memref<2x1xi32, #tpu.memory_space<smem>>) -> (i32, i32, i32, i32) {
    %c0_i32 = arith.constant 0 : i32
    %c0_i32_0 = arith.constant 0 : i32
    %c0_i32_1 = arith.constant 0 : i32
    return %arg0, %c0_i32, %arg1, %c0_i32_0 : i32, i32, i32, i32
  }
  func.func @transform_3(%arg0: i32, %arg1: i32, %arg2: memref<2x1xi32, #tpu.memory_space<smem>>) -> (i32, i32, i32, i32) {
    %c0_i32 = arith.constant 0 : i32
    %c0_i32_0 = arith.constant 0 : i32
    %c0_i32_1 = arith.constant 0 : i32
    return %arg0, %c0_i32, %arg1, %c0_i32_0 : i32, i32, i32, i32
  }
  func.func @transform_4(%arg0: i32, %arg1: i32, %arg2: memref<2x1xi32, #tpu.memory_space<smem>>) -> (i32, i32, i32) {
    %c0_i32 = arith.constant 0 : i32
    %c0_i32_0 = arith.constant 0 : i32
    %c0_i32_1 = arith.constant 0 : i32
    return %c0_i32, %arg1, %c0_i32_0 : i32, i32, i32
  }
  func.func @transform_5(%arg0: i32, %arg1: i32, %arg2: memref<2x1xi32, #tpu.memory_space<smem>>) -> (i32, i32, i32, i32) {
    %c0_i32 = arith.constant 0 : i32
    %c0_i32_0 = arith.constant 0 : i32
    %c0_i32_1 = arith.constant 0 : i32
    return %arg0, %arg1, %c0_i32, %c0_i32_0 : i32, i32, i32, i32
  }
}

</mosaic_0001>

<bundles_post_ra>
// kernel: tpu_custom_call.1
= control target key start
LH: loop header
LB: loop body
LE: loop exit
PB: predicated region body
PF: predicated region fallthrough
CT: control target
= control target key end

     0   :  { %s5272_s0 = inlined_call_operand.vmem [shape: s32[2,1], index: 0, kind: input, shape index: {}]   ;;  %s5273_s1 = inlined_call_operand.hbm [shape: f32[2,16,1,128], index: 1, kind: input, shape index: {}]   ;;  %s5274_s2 = inlined_call_operand.hbm [shape: f32[2,16,1,128], index: 2, kind: input, shape index: {}]   ;;  %s5275_s3 = inlined_call_operand.hbm [shape: f32[2,64,1,128], index: 3, kind: input, shape index: {}]   ;;  %s5276_s4 = inlined_call_operand.vmem [shape: f32[2,9,1,128], index: 4, kind: input, shape index: {}]   ;;  %s5277_s5 = inlined_call_operand.vmem [shape: f32[2,1,128], index: 5, kind: input, shape index: {}]   ;;  %s5278_s6 = inlined_call_operand.hbm [shape: f32[2,1,4,128], index: 6, kind: output, shape index: {}]  }
   0x1   :  { %5306 = sst [smem:[#allocation40_spill]] %s5273_s1  ;;  %s11_s23 = sshll.u32 %s5272_s0, 4  ;;  %s12_s23 = int_to_ptr.vmem [resolvable:$true] %s11_s23 }
   0x2   :  { %5307 = sst [smem:[#allocation41_spill]] %s5274_s2  ;;  %s2617_s24 = scalar_lea.vmem %s12_s23, 32 }
   0x3   :  { %p2618_p0 = scmp.ne.s32.totalorder %s12_s23, %s2617_s24  ;;  %p2622_p1 = scmp.lt.s32.totalorder %s12_s23, %s12_s23 }
   0x4   :  { %p2623_p2 = scmp.lt.s32.totalorder %s2617_s24, %s2617_s24 }
   0x6   :  { %p2624_p3 = por %p2623_p2, %p2622_p1 }
   0x8   :  { %p2625_p4 = pnand %p2624_p3, %p2618_p0 }
   0xa   :  { %2628 = shalt.err (!%p2625_p4)  }
   0xb   :  { %s2809_s25 = smov [#allocation3]  }
   0xc   :  { %14 = dma.vmem_to_smem %s12_s23, 32, %s2809_s25, [#allocation2] }
   0xd   :  { %2771 = dma.done.wait [#allocation2], 32 }
   0xe   :  { %2772 = vsyncadd [#allocation2], 4294967264 }
   0xf   :  { %16 = sfence }
  0x10   :  { %17 = vsyncpa [#allocation5], 0 }
  0x11   :  { %19 = vsyncpa [#allocation5 + $0x1], 0 }
  0x12   :  { %20 = vsyncpa [#allocation8], 0 }
  0x13   :  { %22 = vsyncpa [#allocation8 + $0x1], 0 }
  0x14   :  { %23 = vsyncpa [#allocation6], 0 }
  0x15   :  { %25 = vsyncpa [#allocation6 + $0x1], 0  ;;  %s2857_s0 = smov 0   ;;  %s2859_s26 = smov 0  }
  0x16   :  { %s2861_s27 = smov 0   ;;  %s2863_s28 = smov 0  }
  0x17   :  { %s2865_s29 = smov 0   ;;  %s2867_s30 = smov 0  }
  0x18 LB: > { %5308 = sst [smem:[#allocation15_spill]] %s2795_s27  ;;  %s2888_s7 = sadd.s32 4294967295, %s2807_s30   ;;  %s2807_s30 = sphi %s2867_s30, %s31_s30   ;;  %s2803_s29 = sphi %s2865_s29, %s5439_s29   ;;  %s2799_s28 = sphi %s2863_s28, %s5438_s28   ;;  %s2795_s27 = sphi %s2861_s27, %s5434_s27   ;;  %s2791_s26 = sphi %s2859_s26, %s5437_s26   ;;  %s2787_s0 = sphi %s2857_s0, %s5436_s0  }
  0x19   : > { %s2219_s8 = sadd.s32 4294967294, %s2807_s30   ;;  %s43_s9 = sadd.s32 1, %s2803_s29 }
  0x1a   : > { %s52_s10 = sadd.s32 1, %s2795_s27  ;;  %p45_p5 = scmp.ge.s32.totalorder %s43_s9, 2 }
  0x1b   : > { %p59_p6 = scmp.ne.s32.totalorder %s2795_s27, %s2791_s26  ;;  %p60_p7 = scmp.eq.s32.totalorder %s2807_s30, 0 }
  0x1c   : > { %p65_p8 = scmp.ne.s32.totalorder %s2791_s26, %s2787_s0  ;;  %s5441_s9 = smov (%p45_p5, %s43_s9), 0 }
  0x1d   : > { %5309 = sst [smem:[#allocation16_spill]] %s5441_s9  ;;  %p2900_p9 = por %p60_p7, %p59_p6 }
  0x1e   : > { %p66_p10 = scmp.eq.s32.totalorder %s2888_s7, 0  ;;  %s47_s12 = ssub.s32 %s2803_s29, %s5441_s9 }
  0x1f   : > { %p201_p11 = scmp.eq.s32.totalorder %s2888_s7, 1  ;;  %p50_p12 = scmp.eq.s32.totalorder %s47_s12, 0 }
  0x20   : > { %p2908_p13 = por %p66_p10, %p65_p8  ;;  %p207_p1 = scmp.eq.s32.totalorder %s2219_s8, 1 }
  0x21   : > { %p2912_p0 = por %p201_p11, %p59_p6  ;;  %p2341_p4 = scmp.lt.s32.totalorder %s2807_s30, 2 }
  0x22   : > { %s5311_s13 = scalar_select %p2908_p13, 1, 0 }
  0x23   : > { %s5312_s14 = scalar_select %p2912_p0, 1, 0 }
  0x24   : > { %s2917_s15 = scalar_select %p50_p12, %s2795_s27, %s52_s10  }
  0x25   : > { %p2919_p2 = por %p207_p1, %p65_p8  ;;  %s2926_s17 = sand.u32 1, %s2795_s27  }
  0x26   : > { %5313 = sst [smem:[#allocation17_spill]] %s2917_s15  ;;  %s5279_s18 = sshll.u32 %s2926_s17, 4 }
  0x27   : > { %s5314_s16 = scalar_select %p2919_p2, 1, 0 }
  0x28   : > { %s5280_s19 = sshll.u32 %s2803_s29, 8  ;;  %p2932_p5 = pnand %p2341_p4, %p2900_p9 }
  0x29   : > { %s255_s21 = sand.u32 1, %s2807_s30   ;;  %s5316_s2 = sld [smem:[#allocation41_spill]] }
  0x2a   : > { %s259_s25 = scalar_lea.vmem [#allocation7], %s5279_s18  ;;  %s2950_s10 = scalar_lea.sflag [#allocation8], %s255_s21 }
  0x2b   : > { %s267_s8 = sshll.u32 %s259_s25, 4  ;;  %p2956_p9 = pneg %p2932_p5  ;;  %s2947_s8 = int_to_ptr.vmem [resolvable:$true] %s267_s8 }
  0x2f   : > { %s2942_s24 = scalar_lea.hbm %s5316_s2, %s5280_s19  ;;  %s2634_s25 = scalar_lea.hbm %s5316_s2, 512 }
  0x30   : > { %s2629_s11 = scalar_lea.hbm %s2942_s24, 256  ;;  %p2635_p12 = scmp.lt.u32.totalorder %s2942_s24, %s5316_s2 }
  0x31   : > { %p2630_p8 = scmp.ne.s32.totalorder %s2942_s24, %s2629_s11  ;;  %p2636_p1 = scmp.lt.u32.totalorder %s2634_s25, %s2629_s11 }
  0x32   : > { %p2638_p3 = scmp.lt.u32.totalorder %s2629_s11, %s2942_s24 }
  0x33   : > { %p2632_p10 = pnand %p2956_p9, %p2630_p8  ;;  %p2637_p4 = por %p2636_p1, %p2635_p12 }
  0x35   : > { %p2633_p11 = pneg %p2632_p10  ;;  %p2639_p6 = por %p2638_p3, %p2637_p4 }
  0x37   : > { %p2640_p7 = pnand %p2639_p6, %p2633_p11 }
  0x39   : > { %2643 = shalt.err (!%p2640_p7)
}
  0x3a   : > { %s2644_s21 = scalar_lea.vmem %s2947_s8, 256  ;;  %s2810_s22 = smov [#allocation7]  }
  0x3b   : > { %p2645_p8 = scmp.ne.s32.totalorder %s2947_s8, %s2644_s21  ;;  %s2649_s23 = sshll.u32 %s2810_s22, 4  ;;  %s2650_s23 = int_to_ptr.vmem [resolvable:$false] %s2649_s23 }
  0x3c   : > { %s2651_s18 = scalar_lea.vmem %s2650_s23, 512  ;;  %p2652_p0 = scmp.lt.s32.totalorder %s2947_s8, %s2650_s23 }
  0x3d   : > { %p2647_p10 = pnand %p2645_p8, %p2956_p9  ;;  %p2653_p13 = scmp.lt.s32.totalorder %s2651_s18, %s2644_s21 }
  0x3f   : > { %p2648_p2 = pneg %p2647_p10  ;;  %p2654_p12 = por %p2653_p13, %p2652_p0 }
  0x41   : > { %p2655_p1 = pnand %p2654_p12, %p2648_p2 }
  0x43   : > { %2658 = shalt.err (!%p2655_p1)
}
  0x44   : > { %s5284_s19 = smov 16   ;;  %s5286_s11 = smov 1  }
  0x45   : > { %2333 = dma.hbm_to_vmem [thread:$0]  (!%p2932_p5), %s2942_s24, 256, %s2947_s8, %s2950_s10, %s5284_s19, %s5284_s19, %s5286_s11  }
  0x46   : > { %p5318_p13 = scmp.lt.s32.totalorder %s2807_s30, 3  ;;  %p5319_p0 = scmp.ge.s32.totalorder %s2807_s30, 1 }
  0x47   : > { %s5321_s21 = sshll.u32 %s2803_s29, 8  ;;  %s5322_s1 = sld [smem:[#allocation40_spill]] }
  0x48   : > { %p2987_p2 = pnand %p5319_p0, %p5318_p13  ;;  %s5323_s2 = sshll.u32 %s2926_s17, 4 }
  0x49   : > { %s237_s9 = scalar_lea.vmem [#allocation4], %s5323_s2  ;;  %s2229_s24 = sshll.u32 %s2926_s17, 6 }
  0x4a   : > { %s5320_s25 = scalar_select %p2987_p2, 1, 0 }
  0x4b   : > { %s245_s15 = sshll.u32 %s237_s9, 4  ;;  %s234_s8 = scalar_lea.sflag [#allocation5], %s2926_s17  ;;  %s3001_s15 = int_to_ptr.vmem [resolvable:$true] %s245_s15 }
  0x4d   : > { %s2996_s18 = scalar_lea.hbm %s5322_s1, %s5321_s21  ;;  %s2664_s21 = scalar_lea.hbm %s5322_s1, 512 }
  0x4e   : > { %s2659_s19 = scalar_lea.hbm %s2996_s18, 256  ;;  %p2665_p11 = scmp.lt.u32.totalorder %s2996_s18, %s5322_s1 }
  0x4f   : > { %p2660_p3 = scmp.ne.s32.totalorder %s2996_s18, %s2659_s19  ;;  %p2666_p4 = scmp.lt.u32.totalorder %s2664_s21, %s2659_s19 }
  0x50   : > { %p2668_p10 = scmp.lt.u32.totalorder %s2659_s19, %s2996_s18 }
  0x51   : > { %p2662_p6 = pnand %p2660_p3, %p2956_p9  ;;  %p2667_p8 = por %p2666_p4, %p2665_p11 }
  0x53   : > { %p2663_p7 = pneg %p2662_p6  ;;  %p2669_p12 = por %p2668_p10, %p2667_p8 }
  0x55   : > { %p2670_p1 = pnand %p2669_p12, %p2663_p7 }
  0x57   : > { %2673 = shalt.err (!%p2670_p1)
}
  0x58   : > { %s2674_s2 = scalar_lea.vmem %s3001_s15, 256  ;;  %s2813_s9 = smov [#allocation4]  }
  0x59   : > { %p2675_p13 = scmp.ne.s32.totalorder %s3001_s15, %s2674_s2  ;;  %s2679_s11 = sshll.u32 %s2813_s9, 4  ;;  %s2680_s11 = int_to_ptr.vmem [resolvable:$false] %s2679_s11 }
  0x5a   : > { %s2681_s27 = scalar_lea.vmem %s2680_s11, 512  ;;  %p2682_p6 = scmp.lt.s32.totalorder %s3001_s15, %s2680_s11 }
  0x5b   : > { %p2677_p0 = pnand %p2675_p13, %p2956_p9  ;;  %p2683_p2 = scmp.lt.s32.totalorder %s2681_s27, %s2674_s2 }
  0x5d   : > { %p2678_p3 = pneg %p2677_p0  ;;  %p2684_p11 = por %p2683_p2, %p2682_p6 }
  0x5f   : > { %p2685_p4 = pnand %p2684_p11, %p2678_p3 }
  0x61   : > { %2688 = shalt.err (!%p2685_p4)
}
  0x62   : > { %s5324_s19 = smov 1   ;;  %s5325_s22 = smov 16  }
  0x63   : > { %2330 = dma.hbm_to_vmem [thread:$0]  (!%p2932_p5), %s2996_s18, 256, %s3001_s15, %s234_s8, %s5325_s22, %s5325_s22, %s5324_s19  }
  0x64   : > { %s2309_s21 = sshll.u32 %s2803_s29, 10  ;;  %s281_s23 = scalar_lea.vmem [#allocation9], %s2229_s24 }
  0x65   : > { %s289_s2 = sshll.u32 %s281_s23, 4  ;;  %s3036_s27 = scalar_lea.hbm %s5275_s3, %s2309_s21  ;;  %s3038_s2 = int_to_ptr.vmem [resolvable:$true] %s289_s2 }
  0x66   : > { %s2689_s1 = scalar_lea.hbm %s3036_s27, 1024  ;;  %s2694_s18 = scalar_lea.hbm %s5275_s3, 2048 }
  0x67   : > { %p2690_p2 = scmp.ne.s32.totalorder %s3036_s27, %s2689_s1  ;;  %p2695_p10 = scmp.lt.u32.totalorder %s3036_s27, %s5275_s3 }
  0x68   : > { %p2696_p12 = scmp.lt.u32.totalorder %s2694_s18, %s2689_s1  ;;  %p2698_p13 = scmp.lt.u32.totalorder %s2689_s1, %s3036_s27 }
  0x69   : > { %p2692_p7 = pnand %p2690_p2, %p2956_p9 }
  0x6a   : > { %p2697_p1 = por %p2696_p12, %p2695_p10 }
  0x6b   : > { %p2693_p8 = pneg %p2692_p7 }
  0x6c   : > { %p2699_p0 = por %p2698_p13, %p2697_p1 }
  0x6e   : > { %p2700_p3 = pnand %p2699_p0, %p2693_p8 }
  0x70   : > { %2703 = shalt.err (!%p2700_p3)
}
  0x71   : > { %s2704_s21 = scalar_lea.vmem %s3038_s2, 1024  ;;  %s2814_s23 = smov [#allocation9]  }
  0x72   : > { %p2705_p6 = scmp.ne.s32.totalorder %s3038_s2, %s2704_s21  ;;  %s2709_s9 = sshll.u32 %s2814_s23, 4  ;;  %s2710_s9 = int_to_ptr.vmem [resolvable:$false] %s2709_s9 }
  0x73   : > { %s2711_s11 = scalar_lea.vmem %s2710_s9, 2048  ;;  %p2712_p2 = scmp.lt.s32.totalorder %s3038_s2, %s2710_s9 }
  0x74   : > { %p2707_p11 = pnand %p2705_p6, %p2956_p9  ;;  %p2713_p7 = scmp.lt.s32.totalorder %s2711_s11, %s2704_s21 }
  0x76   : > { %p2708_p4 = pneg %p2707_p11  ;;  %p2714_p10 = por %p2713_p7, %p2712_p2 }
  0x78   : > { %p2715_p12 = pnand %p2714_p10, %p2708_p4 }
  0x7a   : > { %2718 = shalt.err (!%p2715_p12)
}
  0x7b   : > { %2336 = dma.hbm_to_vmem [thread:$0]  (!%p2932_p5), %s3036_s27, 1024, %s3038_s2, %s2950_s10, %s5325_s22, %s5325_s22, %s5324_s19  }
  0x7c   : > { %p5326_p9 = scmp.ne.s32.totalorder %s5320_s25, 0 }
  0x7e   : > { %311 = sbr.rel (%p5326_p9) target bundleno = 588 (0x24c), region = 40 }
  0x85   : > { %s3068_s1 = sand.u32 1, %s2791_s26   ;;  %p5327_p8 = scmp.ne.s32.totalorder %s5311_s13, 0 }
  0x86   : > { %s2233_s12 = sshll.u32 %s3068_s1, 4  ;;  %s314_s15 = scalar_lea.sflag [#allocation5], %s3068_s1 }
  0x87   : > { %s3072_s17 = scalar_lea.vmem [#allocation4], %s2233_s12 }
  0x88   : > { %2774 = dma.done.wait (%p5327_p8), %s314_s15, 256  }
  0x89   : > { %2776 = vsyncadd (%p5327_p8), %s314_s15, 4294967040  ;;  %s322_s20 = sand.u32 1, %s2888_s7   ;;  %s3079_s25 = scalar_lea.vmem [#allocation7], %s2233_s12 }
  0x8a   : > { %s323_s10 = scalar_lea.sflag [#allocation8], %s322_s20 }
  0x8b   : > { %2778 = dma.done.wait (%p5327_p8), %s323_s10, 1280  }
  0x8c   : > { %2780 = vsyncadd (%p5327_p8), %s323_s10, 4294966016  ;;  %s2235_s19 = sshll.u32 %s3068_s1, 6  ;;  %p382_p5 = scmp.lt.s32.totalorder %s2799_s28, 1  ;;  %v5289_v0 = vlaneseq  ;;  %v403_v1 = vld [vmem:[%s3072_s17] sm:$0x1]  ;;  %vm707_vm0 = vcmask 1040384  }
  0x8d   : > { %s2238_s7 = sshll.u32 %s2799_s28, 7  ;;  %v3098_v2 = vld [vmem:[%s3079_s25] sm:$0x1]  ;;  %v404_v4 = vld [vmem:[%s3072_s17 + $0x1] sm:$0x1]  ;;  %v435_v5 = vmax.f32 %v403_v1, 0.0 }
  0x8e   : > { %s3088_s22 = sld [smem:[#allocation3 + %s2238_s7]]  ;;  %v3101_v3 = vshrl.u32 %v5289_v0, 7  ;;  %v3105_v6 = vld [vmem:[%s3072_s17 + $0x2] sm:$0x1]  ;;  %v3108_v7 = vld [vmem:[%s3079_s25 + $0x1] sm:$0x1]  ;;  %v451_v17 = vmul.f32 %v3098_v2, %v403_v1 }
  0x8f   : > { %s383_s13 = scalar_select %p382_p5, %s2799_s28, 1  ;;  %v3111_v8 = vld [vmem:[%s3079_s25 + $0x2] sm:$0x1]  ;;  %v3114_v9 = vld [vmem:[%s3079_s25 + $0x3] sm:$0x1]  ;;  %v3139_v18 = vand.u32 127, %v5289_v0  ;;  %v452_v25 = vmul.f32 %v3108_v7, %v404_v4 }
  0x90   : > { %5328 = vst [vmem:[#allocation18_spill] sm:$0xff] %v3101_v3  ;;  %v3117_v10 = vld [vmem:[%s3072_s17 + $0x3] sm:$0x1]  ;;  %v3120_v11 = vld [vmem:[%s3072_s17 + $0x4] sm:$0x1]  ;;  %v436_v21 = vmax.f32 %v404_v4, 0.0  ;;  %v453_v26 = vmul.f32 %v3111_v8, %v3105_v6  ;;  %v3194_v38 = vsub.f32 %v435_v5, %v451_v17 }
  0x91   : > { %s2310_s2 = smul.u32 9, %s383_s13  ;;  %v3123_v12 = vld [vmem:[%s3072_s17 + $0x5] sm:$0x1]  ;;  %v3126_v13 = vld [vmem:[%s3072_s17 + $0x6] sm:$0x1]  ;;  %5329 = vst [vmem:[#allocation19_spill] sm:$0xff] %v3139_v18  ;;  %v454_v30 = vmul.f32 %v3114_v9, %v3117_v10 }
  0x92   : > { %v3129_v14 = vld [vmem:[%s3079_s25 + $0x4] sm:$0x1]  ;;  %v3132_v15 = vld [vmem:[%s3079_s25 + $0x5] sm:$0x1]  ;;  %v3135_v16 = vld [vmem:[%s3079_s25 + $0x6] sm:$0x1]  ;;  %v3210_v46 = vsub.f32 %v436_v21, %v452_v25 }
  0x93   : > { %s3094_s24 = scalar_lea.vmem %s5276_s4, %s2310_s2  ;;  %v3142_v19 = vld [vmem:[%s3079_s25 + $0x7] sm:$0x1]  ;;  %v3145_v20 = vld [vmem:[%s3079_s25 + $0x8] sm:$0x1]  ;;  %v3148_v22 = vld [vmem:[%s3079_s25 + $0x9] sm:$0x1]  ;;  %v455_v31 = vmul.f32 %v3129_v14, %v3120_v11  ;;  %v3174_v32 = vmul.f32 %v3132_v15, %v3123_v12  ;;  %v3178_v33 = vmul.f32 %v3135_v16, %v3126_v13 }
  0x94   : > { %v3151_v23 = vld [vmem:[%s3079_s25 + $0xa] sm:$0x1]  ;;  %v3154_v24 = vld [vmem:[%s3079_s25 + $0xb] sm:$0x1]  ;;  %v3160_v27 = vld [vmem:[%s3072_s17 + $0x7] sm:$0x1] }
  0x95   : > { %v3163_v28 = vld [vmem:[%s3072_s17 + $0x8] sm:$0x1]  ;;  %v3166_v29 = vld [vmem:[%s3072_s17 + $0x9] sm:$0x1]  ;;  %v3181_v34 = vld [vmem:[%s3072_s17 + $0xa] sm:$0x1]  ;;  %v3188_v36 = vmul.f32 %v3142_v19, %v3160_v27 }
  0x96   : > { %v3184_v35 = vld [vmem:[%s3072_s17 + $0xb] sm:$0x1]  ;;  %v3192_v37 = vmul.f32 %v3145_v20, %v3163_v28  ;;  %v483_v39 = vand.u32 2147483647, %v403_v1  ;;  %v3198_v40 = vmul.f32 %v3148_v22, %v3166_v29  ;;  %v3202_v41 = vmul.f32 %v3151_v23, %v3181_v34  ;;  %v3214_v48 = vld [vmem:[%s3072_s17 + $0xc] sm:$0x1] }
  0x97   : > { %v3206_v42 = vmul.f32 %v3154_v24, %v3184_v35  ;;  %v484_v43 = vand.u32 2147483647, %v404_v4  ;;  %v437_v44 = vmax.f32 %v3105_v6, 0.0  ;;  %v438_v45 = vmax.f32 %v3117_v10, 0.0  ;;  %v3217_v49 = vld [vmem:[%s3072_s17 + $0xd] sm:$0x1] }
  0x98   : > { %v485_v47 = vand.u32 2147483647, %v3105_v6  ;;  %v3220_v50 = vld [vmem:[%s3079_s25 + $0xc] sm:$0x1]  ;;  %v3223_v51 = vld [vmem:[%s3079_s25 + $0xd] sm:$0x1] }
  0x99   : > { %5330 = vst [vmem:[#allocation20_spill] sm:$0xff] %v3220_v50  ;;  %5331 = vst [vmem:[#allocation21_spill] sm:$0xff] %v3223_v51  ;;  %v439_v52 = vmax.f32 %v3120_v11, 0.0  ;;  %v440_v53 = vmax.f32 %v3123_v12, 0.0  ;;  %v441_v54 = vmax.f32 %v3126_v13, 0.0  ;;  %v442_v59 = vmax.f32 %v3160_v27, 0.0 }
  0x9a   : > { %v486_v55 = vand.u32 2147483647, %v3117_v10  ;;  %v3230_v56 = vld [vmem:[%s3072_s17 + $0xe] sm:$0x1]  ;;  %v3233_v57 = vld [vmem:[%s3072_s17 + $0xf] sm:$0x1] }
  0x9b   : > { %5332 = vst [vmem:[#allocation22_spill] sm:$0xff] %v3233_v57  ;;  %v3236_v58 = vld [vmem:[%s3079_s25 + $0xe] sm:$0x1]  ;;  %v487_v61 = vand.u32 2147483647, %v3120_v11  ;;  %v499_v62 = vsub.f32 0.0, %v483_v39 }
  0x9c   : > { %5333 = vst [vmem:[#allocation23_spill] sm:$0xff] %v3236_v58  ;;  %v488_v4 = vand.u32 2147483647, %v3123_v12  ;;  %v500_v5 = vsub.f32 0.0, %v484_v43  ;;  %v3245_v6 = vld [vmem:[%s3079_s25 + $0xf] sm:$0x1]  ;;  %v3255_v12 = vmul.f32 %v3220_v50, %v3214_v48  ;;  %v3259_v43 = vmul.f32 %v3223_v51, %v3217_v49 }
  0x9d   : > { %5334 = vst [vmem:[#allocation24_spill] sm:$0xff] %v3245_v6  ;;  %v501_v25 = vsub.f32 0.0, %v485_v47  ;;  %v489_v39 = vand.u32 2147483647, %v3126_v13  ;;  %v502_v63 = vsub.f32 0.0, %v486_v55  ;;  %v503_v10 = vsub.f32 0.0, %v487_v61 }
  0x9e   : > { %v515_v17 = vmul.f32 1.442695, %v499_v62  ;;  %v3263_v47 = vmul.f32 %v3236_v58, %v3230_v56  ;;  %v490_v0 = vand.u32 2147483647, %v3160_v27  ;;  %v504_v11 = vsub.f32 0.0, %v488_v4  ;;  %s2236_s8 = sshll.u32 %s3068_s1, 2 }
  0x9f   : > { %v517_v21 = vmul.f32 1.442695, %v500_v5  ;;  %v3268_v13 = vmul.f32 %v3245_v6, %v3233_v57  ;;  %v3270_v55 = vsub.f32 %v437_v44, %v453_v26  ;;  %v491_v1 = vand.u32 2147483647, %v3163_v28  ;;  %s3657_s21 = scalar_lea.vmem [#allocation10], %s2236_s8  ;;  %s3662_s23 = scalar_lea.vmem [#allocation9], %s2235_s19 }
  0xa0   : > { %v519_v60 = vmul.f32 1.442695, %v501_v25  ;;  %v3273_v61 = vsub.f32 %v438_v45, %v454_v30  ;;  %v492_v62 = vand.u32 2147483647, %v3166_v29  ;;  %v505_v58 = vsub.f32 0.0, %v489_v39  ;;  %p2239_p1 = scmp.le.s32.totalorder %s3088_s22, 0 }
  0xa1   : > { %5335 = vst [vmem:[#allocation25_spill] sm:$0xff] %v3268_v13  ;;  %v521_v18 = vmul.f32 1.442695, %v502_v63  ;;  %v3276_v51 = vsub.f32 %v439_v52, %v455_v31  ;;  %v493_v27 = vand.u32 2147483647, %v3181_v34  ;;  %2397 = vpow2.f32 %v515_v17 }
  0xa2   : > { %v523_v4 = vmul.f32 1.442695, %v503_v10  ;;  %v494_v5 = vand.u32 2147483647, %v3184_v35  ;;  %v506_v26 = vsub.f32 0.0, %v490_v0  ;;  %2399 = vpow2.f32 %v517_v21 }
  0xa3   : > { %v525_v44 = vmul.f32 1.442695, %v504_v11  ;;  %v495_v25 = vand.u32 2147483647, %v3214_v48  ;;  %v496_v30 = vand.u32 2147483647, %v3217_v49  ;;  %2401 = vpow2.f32 %v519_v60 }
  0xa4   : > { %v507_v45 = vsub.f32 0.0, %v491_v1  ;;  %v3283_v39 = vsub.f32 %v440_v53, %v3174_v32  ;;  %v508_v31 = vsub.f32 0.0, %v492_v62  ;;  %2403 = vpow2.f32 %v521_v18 }
  0xa5   : > { %v527_v52 = vmul.f32 1.442695, %v505_v58  ;;  %v3286_v63 = vsub.f32 %v441_v54, %v3178_v33  ;;  %v497_v10 = vand.u32 2147483647, %v3230_v56  ;;  %v509_v0 = vsub.f32 0.0, %v493_v27 }
  0xa6   : > { %2405 = vpow2.f32 %v523_v4  ;;  %v498_v17 = vand.u32 2147483647, %v3233_v57  ;;  %v510_v21 = vsub.f32 0.0, %v494_v5  ;;  %v529_v11 = vmul.f32 1.442695, %v506_v26 }
  0xa7   : > { %2407 = vpow2.f32 %v525_v44  ;;  %v3291_v60 = vsub.f32 %v442_v59, %v3188_v36  ;;  %v511_v32 = vsub.f32 0.0, %v495_v25  ;;  %v512_v53 = vsub.f32 0.0, %v496_v30 }
  0xa8   : > { %v531_v1 = vmul.f32 1.442695, %v507_v45  ;;  %2409 = vpow2.f32 %v527_v52  ;;  %v533_v18 = vmul.f32 1.442695, %v508_v31  ;;  %v739_v33 = vsel %vm707_vm0, %v3098_v2, 0.0 }
  0xa9   : > { %v740_v54 = vsel %vm707_vm0, %v3108_v7, 0.0  ;;  %v5336_v58 = vmax.f32 %v3163_v28, 0.0  ;;  %v5337_v36 = vmax.f32 %v3166_v29, 0.0  ;;  %v513_v27 = vsub.f32 0.0, %v497_v10 }
  0xaa   : > { %v535_v4 = vmul.f32 1.442695, %v509_v0  ;;  %v5338_v5 = vmax.f32 %v3181_v34, 0.0  ;;  %v514_v2 = vsub.f32 0.0, %v498_v17  ;;  %2411 = vpow2.f32 %v529_v11 }
  0xab   : > { %v3300_v62 = vsub.f32 %v5336_v58, %v3192_v37  ;;  %v3305_v59 = vsub.f32 %v5337_v36, %v3198_v40  ;;  %v537_v7 = vmul.f32 1.442695, %v510_v21  ;;  %v3312_v44 = vpop.eup %2397  ;;  %v5339_v28 = vmax.f32 %v3184_v35, 0.0 }
  0xac   : > { %v3310_v26 = vsub.f32 %v5338_v5, %v3202_v41  ;;  %2413 = vpow2.f32 %v531_v1  ;;  %v539_v29 = vmul.f32 1.442695, %v511_v32  ;;  %v741_v40 = vadd.f32 %v740_v54, %v739_v33  ;;  %v3319_v25 = vpop.eup %2399 }
  0xad   : > { %v3317_v37 = vsub.f32 %v5339_v28, %v3206_v42  ;;  %v5340_v34 = vmax.f32 %v3214_v48, 0.0  ;;  %2415 = vpow2.f32 %v533_v18  ;;  %v541_v30 = vmul.f32 1.442695, %v512_v53  ;;  %v3328_v31 = vpop.eup %2401 }
  0xae   : > { %v742_v45 = vsel %vm707_vm0, %v3111_v8, 0.0  ;;  %v5342_v35 = vmax.f32 %v3217_v49, 0.0  ;;  %v5344_v52 = vmax.f32 %v3230_v56, 0.0  ;;  %2417 = vpow2.f32 %v535_v4 }
  0xaf   : > { %v3324_v41 = vsub.f32 %v5340_v34, %v3255_v12  ;;  %v543_v48 = vmul.f32 1.442695, %v513_v27  ;;  %v3340_v12 = vpop.eup %2403  ;;  %2419 = vpow2.f32 %v537_v7  ;;  %v545_v0 = vmul.f32 1.442695, %v514_v2 }
  0xb0   : > { %v3333_v42 = vsub.f32 %v5342_v35, %v3259_v43  ;;  %v3338_v10 = vsub.f32 %v5344_v52, %v3263_v47  ;;  %v547_v8 = vadd.f32 1.0, %v3312_v44  ;;  %v744_v17 = vsel %vm707_vm0, %v3114_v9, 0.0  ;;  %v3345_v21 = vpop.eup %2405 }
  0xb1   : > { %5341 = vst [vmem:[#allocation26_spill] sm:$0xff] %v3324_v41  ;;  %2421 = vpow2.f32 %v539_v29  ;;  %v556_v49 = vadd.f32 1.0, %v3319_v25  ;;  %v743_v43 = vadd.f32 %v742_v45, %v741_v40  ;;  %v746_v56 = vsel %vm707_vm0, %v3129_v14, 0.0  ;;  %v3350_v47 = vpop.eup %2407 }
  0xb2   : > { %5343 = vst [vmem:[#allocation27_spill] sm:$0xff] %v3333_v42  ;;  %5345 = vst [vmem:[#allocation28_spill] sm:$0xff] %v3338_v10  ;;  %2423 = vpow2.f32 %v541_v30  ;;  %v565_v11 = vadd.f32 1.0, %v3328_v31  ;;  %v3355_v32 = vsel %vm707_vm0, %v3132_v15, 0.0  ;;  %v3359_v9 = vsel %vm707_vm0, %v3135_v16, 0.0  ;;  %v3367_v18 = vpop.eup %2409 }
  0xb3   : > { %2425 = vpow2.f32 %v543_v48  ;;  %v550_v53 = vmul.f32 -0.5, %v3312_v44  ;;  %v574_v1 = vadd.f32 1.0, %v3340_v12  ;;  %v3365_v14 = vsel %vm707_vm0, %v3142_v19, 0.0 }
  0xb4   : > { %2427 = vlog2.f32 %v547_v8  ;;  %v583_v33 = vadd.f32 1.0, %v3345_v21  ;;  %v3372_v15 = vsel %vm707_vm0, %v3145_v20, 0.0  ;;  %v3376_v16 = vsel %vm707_vm0, %v3148_v22, 0.0  ;;  %v3380_v36 = vpop.eup %2411 }
  0xb5   : > { %2429 = vlog2.f32 %v556_v49  ;;  %v559_v54 = vmul.f32 -0.5, %v3319_v25  ;;  %v592_v58 = vadd.f32 1.0, %v3350_v47  ;;  %v745_v19 = vadd.f32 %v744_v17, %v743_v43 }
  0xb6   : > { %v553_v27 = vand.u32 2147483647, %v3312_v44  ;;  %2431 = vlog2.f32 %v565_v11  ;;  %v568_v4 = vmul.f32 -0.5, %v3328_v31  ;;  %v3386_v20 = vsel %vm707_vm0, %v3151_v23, 0.0  ;;  %v3388_v5 = vpop.eup %2413 }
  0xb7   : > { %5346 = vst [vmem:[#allocation29_spill] sm:$0xff] %v3386_v20  ;;  %v551_v22 = vadd.f32 1.0, %v550_v53  ;;  %2433 = vlog2.f32 %v574_v1  ;;  %v577_v2 = vmul.f32 -0.5, %v3340_v12  ;;  %v601_v7 = vadd.f32 1.0, %v3367_v18  ;;  %v3392_v28 = vpop.eup %2415 }
  0xb8   : > { %v562_v29 = vand.u32 2147483647, %v3319_v25  ;;  %2435 = vlog2.f32 %v583_v33  ;;  %v586_v40 = vmul.f32 -0.5, %v3345_v21  ;;  %v3398_v34 = vsel %vm707_vm0, %v3154_v24, 0.0  ;;  %v3400_v23 = vpop.eup %2417 }
  0xb9   : > { %5347 = vst [vmem:[#allocation30_spill] sm:$0xff] %v3398_v34  ;;  %v560_v30 = vadd.f32 1.0, %v559_v54  ;;  %v571_v45 = vand.u32 2147483647, %v3328_v31  ;;  %2437 = vlog2.f32 %v592_v58  ;;  %v3403_v35 = vadd.f32 %v746_v56, %v745_v19  ;;  %v3405_v52 = vpop.eup %2419 }
  0xba   : > { %2439 = vpow2.f32 %v545_v0  ;;  %v569_v48 = vadd.f32 1.0, %v568_v4  ;;  %v580_v8 = vand.u32 2147483647, %v3340_v12  ;;  %v595_v17 = vmul.f32 -0.5, %v3350_v47 }
  0xbb   : > { %v3409_v49 = vpop.eup %2421  ;;  %v3412_v24 = vmul.f32 %v3312_v44, %v551_v22  ;;  %vm3414_vm1 = vcmp.lt.f32.partialorder %v553_v27, 0.0004427343  ;;  %v578_v11 = vadd.f32 1.0, %v577_v2  ;;  %2441 = vlog2.f32 %v601_v7 }
  0xbc   : > { %v610_v56 = vadd.f32 1.0, %v3380_v36  ;;  %v3419_v53 = vpop.eup %2423  ;;  %vm3421_vm2 = vcmp.lt.f32.partialorder %v562_v29, 0.0004427343  ;;  %v587_v1 = vadd.f32 1.0, %v586_v40  ;;  %v589_v33 = vand.u32 2147483647, %v3345_v21 }
  0xbd   : > { %v598_v44 = vand.u32 2147483647, %v3350_v47  ;;  %v604_v54 = vmul.f32 -0.5, %v3367_v18  ;;  %v3428_v58 = vpop.eup %2425  ;;  %v3431_v19 = vmul.f32 %v3319_v25, %v560_v30  ;;  %vm3433_vm3 = vcmp.lt.f32.partialorder %v571_v45, 0.0004427343 }
  0xbe   : > { %v607_v4 = vand.u32 2147483647, %v3367_v18  ;;  %v619_v22 = vadd.f32 1.0, %v3388_v5  ;;  %v2428_v2 = vpop.eup %2427  ;;  %v3440_v7 = vmul.f32 %v3328_v31, %v569_v48  ;;  %vm3442_vm4 = vcmp.lt.f32.partialorder %v580_v8, 0.0004427343 }
  0xbf   : > { %v596_v40 = vadd.f32 1.0, %v595_v17  ;;  %v613_v25 = vmul.f32 -0.5, %v3380_v36  ;;  %v2430_v30 = vpop.eup %2429  ;;  %v3448_v45 = vmul.f32 %v3340_v12, %v578_v11  ;;  %2443 = vlog2.f32 %v610_v56 }
  0xc0   : > { %v622_v6 = vmul.f32 -0.5, %v3388_v5  ;;  %v628_v10 = vadd.f32 1.0, %v3392_v28  ;;  %v2432_v34 = vpop.eup %2431  ;;  %v3453_v31 = vmul.f32 %v3345_v21, %v587_v1  ;;  %vm3455_vm5 = vcmp.lt.f32.partialorder %v589_v33, 0.0004427343 }
  0xc1   : > { %vm3459_vm6 = vcmp.lt.f32.partialorder %v598_v44, 0.0004427343  ;;  %v605_v17 = vadd.f32 1.0, %v604_v54  ;;  %v2434_v12 = vpop.eup %2433  ;;  %vm3463_vm7 = vcmp.lt.f32.partialorder %v607_v4, 0.0004427343  ;;  %2445 = vlog2.f32 %v619_v22 }
  0xc2   : > { %v616_v56 = vand.u32 2147483647, %v3380_v36  ;;  %v631_v21 = vmul.f32 -0.5, %v3392_v28  ;;  %v2436_v1 = vpop.eup %2435  ;;  %v549_v33 = vmul.f32 0.6931472, %v2428_v2  ;;  %v3470_v42 = vmul.f32 %v3350_v47, %v596_v40 }
  0xc3   : > { %v614_v44 = vadd.f32 1.0, %v613_v25  ;;  %v625_v57 = vand.u32 2147483647, %v3388_v5  ;;  %v2438_v13 = vpop.eup %2437  ;;  %v558_v54 = vmul.f32 0.6931472, %v2430_v30  ;;  %v623_v50 = vadd.f32 1.0, %v622_v6 }
  0xc4   : > { %2447 = vlog2.f32 %v628_v10  ;;  %v637_v4 = vadd.f32 1.0, %v3400_v23  ;;  %v3474_v3 = vpop.eup %2439  ;;  %v567_v20 = vmul.f32 0.6931472, %v2432_v34  ;;  %v576_v22 = vmul.f32 0.6931472, %v2434_v12 }
  0xc5   : > { %v3477_v41 = vmul.f32 %v3367_v18, %v605_v17  ;;  %v640_v2 = vmul.f32 -0.5, %v3400_v23  ;;  %v2442_v47 = vpop.eup %2441  ;;  %vm3480_vm8 = vcmp.lt.f32.partialorder %v616_v56, 0.0004427343  ;;  %v632_v25 = vadd.f32 1.0, %v631_v21 }
  0xc6   : > { %v634_v6 = vand.u32 2147483647, %v3392_v28  ;;  %v646_v10 = vadd.f32 1.0, %v3405_v52  ;;  %v555_v34 = vsel %vm3414_vm1, %v3412_v24, %v549_v33  ;;  %v585_v30 = vmul.f32 0.6931472, %v2436_v1 }
  0xc7   : > { %v594_v12 = vmul.f32 0.6931472, %v2438_v13  ;;  %v3490_v18 = vmul.f32 %v3380_v36, %v614_v44  ;;  %v564_v17 = vsel %vm3421_vm2, %v3431_v19, %v558_v54  ;;  %v3496_v56 = vmul.f32 %v3388_v5, %v623_v50 }
  0xc8   : > { %vm3498_vm9 = vcmp.lt.f32.partialorder %v625_v57, 0.0004427343  ;;  %2449 = vlog2.f32 %v637_v4  ;;  %v655_v43 = vadd.f32 1.0, %v3409_v49  ;;  %v573_v13 = vsel %vm3433_vm3, %v3440_v7, %v567_v20 }
  0xc9   : > { %v582_v36 = vsel %vm3442_vm4, %v3448_v45, %v576_v22  ;;  %v603_v24 = vmul.f32 0.6931472, %v2442_v47  ;;  %v641_v0 = vadd.f32 1.0, %v640_v2  ;;  %v2444_v19 = vpop.eup %2443  ;;  %v3510_v50 = vmul.f32 %v3392_v28, %v632_v25 }
  0xca   : > { %vm3512_vm10 = vcmp.lt.f32.partialorder %v634_v6, 0.0004427343  ;;  %v643_v5 = vand.u32 2147483647, %v3400_v23  ;;  %2451 = vlog2.f32 %v646_v10  ;;  %v664_v27 = vadd.f32 1.0, %v3419_v53 }
  0xcb   : > { %v591_v20 = vsel %vm3455_vm5, %v3453_v31, %v585_v30  ;;  %v600_v7 = vsel %vm3459_vm6, %v3470_v42, %v594_v12  ;;  %v649_v28 = vmul.f32 -0.5, %v3405_v52  ;;  %v652_v29 = vand.u32 2147483647, %v3405_v52  ;;  %v2446_v45 = vpop.eup %2445 }
  0xcc   : > { %2453 = vlog2.f32 %v655_v43  ;;  %v673_v1 = vadd.f32 1.0, %v3428_v58  ;;  %v691_v33 = vadd.f32 %v555_v34, %v3194_v38  ;;  %v692_v44 = vadd.f32 %v564_v17, %v3210_v46 }
  0xcd   : > { %v609_v31 = vsel %vm3463_vm7, %v3477_v41, %v603_v24  ;;  %v612_v48 = vmul.f32 0.6931472, %v2444_v19  ;;  %v3533_v8 = vmul.f32 %v3400_v23, %v641_v0  ;;  %v693_v42 = vadd.f32 %v573_v13, %v3270_v55 }
  0xce   : > { %v2448_v54 = vpop.eup %2447  ;;  %vm3536_vm11 = vcmp.lt.f32.partialorder %v643_v5, 0.0004427343  ;;  %v658_v22 = vmul.f32 -0.5, %v3409_v49  ;;  %2455 = vlog2.f32 %v664_v27  ;;  %v682_v38 = vadd.f32 1.0, %v3474_v3 }
  0xcf   : > { %v694_v46 = vadd.f32 %v582_v36, %v3273_v61  ;;  %v621_v11 = vmul.f32 0.6931472, %v2446_v45  ;;  %v650_v41 = vadd.f32 1.0, %v649_v28  ;;  %v661_v2 = vand.u32 2147483647, %v3409_v49 }
  0xd0   : > { %v667_v23 = vmul.f32 -0.5, %v3419_v53  ;;  %vm3545_vm12 = vcmp.lt.f32.partialorder %v652_v29, 0.0004427343  ;;  %2457 = vlog2.f32 %v673_v1  ;;  %v695_v47 = vadd.f32 %v591_v20, %v3276_v51 }
  0xd1   : > { %v708_v25 = vsel %vm707_vm0, %v691_v33, 0.0  ;;  %v709_v6 = vsel %vm707_vm0, %v692_v44, 0.0  ;;  %v618_v61 = vsel %vm3480_vm8, %v3490_v18, %v612_v48  ;;  %v630_v10 = vmul.f32 0.6931472, %v2448_v54 }
  0xd2   : > { %v710_v34 = vadd.f32 %v709_v6, %v708_v25  ;;  %v711_v30 = vsel %vm707_vm0, %v693_v42, 0.0  ;;  %v2450_v12 = vpop.eup %2449  ;;  %v659_v17 = vadd.f32 1.0, %v658_v22  ;;  %2459 = vlog2.f32 %v682_v38 }
  0xd3   : > { %v696_v43 = vadd.f32 %v600_v7, %v3283_v39  ;;  %v713_v13 = vsel %vm707_vm0, %v694_v46, 0.0  ;;  %v627_v51 = vsel %vm3498_vm9, %v3496_v56, %v621_v11  ;;  %v651_v36 = vmul.f32 %v3405_v52, %v650_v41 }
  0xd4   : > { %vm3562_vm13 = vcmp.lt.f32.partialorder %v661_v2, 0.0004427343  ;;  %v712_v18 = vadd.f32 %v711_v30, %v710_v34  ;;  %v2452_v24 = vpop.eup %2451  ;;  %v668_v0 = vadd.f32 1.0, %v667_v23  ;;  %v670_v19 = vand.u32 2147483647, %v3419_v53 }
  0xd5   : > { %v697_v5 = vadd.f32 %v609_v31, %v3286_v63  ;;  %v715_v39 = vsel %vm707_vm0, %v695_v47, 0.0  ;;  %v636_v21 = vsel %vm3512_vm10, %v3510_v50, %v630_v10  ;;  %v639_v56 = vmul.f32 0.6931472, %v2450_v12 }
  0xd6   : > { %v676_v52 = vmul.f32 -0.5, %v3428_v58  ;;  %v714_v27 = vadd.f32 %v713_v13, %v712_v18  ;;  %v2454_v20 = vpop.eup %2453  ;;  %v660_v7 = vmul.f32 %v3409_v49, %v659_v17  ;;  %v698_v28 = vadd.f32 %v618_v61, %v3291_v60  ;;  %v5380_v17 = vld [vmem:[#allocation26_spill] sm:$0xff] }
  0xd7   : > { %v717_v29 = vsel %vm707_vm0, %v696_v43, 0.0  ;;  %v749_v63 = vadd.f32 %v3355_v32, %v3403_v35  ;;  %v648_v45 = vmul.f32 0.6931472, %v2452_v24  ;;  %v679_v1 = vand.u32 2147483647, %v3428_v58  ;;  %v5383_v24 = vld [vmem:[#allocation20_spill] sm:$0xff] }
  0xd8   : > { %v685_v57 = vmul.f32 -0.5, %v3474_v3  ;;  %v716_v50 = vadd.f32 %v715_v39, %v714_v27  ;;  %v2456_v33 = vpop.eup %2455  ;;  %v669_v44 = vmul.f32 %v3419_v53, %v668_v0  ;;  %v699_v31 = vadd.f32 %v627_v51, %v3300_v62  ;;  %v5384_v0 = vld [vmem:[#allocation25_spill] sm:$0xff]  ;;  %v5388_v27 = vld [vmem:[#allocation30_spill] sm:$0xff] }
  0xd9   : > { %v719_v49 = vsel %vm707_vm0, %v697_v5, 0.0  ;;  %v751_v60 = vadd.f32 %v3359_v9, %v749_v63  ;;  %v645_v48 = vsel %vm3536_vm11, %v3533_v8, %v639_v56  ;;  %v657_v32 = vmul.f32 0.6931472, %v2454_v20 }
  0xda   : > { %v677_v35 = vadd.f32 1.0, %v676_v52  ;;  %v718_v42 = vadd.f32 %v717_v29, %v716_v50  ;;  %v2458_v54 = vpop.eup %2457  ;;  %vm3587_vm14 = vcmp.lt.f32.partialorder %v670_v19, 0.0004427343  ;;  %v700_v53 = vadd.f32 %v636_v21, %v3305_v59  ;;  %v5385_v19 = vld [vmem:[#allocation22_spill] sm:$0xff]  ;;  %v5387_v21 = vld [vmem:[#allocation27_spill] sm:$0xff]  ;;  %v5389_v29 = vld [vmem:[#allocation21_spill] sm:$0xff] }
  0xdb   : > { %v721_v62 = vsel %vm707_vm0, %v698_v28, 0.0  ;;  %v753_v38 = vadd.f32 %v3365_v14, %v751_v60  ;;  %v654_v9 = vsel %vm3545_vm12, %v651_v36, %v648_v45  ;;  %v666_v46 = vmul.f32 0.6931472, %v2456_v33  ;;  %v5382_v36 = vld [vmem:[#allocation18_spill] sm:$0xff]  ;;  %v5390_v45 = vld [vmem:[#allocation28_spill] sm:$0xff]  ;;  %v5391_v33 = vld [vmem:[#allocation19_spill] sm:$0xff] }
  0xdc   : > { %v686_v4 = vadd.f32 1.0, %v685_v57  ;;  %v720_v8 = vadd.f32 %v719_v49, %v718_v42  ;;  %v2460_v11 = vpop.eup %2459  ;;  %v688_v41 = vand.u32 2147483647, %v3474_v3  ;;  %v701_v2 = vadd.f32 %v645_v48, %v3310_v26  ;;  %v5392_v49 = vld [vmem:[#allocation23_spill] sm:$0xff] }
  0xdd   : > { %v723_v23 = vsel %vm707_vm0, %v699_v31, 0.0  ;;  %v755_v47 = vadd.f32 %v3372_v15, %v753_v38  ;;  %v663_v59 = vsel %vm3562_vm13, %v660_v7, %v657_v32  ;;  %v675_v25 = vmul.f32 0.6931472, %v2458_v54 }
  0xde   : > { %v678_v14 = vmul.f32 %v3428_v58, %v677_v35  ;;  %v722_v55 = vadd.f32 %v721_v62, %v720_v8  ;;  %vm3603_vm15 = vcmp.lt.f32.partialorder %v679_v1, 0.0004427343  ;;  %v702_v61 = vadd.f32 %v654_v9, %v3317_v37  ;;  %v5381_v37 = vld [vmem:[#allocation29_spill] sm:$0xff] }
  0xdf   : > { %v725_v10 = vsel %vm707_vm0, %v700_v53, 0.0  ;;  %v757_v26 = vadd.f32 %v3376_v16, %v755_v47  ;;  %v672_v15 = vsel %vm3587_vm14, %v669_v44, %v666_v46  ;;  %v684_v34 = vmul.f32 0.6931472, %v2460_v11  ;;  %v5393_v53 = vld [vmem:[#allocation24_spill] sm:$0xff] }
  0xe0   : > { %v687_v30 = vmul.f32 %v3474_v3, %v686_v4  ;;  %v724_v12 = vadd.f32 %v723_v23, %v722_v55  ;;  %vm3613_vm1 = vcmp.lt.f32.partialorder %v688_v41, 0.0004427343  ;;  %v703_v43 = vadd.f32 %v663_v59, %v5380_v17 }
  0xe1   : > { %v727_v13 = vsel %vm707_vm0, %v701_v2, 0.0  ;;  %v759_v51 = vadd.f32 %v5381_v37, %v757_v26  ;;  %v398_v40 = vmul.u32 128, %v5382_v36  ;;  %v681_v16 = vsel %vm3603_vm15, %v678_v14, %v675_v25 }
  0xe2   : > { %v726_v18 = vadd.f32 %v725_v10, %v724_v12  ;;  %v762_v3 = vsel %vm707_vm0, %v5383_v24, 0.0  ;;  %v5386_v5 = vmax.f32 %v5385_v19, 0.0  ;;  %v704_v56 = vadd.f32 %v672_v15, %v5387_v21 }
  0xe3   : > { %v729_v52 = vsel %vm707_vm0, %v702_v61, 0.0  ;;  %v761_v20 = vadd.f32 %v5388_v27, %v759_v51  ;;  %v690_v7 = vsel %vm3613_vm1, %v687_v30, %v684_v34  ;;  %v764_v63 = vsel %vm707_vm0, %v5389_v29, 0.0 }
  0xe4   : > { %v482_v39 = vsub.f32 %v5386_v5, %v5384_v0  ;;  %v728_v28 = vadd.f32 %v727_v13, %v726_v18  ;;  %v705_v1 = vadd.f32 %v681_v16, %v5390_v45  ;;  %v731_v57 = vsel %vm707_vm0, %v703_v43, 0.0 }
  0xe5   : > { %v763_v50 = vadd.f32 %v762_v3, %v761_v20  ;;  %v399_v44 = vadd.s32 %v398_v40, %v5391_v33  ;;  %v766_v60 = vsel %vm707_vm0, %v5392_v49, 0.0  ;;  %v733_v32 = vsel %vm707_vm0, %v704_v56, 0.0 }
  0xe6   : > { %v730_v31 = vadd.f32 %v729_v52, %v728_v28  ;;  %v706_v48 = vadd.f32 %v690_v7, %v482_v39  ;;  %v735_v54 = vsel %vm707_vm0, %v705_v1, 0.0  ;;  %v768_v62 = vsel %vm707_vm0, %v5393_v53, 0.0 }
  0xe7   : > { %v765_v35 = vadd.f32 %v764_v63, %v763_v50  ;;  %vm400_vm2 = vcmp.lt.s32.totalorder %v399_v44, 80  ;;  %v2815_v8 = vmov 0.0   ;;  %vm777_vm3 = vcmask 1041408  }
  0xe8   : > { %v732_v42 = vadd.f32 %v731_v57, %v730_v31  ;;  %v737_v9 = vsel %vm707_vm0, %v706_v48, 0.0  ;;  %v2237_v11 = vsel %vm400_vm2, 1.0, %v2815_v8  ;;  %vm779_vm4 = vcmask 1042432  }
  0xe9   : > { %v767_v22 = vadd.f32 %v766_v60, %v765_v35 }
  0xea   : > { %v734_v38 = vadd.f32 %v733_v32, %v732_v42 }
  0xeb   : > { %v3645_v4 = vadd.f32 %v768_v62, %v767_v22 }
  0xec   : > { %v736_v46 = vadd.f32 %v735_v54, %v734_v38 }
  0xed   : > { %5394 = vst [vmem:[#allocation26_spill] sm:$0xff] %v3645_v4  ;;  %v5295_v23 = vrot.slane %v3645_v4, 5 }
  0xee   : > { %v738_v41 = vadd.f32 %v737_v9, %v736_v46 }
  0xef   : > { %793 = sbr.rel (%p2239_p1) target bundleno = 563 (0x233), region = 56 }
  0xf0   : > { %v3648_v2 = vmul.f32 %v2237_v11, %v738_v41 }
  0xf2   : > { %5395 = vst [vmem:[#allocation29_spill] sm:$0xff] %v3648_v2  ;;  %v776_v47 = vsel %vm707_vm0, %v3648_v2, 0.0 }
  0xf3   : > { %v778_v59 = vsel %vm777_vm3, %v776_v47, 0.0 }
  0xf4   : > { %v780_v25 = vsel %vm779_vm4, %v778_v59, %v5295_v23 }
  0xf5   : > { %781 = vst [vmem:[%s3657_s21] sm:$0xf] %v780_v25 }
  0xf6   : > { %v3666_v14 = vld [vmem:[%s3094_s24 + $0x1] sm:$0x1]  ;;  %v3669_v55 = vld [vmem:[%s3094_s24 + $0x3] sm:$0x1]  ;;  %v3676_v61 = vld [vmem:[%s3094_s24 + $0x5] sm:$0x1]  ;;  %v5398_v40 = vlaneseq }
  0xf7   : > { %v3673_v6 = vadd.f32 %v3669_v55, %v3666_v14  ;;  %v3679_v10 = vld [vmem:[%s3094_s24 + $0x7] sm:$0x1]  ;;  %v3683_v26 = vsub.f32 %v3669_v55, %v3666_v14  ;;  %v3698_v17 = vld [vmem:[%s3094_s24] sm:$0x1]  ;;  %v3701_v43 = vld [vmem:[%s3094_s24 + $0x2] sm:$0x1] }
  0xf8   : > { %v3687_v15 = vadd.f32 %v3679_v10, %v3676_v61  ;;  %v3693_v30 = vsub.f32 %v3679_v10, %v3676_v61  ;;  %v3704_v13 = vld [vmem:[%s3662_s23] sm:$0x1]  ;;  %v3707_v37 = vld [vmem:[%s3662_s23 + $0x4] sm:$0x1]  ;;  %v3710_v51 = vld [vmem:[%s3662_s23 + $0x1] sm:$0x1]  ;;  %v3743_v21 = vsub.f32 %v3701_v43, %v3698_v17 }
  0xf9   : > { %5396 = vst [vmem:[#allocation31_spill] sm:$0xff] %v3673_v6  ;;  %v859_v12 = vadd.f32 1e-09, %v3683_v26  ;;  %v3713_v36 = vld [vmem:[%s3662_s23 + $0x5] sm:$0x1]  ;;  %vm3716_vm5 = vcmp.lt.s32.totalorder %v5398_v40, 128 }
  0xfa   : > { %5397 = vst [vmem:[#allocation32_spill] sm:$0xff] %v3687_v15  ;;  %v894_v58 = vadd.f32 1e-09, %v3693_v30  ;;  %v3721_v18 = vld [vmem:[%s3094_s24 + $0x4] sm:$0x1]  ;;  %v973_v5 = vsel %vm3716_vm5, %v3704_v13, -inf }
  0xfb   : > { %2461 = vrcp.f32 %v859_v12  ;;  %v3724_v24 = vld [vmem:[%s3094_s24 + $0x6] sm:$0x1]  ;;  %v3727_v3 = vld [vmem:[%s3662_s23 + $0x2] sm:$0x1]  ;;  %v3730_v0 = vld [vmem:[%s3662_s23 + $0x3] sm:$0x1] }
  0xfc   : > { %2463 = vrcp.f32 %v894_v58  ;;  %v3733_v19 = vld [vmem:[%s3662_s23 + $0x6] sm:$0x1]  ;;  %v977_v39 = vsel %vm3716_vm5, %v3707_v37, -inf  ;;  %v3746_v56 = vld [vmem:[%s3662_s23 + $0x7] sm:$0x1]  ;;  %v974_v27 = vsel %vm3716_vm5, %v3710_v51, -inf  ;;  %v827_v28 = vsub.f32 %v3724_v24, %v3721_v18 }
  0xfd   : > { %v3749_v52 = vld [vmem:[%s3662_s23 + $0x8] sm:$0x1]  ;;  %v979_v20 = vsel %vm3716_vm5, %v3713_v36, -inf  ;;  %v3758_v7 = vld [vmem:[%s3662_s23 + $0x9] sm:$0x1]  ;;  %v975_v29 = vsel %vm3716_vm5, %v3727_v3, -inf  ;;  %v978_v45 = vmax.f32 %v973_v5, %v977_v39 }
  0xfe   : > { %v976_v63 = vsel %vm3716_vm5, %v3730_v0, -inf  ;;  %v980_v57 = vmax.f32 %v974_v27, %v979_v20  ;;  %v981_v50 = vsel %vm3716_vm5, %v3733_v19, -inf  ;;  %v983_v33 = vsel %vm3716_vm5, %v3746_v56, -inf  ;;  %v3781_v49 = vld [vmem:[%s3662_s23 + $0xa] sm:$0x1] }
  0xff   : > { %v985_v44 = vsel %vm3716_vm5, %v3749_v52, -inf  ;;  %v3784_v60 = vld [vmem:[%s3662_s23 + $0xb] sm:$0x1]  ;;  %v987_v48 = vsel %vm3716_vm5, %v3758_v7, -inf  ;;  %v3790_v32 = vld [vmem:[%s3662_s23 + $0xc] sm:$0x1]  ;;  %v982_v22 = vmax.f32 %v975_v29, %v981_v50  ;;  %v984_v53 = vmax.f32 %v976_v63, %v983_v33 }
 0x100   : > { %v3793_v35 = vld [vmem:[%s3662_s23 + $0xd] sm:$0x1]  ;;  %v986_v62 = vmax.f32 %v978_v45, %v985_v44  ;;  %v988_v9 = vmax.f32 %v980_v57, %v987_v48  ;;  %v989_v46 = vsel %vm3716_vm5, %v3781_v49, -inf  ;;  %v991_v8 = vsel %vm3716_vm5, %v3784_v60, -inf  ;;  %v3808_v11 = vld [vmem:[%s3662_s23 + $0xe] sm:$0x1] }
 0x101   : > { %v993_v41 = vsel %vm3716_vm5, %v3790_v32, -inf  ;;  %v995_v47 = vsel %vm3716_vm5, %v3793_v35, -inf  ;;  %v990_v58 = vmax.f32 %v982_v22, %v989_v46  ;;  %v992_v40 = vmax.f32 %v984_v53, %v991_v8  ;;  %v3826_v5 = vld [vmem:[%s5277_s5] sm:$0x1]  ;;  %v3829_v39 = vld [vmem:[%s3662_s23 + $0xf] sm:$0x1] }
 0x102   : > { %v994_v27 = vmax.f32 %v986_v62, %v993_v41  ;;  %v996_v20 = vmax.f32 %v988_v9, %v995_v47  ;;  %v997_v29 = vsel %vm3716_vm5, %v3808_v11, -inf  ;;  %v816_v63 = vmax.f32 %v3698_v17, %v3721_v18 }
 0x103   : > { %v815_v45 = vmin.f32 %v3701_v43, %v3724_v24  ;;  %v820_v57 = vmax.f32 %v3666_v14, %v3676_v61  ;;  %v942_v33 = vsub.f32 %v3826_v5, %v3721_v18  ;;  %v998_v44 = vmax.f32 %v990_v58, %v997_v29 }
 0x104   : > { %v999_v48 = vsel %vm3716_vm5, %v3829_v39, -inf  ;;  %v1001_v53 = vmax.f32 %v994_v27, %v996_v20  ;;  %v826_v47 = vmul.f32 %v3683_v26, %v3743_v21  ;;  %v846_v58 = vmax.f32 %v3701_v43, %v3724_v24 }
 0x105   : > { %v2462_v1 = vpop.eup %2461  ;;  %v1000_v22 = vmax.f32 %v992_v40, %v999_v48  ;;  %v817_v62 = vsub.f32 %v815_v45, %v816_v63  ;;  %v946_v41 = vmax.f32 %v942_v33, 0.0  ;;  %v847_v40 = vmin.f32 %v3698_v17, %v3721_v18 }
 0x106   : > { %v3778_v31 = vmul.f32 %v2462_v1, %v3743_v21  ;;  %v2464_v42 = vpop.eup %2463  ;;  %v819_v1 = vmin.f32 %v3669_v55, %v3679_v10  ;;  %vm2816_vm9 = vmmov 1   ;;  %v849_v21 = vmax.f32 %v3669_v55, %v3679_v10 }
 0x107   : > { %v3798_v38 = vmul.f32 %v2464_v42, %v827_v28  ;;  %v1002_v46 = vmax.f32 %v998_v44, %v1000_v22  ;;  %v818_v20 = vmax.f32 %v817_v62, 0.0  ;;  %v3872_v29 = vadd.f32 %v3701_v43, %v3698_v17  ;;  %v2248_v62 = vld [vmem:[%s5277_s5 + $0x1] sm:$0x1] }
 0x108   : > { %v3796_v54 = vand.u32 2147483647, %v3778_v31  ;;  %v821_v9 = vsub.f32 %v819_v1, %v820_v57  ;;  %v3874_v45 = vmin.f32 %v946_v41, 14.99  ;;  %v3880_v57 = vadd.f32 %v3724_v24, %v3721_v18 }
 0x109   : > { %v3821_v12 = vand.u32 2147483647, %v3798_v38  ;;  %5401 = vst [vmem:[#allocation33_spill] sm:$0xff] %v3872_v29 }
 0x10a   : > { %vm867_vm6 = vcmp.gt.f32.partialorder %v3796_v54, 2.4142137  ;;  %v875_v25 = vadd.f32 1.0, %v3796_v54  ;;  %v2249_v8 = vadd.f32 -1.0, %v3796_v54  ;;  %vm868_vm8 = vcmp.gt.f32.partialorder %v3796_v54, 0.41421357 }
 0x10b   : > { %v871_v59 = vsel %vm867_vm6, %v3796_v54, 1.0  ;;  %vm902_vm7 = vcmp.gt.f32.partialorder %v3821_v12, 2.4142137  ;;  %v910_v50 = vadd.f32 1.0, %v3821_v12  ;;  %vm869_vm10 = vmxor %vm867_vm6, %vm2816_vm9  ;;  %v822_v26 = vmax.f32 %v821_v9, 0.0  ;;  %5402 = vst [vmem:[#allocation34_spill] sm:$0xff] %v3880_v57 }
 0x10c   : > { %2465 = vrcp.f32 %v875_v25  ;;  %v906_v42 = vsel %vm902_vm7, %v3821_v12, 1.0  ;;  %v829_v25 = vmul.f32 %v3693_v30, %v827_v28  ;;  %v850_v30 = vmin.f32 %v3666_v14, %v3676_v61  ;;  %vm3882_vm11 = vmand %vm868_vm8, %vm869_vm10 }
 0x10d   : > { %2467 = vrcp.f32 %v871_v59  ;;  %v3855_v59 = vmax.f32 %v1001_v53, %v1002_v46  ;;  %v2252_v33 = vadd.f32 -1.0, %v3821_v12  ;;  %v3897_v48 = vmul.f32 %v822_v26, %v818_v20  ;;  %vm904_vm13 = vmxor %vm902_vm7, %vm2816_vm9 }
 0x10e   : > { %2469 = vrcp.f32 %v910_v50  ;;  %v830_v43 = vadd.f32 %v829_v25, %v826_v47  ;;  %v3892_v50 = vsub.f32 %v846_v58, %v847_v40  ;;  %vm903_vm12 = vcmp.gt.f32.partialorder %v3821_v12, 0.41421357 }
 0x10f   : > { %2471 = vrcp.f32 %v906_v42  ;;  %v1004_v1 = vsub.f32 %v3704_v13, %v3855_v59  ;;  %v1005_v14 = vsub.f32 %v3710_v51, %v3855_v59  ;;  %v1006_v10 = vsub.f32 %v3727_v3, %v3855_v59  ;;  %5406 = vst [vmem:[#allocation36_spill] sm:$0xff] %v3897_v48  ;;  %vm3922_vm14 = vmand %vm903_vm12, %vm904_vm13 }
 0x110   : > { %v1007_v17 = vsub.f32 %v3730_v0, %v3855_v59  ;;  %5405 = vst [vmem:[#allocation35_spill] sm:$0xff] %v3892_v50  ;;  %v1008_v18 = vsub.f32 %v3707_v37, %v3855_v59  ;;  %v3899_v42 = vsub.f32 %v849_v21, %v850_v30  ;;  %v1009_v53 = vsub.f32 %v3713_v36, %v3855_v59 }
 0x111   : > { %v3914_v46 = vfloor.f32 %v3874_v45  ;;  %v1010_v41 = vsub.f32 %v3733_v19, %v3855_v59  ;;  %v1022_v47 = vmul.f32 1.442695, %v1005_v14  ;;  %v1024_v25 = vmul.f32 1.442695, %v1006_v10 }
 0x112   : > { %5407 = vst [vmem:[#allocation37_spill] sm:$0xff] %v3899_v42  ;;  %v1026_v58 = vmul.f32 1.442695, %v1007_v17  ;;  %v1028_v20 = vmul.f32 1.442695, %v1008_v18  ;;  %v1011_v30 = vsub.f32 %v3746_v56, %v3855_v59  ;;  %v1012_v17 = vsub.f32 %v3749_v52, %v3855_v59 }
 0x113   : > { %5408 = vst [vmem:[#allocation38_spill] sm:$0xff] %v3914_v46  ;;  %v2311_v14 = vtrunc.f32 %v3914_v46 }
 0x116   : > { %v2466_v27 = vpop.eup %2465 }
 0x117   : > { %v2468_v28 = vpop.eup %2467  ;;  %v877_v63 = vmul.f32 %v2466_v27, %v2249_v8  ;;  %v1020_v8 = vmul.f32 1.442695, %v1004_v1  ;;  %v943_v1 = vsub.f32 %v2248_v62, %v3676_v61  ;;  %v1018_v61 = vsub.f32 %v3808_v11, %v3855_v59 }
 0x118   : > { %v2470_v44 = vpop.eup %2469  ;;  %v873_v22 = vsub.f32 0.0, %v2468_v28  ;;  %v1030_v28 = vmul.f32 1.442695, %v1009_v53  ;;  %v1034_v53 = vmul.f32 1.442695, %v1011_v30 }
 0x119   : > { %v878_v9 = vsel %vm3882_vm11, %v877_v63, %v3796_v54  ;;  %v2472_v40 = vpop.eup %2471  ;;  %v912_v27 = vmul.f32 %v2470_v44, %v2252_v33  ;;  %2473 = vpow2.f32 %v1020_v8  ;;  %v831_v63 = vsub.f32 %v830_v43, %v3897_v48 }
 0x11a   : > { %v3920_v26 = vsel %vm867_vm6, %v873_v22, %v878_v9  ;;  %2475 = vpow2.f32 %v1022_v47  ;;  %v908_v10 = vsub.f32 0.0, %v2472_v40  ;;  %v1032_v33 = vmul.f32 1.442695, %v1010_v41 }
 0x11b   : > { %2477 = vpow2.f32 %v1024_v25  ;;  %v3935_v18 = vmul.f32 %v3920_v26, %v3920_v26  ;;  %v913_v44 = vsel %vm3922_vm14, %v912_v27, %v3821_v12  ;;  %v3941_v43 = vadd.f32 1.0, %v3914_v46 }
 0x11c   : > { %2479 = vpow2.f32 %v1026_v58  ;;  %v1013_v22 = vsub.f32 %v3758_v7, %v3855_v59  ;;  %v3947_v62 = vadd.f32 1e-09, %v831_v63  ;;  %v3951_v8 = vcvt.f32.s32 %v2311_v14 }
 0x11d   : > { %2481 = vpow2.f32 %v1028_v20  ;;  %v3953_v41 = vmax.f32 %v943_v1, 0.0  ;;  %v3957_v47 = vsel %vm902_vm7, %v908_v10, %v913_v44  ;;  %v1014_v25 = vsub.f32 %v3781_v49, %v3855_v59 }
 0x11e   : > { %2483 = vpow2.f32 %v1030_v28  ;;  %5411 = vst [vmem:[#allocation39_spill] sm:$0xff] %v3947_v62  ;;  %v1036_v58 = vmul.f32 1.442695, %v1012_v17  ;;  %v883_v40 = vmul.f32 0.080537446, %v3935_v18  ;;  %vm1086_vm15 = vcmp.eq.s32.totalorder %v3951_v8, 0 }
 0x11f   : > { %2485 = vpow2.f32 %v1032_v33  ;;  %vm1087_vm1 = vcmp.eq.s32.totalorder %v3951_v8, 1  ;;  %v1015_v20 = vsub.f32 %v3784_v60, %v3855_v59  ;;  %v1038_v30 = vmul.f32 1.442695, %v1013_v22 }
 0x120   : > { %2487 = vpow2.f32 %v1034_v53  ;;  %vm1088_vm2 = vcmp.eq.s32.totalorder %v3951_v8, 2  ;;  %v3971_v63 = vmul.f32 %v3957_v47, %v3957_v47  ;;  %vm1089_vm8 = vcmp.eq.s32.totalorder %v3951_v8, 3 }
 0x121   : > { %vm1090_vm9 = vcmp.eq.s32.totalorder %v3951_v8, 4  ;;  %vm1091_vm10 = vcmp.eq.s32.totalorder %v3951_v8, 5  ;;  %v1016_v14 = vsub.f32 %v3790_v32, %v3855_v59  ;;  %2489 = vpow2.f32 %v1036_v58 }
 0x122   : > { %v1040_v10 = vmul.f32 1.442695, %v1014_v25  ;;  %v2250_v44 = vadd.f32 -0.13877685, %v883_v40  ;;  %v1017_v22 = vsub.f32 %v3793_v35, %v3855_v59  ;;  %vm1092_vm12 = vcmp.eq.s32.totalorder %v3951_v8, 6 }
 0x123   : > { %v2474_v28 = vpop.eup %2473  ;;  %v1102_v23 = vsel %vm1086_vm15, %v3704_v13, 0.0  ;;  %2491 = vpow2.f32 %v1038_v30  ;;  %v1042_v9 = vmul.f32 1.442695, %v1015_v20  ;;  %v918_v40 = vmul.f32 0.080537446, %v3971_v63 }
 0x124   : > { %v2476_v1 = vpop.eup %2475  ;;  %v1052_v17 = vsel %vm707_vm0, %v2474_v28, 0.0  ;;  %v1103_v27 = vsel %vm1087_vm1, %v3710_v51, 0.0  ;;  %v1019_v30 = vsub.f32 %v3829_v39, %v3855_v59  ;;  %2493 = vpow2.f32 %v1040_v10 }
 0x125   : > { %v2478_v33 = vpop.eup %2477  ;;  %v1053_v53 = vsel %vm707_vm0, %v2476_v1, 0.0  ;;  %v1044_v20 = vmul.f32 1.442695, %v1016_v14  ;;  %2495 = vpow2.f32 %v1042_v9  ;;  %v1105_v29 = vsel %vm1089_vm8, %v3730_v0, 0.0 }
 0x126   : > { %v2480_v34 = vpop.eup %2479  ;;  %v1054_v58 = vadd.f32 %v1053_v53, %v1052_v17  ;;  %v1055_v25 = vsel %vm707_vm0, %v2478_v33, 0.0  ;;  %v885_v33 = vmul.f32 %v2250_v44, %v3935_v18  ;;  %v1046_v53 = vmul.f32 1.442695, %v1017_v22 }
 0x127   : > { %v2482_v28 = vpop.eup %2481  ;;  %v1057_v1 = vsel %vm707_vm0, %v2480_v34, 0.0  ;;  %v1104_v34 = vsel %vm1088_vm2, %v3727_v3, 0.0  ;;  %v1118_v10 = vsel %vm707_vm0, %v1102_v23, 0.0  ;;  %v2253_v14 = vadd.f32 -0.13877685, %v918_v40 }
 0x128   : > { %v2484_v2 = vpop.eup %2483  ;;  %v1056_v17 = vadd.f32 %v1055_v25, %v1054_v58  ;;  %v1059_v4 = vsel %vm707_vm0, %v2482_v28, 0.0  ;;  %v1106_v44 = vsel %vm1090_vm9, %v3707_v37, 0.0  ;;  %v1119_v22 = vsel %vm707_vm0, %v1103_v27, 0.0 }
 0x129   : > { %v2486_v15 = vpop.eup %2485  ;;  %v1061_v58 = vsel %vm707_vm0, %v2484_v2, 0.0  ;;  %2497 = vpow2.f32 %v1044_v20  ;;  %v1120_v9 = vadd.f32 %v1119_v22, %v1118_v10  ;;  %v1048_v57 = vmul.f32 1.442695, %v1018_v61 }
 0x12a   : > { %v1058_v6 = vadd.f32 %v1057_v1, %v1056_v17  ;;  %v2488_v25 = vpop.eup %2487  ;;  %v1121_v1 = vsel %vm707_vm0, %v1104_v34, 0.0  ;;  %v886_v17 = vadd.f32 0.19977711, %v885_v33  ;;  %v1063_v42 = vsel %vm707_vm0, %v2486_v15, 0.0 }
 0x12b   : > { %v1123_v23 = vsel %vm707_vm0, %v1105_v29, 0.0  ;;  %v2490_v40 = vpop.eup %2489  ;;  %2499 = vpow2.f32 %v1046_v53  ;;  %v1107_v48 = vsel %vm1091_vm10, %v3713_v36, 0.0  ;;  %v1122_v27 = vadd.f32 %v1121_v1, %v1120_v9 }
 0x12c   : > { %v1060_v28 = vadd.f32 %v1059_v4, %v1058_v6  ;;  %v920_v20 = vmul.f32 %v2253_v14, %v3971_v63  ;;  %v1065_v4 = vsel %vm707_vm0, %v2488_v25, 0.0  ;;  %vm1093_vm13 = vcmp.eq.s32.totalorder %v3951_v8, 7 }
 0x12d   : > { %v1125_v6 = vsel %vm707_vm0, %v1106_v44, 0.0  ;;  %v2492_v61 = vpop.eup %2491  ;;  %v1050_v15 = vmul.f32 1.442695, %v1019_v30  ;;  %v1108_v29 = vsel %vm1092_vm12, %v3733_v19, 0.0  ;;  %v1124_v53 = vadd.f32 %v1123_v23, %v1122_v27 }
 0x12e   : > { %v1062_v2 = vadd.f32 %v1061_v58, %v1060_v28  ;;  %vm863_vm15 = vcmp.gt.f32.partialorder %v3778_v31, 0.0  ;;  %2501 = vpow2.f32 %v1048_v57  ;;  %v1067_v34 = vsel %vm707_vm0, %v2490_v40, 0.0  ;;  %v2494_v14 = vpop.eup %2493 }
 0x12f   : > { %v1127_v10 = vsel %vm707_vm0, %v1107_v48, 0.0  ;;  %v887_v58 = vmul.f32 %v886_v17, %v3935_v18  ;;  %v1109_v44 = vsel %vm1093_vm13, %v3746_v56, 0.0  ;;  %v1126_v30 = vadd.f32 %v1125_v6, %v1124_v53  ;;  %v2496_v9 = vpop.eup %2495 }
 0x130   : > { %v1064_v33 = vadd.f32 %v1063_v42, %v1062_v2  ;;  %v921_v42 = vadd.f32 0.19977711, %v920_v20  ;;  %v1069_v25 = vsel %vm707_vm0, %v2492_v61, 0.0  ;;  %vm1094_vm1 = vcmp.eq.s32.totalorder %v3951_v8, 8 }
 0x131   : > { %v1129_v28 = vsel %vm707_vm0, %v1108_v29, 0.0  ;;  %vm898_vm2 = vcmp.gt.f32.partialorder %v3798_v38, 0.0  ;;  %2503 = vpow2.f32 %v1050_v15  ;;  %v1128_v48 = vadd.f32 %v1127_v10, %v1126_v30 }
 0x132   : > { %v1066_v22 = vadd.f32 %v1065_v4, %v1064_v33  ;;  %v5304_v1 = vmov 0.0   ;;  %v1071_v40 = vsel %vm707_vm0, %v2494_v14, 0.0  ;;  %v1131_v2 = vsel %vm707_vm0, %v1109_v44, 0.0 }
 0x133   : > { %v4035_v17 = vsel %vm863_vm15, 1.0, %v5304_v1  ;;  %v4040_v23 = vsel %vm3882_vm11, 0.7853982, %v5304_v1  ;;  %v2498_v27 = vpop.eup %2497  ;;  %v2251_v20 = vadd.f32 -0.3333295, %v887_v58  ;;  %v1110_v6 = vsel %vm1094_vm1, %v3749_v52, 0.0 }
 0x134   : > { %v1068_v57 = vadd.f32 %v1067_v34, %v1066_v22  ;;  %v1130_v61 = vadd.f32 %v1129_v28, %v1128_v48  ;;  %v4046_v15 = vsel %vm898_vm2, 1.0, %v5304_v1  ;;  %v922_v33 = vmul.f32 %v921_v42, %v3971_v63 }
 0x135   : > { %v1073_v29 = vsel %vm707_vm0, %v2496_v9, 0.0  ;;  %vm1095_vm11 = vcmp.eq.s32.totalorder %v3951_v8, 9  ;;  %v2500_v55 = vpop.eup %2499  ;;  %vm1096_vm8 = vcmp.eq.s32.totalorder %v3951_v8, 10  ;;  %vm1097_vm9 = vcmp.eq.s32.totalorder %v3951_v8, 11 }
 0x136   : > { %v1070_v4 = vadd.f32 %v1069_v25, %v1068_v57  ;;  %v1132_v34 = vadd.f32 %v1131_v2, %v1130_v61  ;;  %v1075_v10 = vsel %vm707_vm0, %v2498_v27, 0.0  ;;  %vm1098_vm10 = vcmp.eq.s32.totalorder %v3951_v8, 12 }
 0x137   : > { %v1133_v14 = vsel %vm707_vm0, %v1110_v6, 0.0  ;;  %v4057_v58 = vadd.s32 1, %v3951_v8  ;;  %v889_v22 = vmul.f32 %v2251_v20, %v3935_v18  ;;  %vm1099_vm12 = vcmp.eq.s32.totalorder %v3951_v8, 13 }
 0x138   : > { %v1072_v53 = vadd.f32 %v1071_v40, %v1070_v4  ;;  %v1111_v30 = vsel %vm1095_vm11, %v3758_v7, 0.0  ;;  %v2502_v42 = vpop.eup %2501  ;;  %v2254_v25 = vadd.f32 -0.3333295, %v922_v33  ;;  %v1077_v28 = vsel %vm707_vm0, %v2500_v55, 0.0 }
 0x139   : > { %vm1100_vm13 = vcmp.eq.s32.totalorder %v3951_v8, 14  ;;  %v1112_v9 = vsel %vm1096_vm8, %v3781_v49, 0.0  ;;  %v1113_v48 = vsel %vm1097_vm9, %v3784_v60, 0.0  ;;  %v1114_v18 = vsel %vm1098_vm10, %v3790_v32, 0.0 }
 0x13a   : > { %v1074_v44 = vadd.f32 %v1073_v29, %v1072_v53  ;;  %v1134_v40 = vadd.f32 %v1133_v14, %v1132_v34  ;;  %v1135_v2 = vsel %vm707_vm0, %v1111_v30, 0.0  ;;  %vm1150_vm15 = vcmp.eq.s32.totalorder %v4057_v58, 0 }
 0x13b   : > { %vm1151_vm1 = vcmp.eq.s32.totalorder %v4057_v58, 1  ;;  %vm1152_vm2 = vcmp.eq.s32.totalorder %v4057_v58, 2  ;;  %v2504_v27 = vpop.eup %2503  ;;  %v4074_v20 = vmul.f32 %v889_v22, %v3920_v26  ;;  %v1079_v6 = vsel %vm707_vm0, %v2502_v42, 0.0 }
 0x13c   : > { %v1076_v57 = vadd.f32 %v1075_v10, %v1074_v44  ;;  %v1115_v61 = vsel %vm1099_vm12, %v3793_v35, 0.0  ;;  %v4081_v33 = vmul.f32 %v2254_v25, %v3971_v63  ;;  %v1116_v29 = vsel %vm1100_vm13, %v3808_v11, 0.0 }
 0x13d   : > { %v1137_v55 = vsel %vm707_vm0, %v1112_v9, 0.0  ;;  %vm1153_vm11 = vcmp.eq.s32.totalorder %v4057_v58, 3  ;;  %v1136_v53 = vadd.f32 %v1135_v2, %v1134_v40  ;;  %v1166_v34 = vsel %vm1150_vm15, %v3704_v13, 0.0 }
 0x13e   : > { %v1078_v4 = vadd.f32 %v1077_v28, %v1076_v57  ;;  %v1167_v10 = vsel %vm1151_vm1, %v3710_v51, 0.0  ;;  %v1168_v14 = vsel %vm1152_vm2, %v3727_v3, 0.0  ;;  %v1081_v63 = vsel %vm707_vm0, %v2504_v27, 0.0  ;;  %v4103_v3 = vld [vmem:[%s3662_s23 + $0x10] sm:$0x1] }
 0x13f   : > { %v1139_v44 = vsel %vm707_vm0, %v1113_v48, 0.0  ;;  %vm1154_vm8 = vcmp.eq.s32.totalorder %v4057_v58, 4  ;;  %v1141_v30 = vsel %vm707_vm0, %v1114_v18, 0.0  ;;  %v4096_v42 = vsel %vm707_vm0, %v1115_v61, 0.0  ;;  %v4110_v57 = vld [vmem:[%s3662_s23 + $0x11] sm:$0x1] }
 0x140   : > { %v1080_v22 = vadd.f32 %v1079_v6, %v1078_v4  ;;  %v4099_v13 = vsel %vm707_vm0, %v1116_v29, 0.0  ;;  %v1169_v51 = vsel %vm1153_vm11, %v3730_v0, 0.0  ;;  %vm1155_vm9 = vcmp.eq.s32.totalorder %v4057_v58, 5  ;;  %v4119_v4 = vld [vmem:[%s3662_s23 + $0x12] sm:$0x1] }
 0x141   : > { %v1182_v25 = vsel %vm707_vm0, %v1166_v34, 0.0  ;;  %v1183_v28 = vsel %vm707_vm0, %v1167_v10, 0.0  ;;  %v1185_v9 = vsel %vm707_vm0, %v1168_v14, 0.0  ;;  %v1138_v48 = vadd.f32 %v1137_v55, %v1136_v53  ;;  %v4122_v6 = vld [vmem:[%s3662_s23 + $0x13] sm:$0x1] }
 0x142   : > { %v1170_v18 = vsel %vm1154_vm8, %v3707_v37, 0.0  ;;  %v1184_v40 = vadd.f32 %v1183_v28, %v1182_v25  ;;  %v4114_v2 = vmin.f32 %v3953_v41, 14.99  ;;  %v1082_v0 = vadd.f32 %v1081_v63, %v1080_v22  ;;  %v4132_v29 = vld [vmem:[%s3662_s23 + $0x14] sm:$0x1] }
 0x143   : > { %vm1156_vm10 = vcmp.eq.s32.totalorder %v4057_v58, 6  ;;  %v1187_v27 = vsel %vm707_vm0, %v1169_v51, 0.0  ;;  %v1243_v61 = vsel %vm3716_vm5, %v4103_v3, -inf  ;;  %vm1157_vm12 = vcmp.eq.s32.totalorder %v4057_v58, 7  ;;  %v4142_v34 = vld [vmem:[%s3662_s23 + $0x15] sm:$0x1] }
 0x144   : > { %v1171_v37 = vsel %vm1155_vm9, %v3713_v36, 0.0  ;;  %v1186_v41 = vadd.f32 %v1185_v9, %v1184_v40  ;;  %v1244_v55 = vsel %vm3716_vm5, %v4110_v57, -inf  ;;  %vm1158_vm13 = vcmp.eq.s32.totalorder %v4057_v58, 8  ;;  %v4150_v22 = vld [vmem:[%s3662_s23 + $0x16] sm:$0x1] }
 0x145   : > { %vm1159_vm15 = vcmp.eq.s32.totalorder %v4057_v58, 9  ;;  %vm1160_vm1 = vcmp.eq.s32.totalorder %v4057_v58, 10  ;;  %v1189_v53 = vsel %vm707_vm0, %v1170_v18, 0.0  ;;  %vm1101_vm2 = vcmp.eq.s32.totalorder %v3951_v8, 15  ;;  %v4157_v25 = vld [vmem:[%s3662_s23 + $0x17] sm:$0x1] }
 0x146   : > { %v1140_v36 = vadd.f32 %v1139_v44, %v1138_v48  ;;  %vm1161_vm11 = vcmp.eq.s32.totalorder %v4057_v58, 11  ;;  %v1172_v10 = vsel %vm1156_vm10, %v3733_v19, 0.0  ;;  %v1188_v14 = vadd.f32 %v1187_v27, %v1186_v41  ;;  %v4178_v40 = vld [vmem:[%s3662_s23 + $0x18] sm:$0x1] }
 0x147   : > { %2505 = vlog2.f32 %v1082_v0  ;;  %v1173_v63 = vsel %vm1157_vm12, %v3746_v56, 0.0  ;;  %v1191_v51 = vsel %vm707_vm0, %v1171_v37, 0.0  ;;  %v1247_v44 = vsel %vm3716_vm5, %v4132_v29, -inf  ;;  %v4181_v0 = vld [vmem:[%s3662_s23 + $0x19] sm:$0x1] }
 0x148   : > { %vm862_vm8 = vcmp.lt.f32.partialorder %v3778_v31, 0.0  ;;  %vm1162_vm9 = vcmp.eq.s32.totalorder %v4057_v58, 12  ;;  %v1190_v19 = vadd.f32 %v1189_v53, %v1188_v14  ;;  %v1245_v28 = vsel %vm3716_vm5, %v4119_v4, -inf  ;;  %v4185_v14 = vld [vmem:[%s3662_s23 + $0x1a] sm:$0x1] }
 0x149   : > { %v1246_v56 = vsel %vm3716_vm5, %v4122_v6, -inf  ;;  %v1249_v9 = vsel %vm3716_vm5, %v4142_v34, -inf  ;;  %v1174_v48 = vsel %vm1158_vm13, %v3749_v52, 0.0  ;;  %v1193_v18 = vsel %vm707_vm0, %v1172_v10, 0.0  ;;  %v4198_v10 = vld [vmem:[%s3662_s23 + $0x1b] sm:$0x1] }
 0x14a   : > { %v1248_v27 = vmax.f32 %v1243_v61, %v1247_v44  ;;  %v1250_v37 = vmax.f32 %v1244_v55, %v1249_v9  ;;  %vm897_vm10 = vcmp.lt.f32.partialorder %v3798_v38, 0.0  ;;  %v1142_v41 = vadd.f32 %v1141_v30, %v1140_v36  ;;  %v4201_v30 = vld [vmem:[%s3662_s23 + $0x1c] sm:$0x1]  ;;  %v4207_v9 = vld [vmem:[%s3662_s23 + $0x1d] sm:$0x1] }
 0x14b   : > { %v1192_v53 = vadd.f32 %v1191_v51, %v1190_v19  ;;  %v1251_v1 = vsel %vm3716_vm5, %v4150_v22, -inf  ;;  %v1253_v52 = vsel %vm3716_vm5, %v4157_v25, -inf  ;;  %v1175_v61 = vsel %vm1159_vm15, %v3758_v7, 0.0 }
 0x14c   : > { %v1195_v55 = vsel %vm707_vm0, %v1173_v63, 0.0  ;;  %v1252_v36 = vmax.f32 %v1245_v28, %v1251_v1  ;;  %v1254_v51 = vmax.f32 %v1246_v56, %v1253_v52  ;;  %v1176_v44 = vsel %vm1160_vm1, %v3781_v49, 0.0 }
 0x14d   : > { %v1194_v19 = vadd.f32 %v1193_v18, %v1192_v53  ;;  %v1255_v7 = vsel %vm3716_vm5, %v4178_v40, -inf  ;;  %v1257_v63 = vsel %vm3716_vm5, %v4181_v0, -inf  ;;  %v1197_v50 = vsel %vm707_vm0, %v1174_v48, 0.0  ;;  %v4221_v18 = vld [vmem:[%s3662_s23 + $0x1e] sm:$0x1] }
 0x14e   : > { %v1256_v62 = vmax.f32 %v1248_v27, %v1255_v7  ;;  %v1258_v1 = vmax.f32 %v1250_v37, %v1257_v63  ;;  %v1259_v28 = vsel %vm3716_vm5, %v4185_v14, -inf  ;;  %v1144_v49 = vadd.f32 %v4096_v42, %v1142_v41  ;;  %v4224_v53 = vld [vmem:[%s3662_s23 + $0x1f] sm:$0x1] }
 0x14f   : > { %v1196_v56 = vadd.f32 %v1195_v55, %v1194_v19  ;;  %v1260_v52 = vmax.f32 %v1252_v36, %v1259_v28  ;;  %v1261_v46 = vsel %vm3716_vm5, %v4198_v10, -inf  ;;  %v1199_v48 = vsel %vm707_vm0, %v1175_v61, 0.0 }
 0x150   : > { %v1262_v27 = vmax.f32 %v1254_v51, %v1261_v46  ;;  %v1263_v37 = vsel %vm3716_vm5, %v4201_v30, -inf  ;;  %v1265_v42 = vsel %vm3716_vm5, %v4207_v9, -inf  ;;  %v1177_v41 = vsel %vm1161_vm11, %v3784_v60, 0.0 }
 0x151   : > { %v1198_v55 = vadd.f32 %v1197_v50, %v1196_v56  ;;  %v1264_v36 = vmax.f32 %v1256_v62, %v1263_v37  ;;  %v1266_v19 = vmax.f32 %v1258_v1, %v1265_v42  ;;  %v2506_v7 = vpop.eup %2505  ;;  %v1117_v46 = vsel %vm1101_vm2, %v3829_v39, 0.0 }
 0x152   : > { %v1201_v61 = vsel %vm707_vm0, %v1176_v44, 0.0  ;;  %v1267_v51 = vsel %vm3716_vm5, %v4221_v18, -inf  ;;  %v1269_v63 = vsel %vm3716_vm5, %v4224_v53, -inf  ;;  %v4252_v1 = vsel %vm862_vm8, -1.0, %v4035_v17 }
 0x153   : > { %v1200_v28 = vadd.f32 %v1199_v48, %v1198_v55  ;;  %v1268_v60 = vmax.f32 %v1260_v52, %v1267_v51  ;;  %v1270_v50 = vmax.f32 %v1262_v27, %v1269_v63  ;;  %v1271_v62 = vmax.f32 %v1264_v36, %v1266_v19 }
 0x154   : > { %v1146_v8 = vadd.f32 %v4099_v13, %v1144_v49  ;;  %v1178_v44 = vsel %vm1162_vm9, %v3790_v32, 0.0  ;;  %v1203_v56 = vsel %vm707_vm0, %v1177_v41, 0.0  ;;  %v1084_v37 = vmul.f32 0.6931472, %v2506_v7 }
 0x155   : > { %v1202_v42 = vadd.f32 %v1201_v61, %v1200_v28  ;;  %v4260_v48 = vfloor.f32 %v4114_v2  ;;  %v1272_v52 = vmax.f32 %v1268_v60, %v1270_v50  ;;  %v881_v31 = vsel %vm867_vm6, 1.5707964, %v4040_v23 }
 0x156   : > { %v4268_v17 = vsel %vm897_vm10, -1.0, %v4046_v15  ;;  %v5412_v13 = vmov 0.0   ;;  %v1147_v49 = vsel %vm707_vm0, %v1117_v46, 0.0  ;;  %v891_v27 = vadd.f32 %v4074_v20, %v3920_v26 }
 0x157   : > { %v915_v32 = vsel %vm3922_vm14, 0.7853982, %v5412_v13  ;;  %v925_v41 = vmul.f32 %v4081_v33, %v3957_v47  ;;  %vm1163_vm12 = vcmp.eq.s32.totalorder %v4057_v58, 13  ;;  %v4279_v54 = vmax.f32 %v1271_v62, %v1272_v52 }
 0x158   : > { %vm1164_vm6 = vcmp.eq.s32.totalorder %v4057_v58, 14  ;;  %vm1165_vm13 = vcmp.eq.s32.totalorder %v4057_v58, 15  ;;  %v1204_v38 = vadd.f32 %v1203_v56, %v1202_v42  ;;  %v1205_v21 = vsel %vm707_vm0, %v1178_v44, 0.0 }
 0x159   : > { %v4285_v23 = vadd.f32 %v1084_v37, %v3855_v59  ;;  %v1148_v15 = vadd.f32 %v1147_v49, %v1146_v8  ;;  %v2313_v26 = vtrunc.f32 %v4260_v48  ;;  %v1274_v20 = vsub.f32 %v4103_v3, %v4279_v54 }
 0x15a   : > { %v1179_v33 = vsel %vm1163_vm12, %v3793_v35, 0.0  ;;  %v1275_v55 = vsub.f32 %v4110_v57, %v4279_v54  ;;  %v1276_v36 = vsub.f32 %v4119_v4, %v4279_v54  ;;  %v1277_v19 = vsub.f32 %v4122_v6, %v4279_v54 }
 0x15b   : > { %v4297_v7 = vadd.f32 %v891_v27, %v881_v31  ;;  %v4301_v59 = vsel %vm902_vm7, 1.5707964, %v915_v32  ;;  %v4304_v46 = vadd.f32 %v925_v41, %v3957_v47  ;;  %v1278_v35 = vsub.f32 %v4132_v29, %v4279_v54 }
 0x15c   : > { %v1180_v61 = vsel %vm1164_vm6, %v3808_v11, 0.0  ;;  %v1181_v51 = vsel %vm1165_vm13, %v3829_v39, 0.0  ;;  %v1206_v63 = vadd.f32 %v1205_v21, %v1204_v38  ;;  %v1279_v12 = vsub.f32 %v4142_v34, %v4279_v54 }
 0x15d   : > { %v1207_v28 = vsel %vm707_vm0, %v1179_v33, 0.0  ;;  %v1213_v47 = vsub.f32 %v4285_v23, %v1148_v15  ;;  %v4318_v60 = vcvt.f32.s32 %v2313_v26  ;;  %v1290_v50 = vmul.f32 1.442695, %v1274_v20 }
 0x15e   : > { %v1280_v62 = vsub.f32 %v4150_v22, %v4279_v54  ;;  %v1292_v8 = vmul.f32 1.442695, %v1275_v55  ;;  %v1294_v11 = vmul.f32 1.442695, %v1276_v36  ;;  %v1296_v44 = vmul.f32 1.442695, %v1277_v19 }
 0x15f   : > { %v1209_v58 = vsel %vm707_vm0, %v1180_v61, 0.0  ;;  %v1211_v39 = vsel %vm707_vm0, %v1181_v51, 0.0  ;;  %2507 = vpow2.f32 %v1290_v50  ;;  %v1298_v56 = vmul.f32 1.442695, %v1278_v35 }
 0x160   : > { %v1208_v37 = vadd.f32 %v1207_v28, %v1206_v63  ;;  %v1281_v42 = vsub.f32 %v4157_v25, %v4279_v54  ;;  %2509 = vpow2.f32 %v1292_v8  ;;  %v1300_v52 = vmul.f32 1.442695, %v1279_v12 }
 0x161   : > { %v5413_v31 = vsub.f32 %v3941_v43, %v3874_v45  ;;  %v4332_v32 = vadd.f32 1.0, %v4260_v48  ;;  %2511 = vpow2.f32 %v1294_v11  ;;  %vm1356_vm7 = vcmp.eq.s32.totalorder %v4318_v60, 0 }
 0x162   : > { %v1282_v49 = vsub.f32 %v4178_v40, %v4279_v54  ;;  %2513 = vpow2.f32 %v1296_v44  ;;  %v1302_v27 = vmul.f32 1.442695, %v1280_v62  ;;  %vm1357_vm14 = vcmp.eq.s32.totalorder %v4318_v60, 1 }
 0x163   : > { %v4329_v13 = vmul.f32 %v1213_v47, %v5413_v31  ;;  %2515 = vpow2.f32 %v1298_v56  ;;  %vm1358_vm15 = vcmp.eq.s32.totalorder %v4318_v60, 2  ;;  %vm1359_vm1 = vcmp.eq.s32.totalorder %v4318_v60, 3 }
 0x164   : > { %vm1360_vm2 = vcmp.eq.s32.totalorder %v4318_v60, 4  ;;  %v1210_v43 = vadd.f32 %v1209_v58, %v1208_v37  ;;  %v1283_v41 = vsub.f32 %v4181_v0, %v4279_v54  ;;  %2517 = vpow2.f32 %v1300_v52 }
 0x165   : > { %v1304_v38 = vmul.f32 1.442695, %v1281_v42  ;;  %v1284_v21 = vsub.f32 %v4185_v14, %v4279_v54  ;;  %v1285_v15 = vsub.f32 %v4198_v10, %v4279_v54  ;;  %vm1361_vm11 = vcmp.eq.s32.totalorder %v4318_v60, 5 }
 0x166   : > { %vm1362_vm8 = vcmp.eq.s32.totalorder %v4318_v60, 6  ;;  %2519 = vpow2.f32 %v1302_v27  ;;  %v1306_v26 = vmul.f32 1.442695, %v1282_v49  ;;  %vm1363_vm9 = vcmp.eq.s32.totalorder %v4318_v60, 7 }
 0x167   : > { %v1372_v20 = vsel %vm1356_vm7, %v4103_v3, 0.0  ;;  %v1286_v33 = vsub.f32 %v4201_v30, %v4279_v54  ;;  %v1287_v55 = vsub.f32 %v4207_v9, %v4279_v54  ;;  %v1373_v36 = vsel %vm1357_vm14, %v4110_v57, 0.0 }
 0x168   : > { %v1374_v19 = vsel %vm1358_vm15, %v4119_v4, 0.0  ;;  %v4363_v35 = vadd.f32 %v1211_v39, %v1210_v43  ;;  %v1288_v61 = vsub.f32 %v4221_v18, %v4279_v54  ;;  %2521 = vpow2.f32 %v1304_v38 }
 0x169   : > { %v1308_v51 = vmul.f32 1.442695, %v1283_v41  ;;  %vm1364_vm10 = vcmp.eq.s32.totalorder %v4318_v60, 8  ;;  %v2508_v63 = vpop.eup %2507  ;;  %v1310_v12 = vmul.f32 1.442695, %v1284_v21  ;;  %vm1365_vm12 = vcmp.eq.s32.totalorder %v4318_v60, 9 }
 0x16a   : > { %v1312_v28 = vmul.f32 1.442695, %v1285_v15  ;;  %v1375_v47 = vsel %vm1359_vm1, %v4122_v6, 0.0  ;;  %v1388_v50 = vsel %vm707_vm0, %v1372_v20, 0.0  ;;  %v2510_v62 = vpop.eup %2509  ;;  %2523 = vpow2.f32 %v1306_v26 }
 0x16b   : > { %v1322_v8 = vsel %vm707_vm0, %v2508_v63, 0.0  ;;  %vm1366_vm6 = vcmp.eq.s32.totalorder %v4318_v60, 10  ;;  %vm1367_vm13 = vcmp.eq.s32.totalorder %v4318_v60, 11  ;;  %v1389_v11 = vsel %vm707_vm0, %v1373_v36, 0.0  ;;  %v2512_v58 = vpop.eup %2511 }
 0x16c   : > { %v1391_v44 = vsel %vm707_vm0, %v1374_v19, 0.0  ;;  %v1314_v39 = vmul.f32 1.442695, %v1286_v33  ;;  %v1323_v56 = vsel %vm707_vm0, %v2510_v62, 0.0  ;;  %vm1368_vm7 = vcmp.eq.s32.totalorder %v4318_v60, 12  ;;  %v2514_v52 = vpop.eup %2513 }
 0x16d   : > { %vm1369_vm14 = vcmp.eq.s32.totalorder %v4318_v60, 13  ;;  %v1376_v37 = vsel %vm1360_vm2, %v4132_v29, 0.0  ;;  %v1390_v42 = vadd.f32 %v1389_v11, %v1388_v50  ;;  %2525 = vpow2.f32 %v1308_v51  ;;  %v2516_v43 = vpop.eup %2515 }
 0x16e   : > { %v1324_v31 = vadd.f32 %v1323_v56, %v1322_v8  ;;  %v1325_v49 = vsel %vm707_vm0, %v2512_v58, 0.0  ;;  %vm1370_vm15 = vcmp.eq.s32.totalorder %v4318_v60, 14  ;;  %v1393_v27 = vsel %vm707_vm0, %v1375_v47, 0.0  ;;  %v2518_v26 = vpop.eup %2517 }
 0x16f   : > { %v1316_v41 = vmul.f32 1.442695, %v1287_v55  ;;  %v1327_v38 = vsel %vm707_vm0, %v2514_v52, 0.0  ;;  %v1377_v21 = vsel %vm1361_vm11, %v4142_v34, 0.0  ;;  %v1392_v15 = vadd.f32 %v1391_v44, %v1390_v42 }
 0x170   : > { %2527 = vpow2.f32 %v1310_v12  ;;  %v1318_v20 = vmul.f32 1.442695, %v1288_v61  ;;  %v1326_v33 = vadd.f32 %v1325_v49, %v1324_v31  ;;  %v1395_v36 = vsel %vm707_vm0, %v1376_v37, 0.0  ;;  %v2520_v63 = vpop.eup %2519 }
 0x171   : > { %2529 = vpow2.f32 %v1312_v28  ;;  %v1329_v19 = vsel %vm707_vm0, %v2516_v43, 0.0  ;;  %v1378_v55 = vsel %vm1362_vm8, %v4150_v22, 0.0  ;;  %v1394_v51 = vadd.f32 %v1393_v27, %v1392_v15 }
 0x172   : > { %v1289_v47 = vsub.f32 %v4224_v53, %v4279_v54  ;;  %2531 = vpow2.f32 %v1314_v39  ;;  %v1328_v50 = vadd.f32 %v1327_v38, %v1326_v33  ;;  %v1397_v12 = vsel %vm707_vm0, %v1377_v21, 0.0  ;;  %v2522_v8 = vpop.eup %2521 }
 0x173   : > { %2533 = vpow2.f32 %v1316_v41  ;;  %v1331_v61 = vsel %vm707_vm0, %v2518_v26, 0.0  ;;  %v1379_v28 = vsel %vm1363_vm9, %v4157_v25, 0.0  ;;  %v1396_v62 = vadd.f32 %v1395_v36, %v1394_v51 }
 0x174   : > { %v1216_v11 = vsub.f32 %v4285_v23, %v4363_v35  ;;  %v1330_v44 = vadd.f32 %v1329_v19, %v1328_v50  ;;  %vm1371_vm1 = vcmp.eq.s32.totalorder %v4318_v60, 15  ;;  %v1399_v58 = vsel %vm707_vm0, %v1378_v55, 0.0  ;;  %v2524_v42 = vpop.eup %2523 }
 0x175   : > { %2535 = vpow2.f32 %v1318_v20  ;;  %v1333_v39 = vsel %vm707_vm0, %v2520_v63, 0.0  ;;  %v1380_v56 = vsel %vm1364_vm10, %v4178_v40, 0.0  ;;  %v1398_v37 = vadd.f32 %v1397_v12, %v1396_v62 }
 0x176   : > { %v1320_v52 = vmul.f32 1.442695, %v1289_v47  ;;  %v1332_v31 = vadd.f32 %v1331_v61, %v1330_v44  ;;  %v1381_v49 = vsel %vm1365_vm12, %v4181_v0, 0.0  ;;  %v1401_v27 = vsel %vm707_vm0, %v1379_v28, 0.0 }
 0x177   : > { %v1335_v43 = vsel %vm707_vm0, %v2522_v8, 0.0  ;;  %v1382_v41 = vsel %vm1366_vm6, %v4185_v14, 0.0  ;;  %v1383_v38 = vsel %vm1367_vm13, %v4198_v10, 0.0  ;;  %v1400_v21 = vadd.f32 %v1399_v58, %v1398_v37  ;;  %v2526_v15 = vpop.eup %2525 }
 0x178   : > { %v1334_v26 = vadd.f32 %v1333_v39, %v1332_v31  ;;  %v1384_v20 = vsel %vm1368_vm7, %v4201_v30, 0.0  ;;  %v1385_v33 = vsel %vm1369_vm14, %v4207_v9, 0.0  ;;  %v1403_v36 = vsel %vm707_vm0, %v1380_v56, 0.0  ;;  %v4446_v39 = vld [vmem:[%s3662_s23 + $0x20] sm:$0x1] }
 0x179   : > { %v1337_v19 = vsel %vm707_vm0, %v2524_v42, 0.0  ;;  %v1386_v55 = vsel %vm1370_vm15, %v4221_v18, 0.0  ;;  %v1402_v51 = vadd.f32 %v1401_v27, %v1400_v21  ;;  %v4434_v63 = vadd.s32 1, %v4318_v60 }
 0x17a   : > { %v2528_v47 = vpop.eup %2527  ;;  %2537 = vpow2.f32 %v1320_v52  ;;  %v1336_v50 = vadd.f32 %v1335_v43, %v1334_v26  ;;  %v4439_v12 = vsel %vm1371_vm1, %v4224_v53, 0.0  ;;  %v1405_v61 = vsel %vm707_vm0, %v1381_v49, 0.0 }
 0x17b   : > { %v2530_v28 = vpop.eup %2529  ;;  %v1339_v62 = vsel %vm707_vm0, %v2526_v15, 0.0  ;;  %v1404_v8 = vadd.f32 %v1403_v36, %v1402_v51  ;;  %v1407_v44 = vsel %vm707_vm0, %v1382_v41, 0.0  ;;  %v1409_v58 = vsel %vm707_vm0, %v1383_v38, 0.0 }
 0x17c   : > { %v2532_v56 = vpop.eup %2531  ;;  %v1338_v37 = vadd.f32 %v1337_v19, %v1336_v50  ;;  %v1411_v42 = vsel %vm707_vm0, %v1384_v20, 0.0  ;;  %v1413_v60 = vsel %vm707_vm0, %v1385_v33, 0.0  ;;  %v4451_v52 = vsel %vm707_vm0, %v1386_v55, 0.0 }
 0x17d   : > { %v2534_v31 = vpop.eup %2533  ;;  %v1341_v49 = vsel %vm707_vm0, %v2528_v47, 0.0  ;;  %v1406_v27 = vadd.f32 %v1405_v61, %v1404_v8  ;;  %vm1420_vm2 = vcmp.eq.s32.totalorder %v4434_v63, 0  ;;  %vm1421_vm11 = vcmp.eq.s32.totalorder %v4434_v63, 1 }
 0x17e   : > { %v1340_v43 = vadd.f32 %v1339_v62, %v1338_v37  ;;  %vm1422_vm8 = vcmp.eq.s32.totalorder %v4434_v63, 2  ;;  %v5414_v41 = vsub.f32 %v3724_v24, %v3826_v5  ;;  %v1513_v21 = vsel %vm3716_vm5, %v4446_v39, -inf }
 0x17f   : > { %v2536_v15 = vpop.eup %2535  ;;  %v1343_v26 = vsel %vm707_vm0, %v2530_v28, 0.0  ;;  %v1345_v20 = vsel %vm707_vm0, %v2532_v56, 0.0  ;;  %v1408_v33 = vadd.f32 %v1407_v44, %v1406_v27  ;;  %vm1423_vm9 = vcmp.eq.s32.totalorder %v4434_v63, 3 }
 0x180   : > { %v4460_v38 = vmax.f32 %v5414_v41, 0.0  ;;  %v1342_v36 = vadd.f32 %v1341_v49, %v1340_v43  ;;  %v1347_v19 = vsel %vm707_vm0, %v2534_v31, 0.0  ;;  %v1436_v55 = vsel %vm1420_vm2, %v4103_v3, 0.0  ;;  %v4491_v31 = vld [vmem:[%s3662_s23 + $0x21] sm:$0x1] }
 0x181   : > { %v1437_v24 = vsel %vm1421_vm11, %v4110_v57, 0.0  ;;  %v1410_v5 = vadd.f32 %v1409_v58, %v1408_v33  ;;  %vm1424_vm10 = vcmp.eq.s32.totalorder %v4434_v63, 4  ;;  %vm1425_vm12 = vcmp.eq.s32.totalorder %v4434_v63, 5  ;;  %v4502_v41 = vld [vmem:[%s3662_s23 + $0x22] sm:$0x1] }
 0x182   : > { %v1438_v51 = vsel %vm1422_vm8, %v4119_v4, 0.0  ;;  %v1344_v47 = vadd.f32 %v1343_v26, %v1342_v36  ;;  %v1349_v50 = vsel %vm707_vm0, %v2536_v15, 0.0  ;;  %vm1426_vm6 = vcmp.eq.s32.totalorder %v4434_v63, 6  ;;  %v4509_v33 = vld [vmem:[%s3662_s23 + $0x24] sm:$0x1] }
 0x183   : > { %v1439_v61 = vsel %vm1423_vm9, %v4122_v6, 0.0  ;;  %vm1427_vm13 = vcmp.eq.s32.totalorder %v4434_v63, 7  ;;  %vm1428_vm7 = vcmp.eq.s32.totalorder %v4434_v63, 8  ;;  %v1452_v3 = vsel %vm707_vm0, %v1436_v55, 0.0 }
 0x184   : > { %v1453_v57 = vsel %vm707_vm0, %v1437_v24, 0.0  ;;  %v2538_v28 = vpop.eup %2537  ;;  %v1346_v62 = vadd.f32 %v1345_v20, %v1344_v47  ;;  %v1440_v4 = vsel %vm1424_vm10, %v4132_v29, 0.0  ;;  %v1455_v44 = vsel %vm707_vm0, %v1438_v51, 0.0  ;;  %v4530_v51 = vld [vmem:[%s3662_s23 + $0x27] sm:$0x1] }
 0x185   : > { %v1454_v8 = vadd.f32 %v1453_v57, %v1452_v3  ;;  %v1412_v58 = vadd.f32 %v1411_v42, %v1410_v5  ;;  %vm1429_vm14 = vcmp.eq.s32.totalorder %v4434_v63, 9  ;;  %vm1430_vm15 = vcmp.eq.s32.totalorder %v4434_v63, 10  ;;  %v4538_v47 = vld [vmem:[%s3662_s23 + $0x28] sm:$0x1] }
 0x186   : > { %v1457_v6 = vsel %vm707_vm0, %v1439_v61, 0.0  ;;  %v1348_v56 = vadd.f32 %v1347_v19, %v1346_v62  ;;  %vm1431_vm1 = vcmp.eq.s32.totalorder %v4434_v63, 11  ;;  %v1441_v29 = vsel %vm1425_vm12, %v4142_v34, 0.0 }
 0x187   : > { %v1456_v37 = vadd.f32 %v1455_v44, %v1454_v8  ;;  %v1351_v42 = vsel %vm707_vm0, %v2538_v28, 0.0  ;;  %v1442_v49 = vsel %vm1426_vm6, %v4150_v22, 0.0  ;;  %v1443_v27 = vsel %vm1427_vm13, %v4157_v25, 0.0  ;;  %v4512_v22 = vld [vmem:[%s3662_s23 + $0x25] sm:$0x1] }
 0x188   : > { %v1459_v43 = vsel %vm707_vm0, %v1440_v4, 0.0  ;;  %v1350_v34 = vadd.f32 %v1349_v50, %v1348_v56  ;;  %v1444_v15 = vsel %vm1428_vm7, %v4178_v40, 0.0  ;;  %v1445_v26 = vsel %vm1429_vm14, %v4181_v0, 0.0  ;;  %v4523_v0 = vld [vmem:[%s3662_s23 + $0x23] sm:$0x1] }
 0x189   : > { %v1458_v20 = vadd.f32 %v1457_v6, %v1456_v37  ;;  %v1414_v25 = vadd.f32 %v1413_v60, %v1412_v58  ;;  %vm1432_vm2 = vcmp.eq.s32.totalorder %v4434_v63, 12  ;;  %v1446_v36 = vsel %vm1430_vm15, %v4185_v14, 0.0  ;;  %v4527_v60 = vld [vmem:[%s3662_s23 + $0x26] sm:$0x1]  ;;  %v4550_v28 = vld [vmem:[%s3662_s23 + $0x29] sm:$0x1] }
 0x18a   : > { %v1447_v19 = vsel %vm1431_vm1, %v4198_v10, 0.0  ;;  %v1461_v40 = vsel %vm707_vm0, %v1441_v29, 0.0  ;;  %v1352_v55 = vadd.f32 %v1351_v42, %v1350_v34  ;;  %v1463_v5 = vsel %vm707_vm0, %v1442_v49, 0.0  ;;  %v4562_v58 = vld [vmem:[%s3662_s23 + $0x2a] sm:$0x1] }
 0x18b   : > { %v1460_v24 = vadd.f32 %v1459_v43, %v1458_v20  ;;  %v1514_v14 = vsel %vm3716_vm5, %v4491_v31, -inf  ;;  %vm1433_vm11 = vcmp.eq.s32.totalorder %v4434_v63, 13  ;;  %v1465_v10 = vsel %vm707_vm0, %v1443_v27, 0.0  ;;  %v4565_v6 = vld [vmem:[%s3662_s23 + $0x2b] sm:$0x1] }
 0x18c   : > { %v1515_v50 = vsel %vm3716_vm5, %v4502_v41, -inf  ;;  %v1517_v61 = vsel %vm3716_vm5, %v4509_v33, -inf  ;;  %v1519_v3 = vsel %vm3716_vm5, %v4512_v22, -inf  ;;  %2539 = vlog2.f32 %v1352_v55  ;;  %v4571_v42 = vld [vmem:[%s3662_s23 + $0x2c] sm:$0x1] }
 0x18d   : > { %v1462_v57 = vadd.f32 %v1461_v40, %v1460_v24  ;;  %v1516_v62 = vsel %vm3716_vm5, %v4523_v0, -inf  ;;  %v1518_v4 = vmax.f32 %v1513_v21, %v1517_v61  ;;  %v1416_v8 = vadd.f32 %v4451_v52, %v1414_v25  ;;  %v4574_v49 = vld [vmem:[%s3662_s23 + $0x2d] sm:$0x1]  ;;  %v4590_v55 = vld [vmem:[%s3662_s23 + $0x2f] sm:$0x1] }
 0x18e   : > { %v1467_v44 = vsel %vm707_vm0, %v1444_v15, 0.0  ;;  %v1520_v56 = vmax.f32 %v1514_v14, %v1519_v3  ;;  %v1521_v29 = vsel %vm3716_vm5, %v4527_v60, -inf  ;;  %v1523_v52 = vsel %vm3716_vm5, %v4530_v51, -inf  ;;  %v4587_v15 = vld [vmem:[%s3662_s23 + $0x2e] sm:$0x1] }
 0x18f   : > { %v1464_v37 = vadd.f32 %v1463_v5, %v1462_v57  ;;  %v1522_v21 = vmax.f32 %v1515_v50, %v1521_v29  ;;  %v1525_v27 = vsel %vm3716_vm5, %v4538_v47, -inf  ;;  %v1469_v43 = vsel %vm707_vm0, %v1445_v26, 0.0 }
 0x190   : > { %v4584_v34 = vmin.f32 %v4460_v38, 14.99  ;;  %v1524_v20 = vmax.f32 %v1516_v62, %v1523_v52  ;;  %v1526_v25 = vmax.f32 %v1518_v4, %v1525_v27  ;;  %v1527_v24 = vsel %vm3716_vm5, %v4550_v28, -inf }
 0x191   : > { %v1466_v40 = vadd.f32 %v1465_v10, %v1464_v37  ;;  %v1529_v5 = vsel %vm3716_vm5, %v4562_v58, -inf  ;;  %v1531_v38 = vsel %vm3716_vm5, %v4565_v6, -inf  ;;  %v1528_v26 = vmax.f32 %v1520_v56, %v1527_v24  ;;  %v5415_v24 = vld [vmem:[#allocation38_spill] sm:$0xff] }
 0x192   : > { %v1530_v14 = vmax.f32 %v1522_v21, %v1529_v5  ;;  %v1532_v50 = vmax.f32 %v1524_v20, %v1531_v38  ;;  %v1533_v10 = vsel %vm3716_vm5, %v4571_v42, -inf  ;;  %v1535_v57 = vsel %vm3716_vm5, %v4574_v49, -inf }
 0x193   : > { %v1468_v61 = vadd.f32 %v1467_v44, %v1466_v40  ;;  %v1534_v3 = vmax.f32 %v1526_v25, %v1533_v10  ;;  %v1537_v62 = vsel %vm3716_vm5, %v4587_v15, -inf  ;;  %v1471_v4 = vsel %vm707_vm0, %v1446_v36, 0.0 }
 0x194   : > { %v1536_v29 = vmax.f32 %v1528_v26, %v1535_v57  ;;  %v1538_v56 = vmax.f32 %v1530_v14, %v1537_v62  ;;  %v1539_v37 = vsel %vm3716_vm5, %v4590_v55, -inf  ;;  %v1417_v44 = vsel %vm707_vm0, %v4439_v12, 0.0 }
 0x195   : > { %v1448_v21 = vsel %vm1432_vm2, %v4201_v30, 0.0  ;;  %v1470_v52 = vadd.f32 %v1469_v43, %v1468_v61  ;;  %v1540_v27 = vmax.f32 %v1532_v50, %v1539_v37  ;;  %vm1434_vm8 = vcmp.eq.s32.totalorder %v4434_v63, 14  ;;  %v4666_v37 = vld [vmem:[%s3094_s24 + $0x7] sm:$0x1] }
 0x196   : > { %v1473_v20 = vsel %vm707_vm0, %v1447_v19, 0.0  ;;  %v4622_v36 = vfloor.f32 %v4584_v34  ;;  %v1541_v25 = vmax.f32 %v1534_v3, %v1536_v29  ;;  %v2540_v40 = vpop.eup %2539  ;;  %v5416_v5 = vsub.f32 %v3874_v45, %v5415_v24 }
 0x197   : > { %v1449_v30 = vsel %vm1433_vm11, %v4207_v9, 0.0  ;;  %v1472_v43 = vadd.f32 %v1471_v4, %v1470_v52  ;;  %v1542_v38 = vmax.f32 %v1538_v56, %v1540_v27  ;;  %v1354_v26 = vmul.f32 0.6931472, %v2540_v40  ;;  %v5417_v56 = vld [vmem:[#allocation39_spill] sm:$0xff] }
 0x198   : > { %v1217_v12 = vmul.f32 %v1216_v11, %v5416_v5  ;;  %v1418_v19 = vadd.f32 %v1417_v44, %v1416_v8  ;;  %vm1435_vm9 = vcmp.eq.s32.totalorder %v4434_v63, 15  ;;  %v1475_v14 = vsel %vm707_vm0, %v1448_v21, 0.0 }
 0x199   : > { %v927_v50 = vadd.f32 %v4304_v46, %v4301_v59  ;;  %v1450_v45 = vsel %vm1434_vm8, %v4221_v18, 0.0  ;;  %v1474_v10 = vadd.f32 %v1473_v20, %v1472_v43  ;;  %v4638_v23 = vmax.f32 %v1541_v25, %v1542_v38 }
 0x19a   : > { %v1223_v35 = vsub.f32 %v4332_v32, %v4114_v2  ;;  %v1355_v9 = vadd.f32 %v1354_v26, %v4279_v54  ;;  %v1477_v11 = vsel %vm707_vm0, %v1449_v30, 0.0  ;;  %v2315_v8 = vtrunc.f32 %v4622_v36 }
 0x19b   : > { %v893_v63 = vmul.f32 %v4297_v7, %v4252_v1  ;;  %v1218_v61 = vadd.f32 %v1217_v12, %v4329_v13  ;;  %v1451_v18 = vsel %vm1435_vm9, %v4224_v53, 0.0  ;;  %v1476_v59 = vadd.f32 %v1475_v14, %v1474_v10 }
 0x19c   : > { %v1479_v46 = vsel %vm707_vm0, %v1450_v45, 0.0  ;;  %v1483_v3 = vsub.f32 %v1355_v9, %v1418_v19  ;;  %v1544_v32 = vsub.f32 %v4446_v39, %v4638_v23  ;;  %v1545_v54 = vsub.f32 %v4491_v31, %v4638_v23 }
 0x19d   : > { %v928_v57 = vmul.f32 %v927_v50, %v4268_v17  ;;  %v1478_v62 = vadd.f32 %v1477_v11, %v1476_v59  ;;  %v1546_v1 = vsub.f32 %v4502_v41, %v4638_v23  ;;  %v1547_v7 = vsub.f32 %v4523_v0, %v4638_v23  ;;  %v4671_v17 = vld [vmem:[%s5277_s5 + $0x1] sm:$0x1] }
 0x19e   : > { %v1481_v53 = vsel %vm707_vm0, %v1451_v18, 0.0  ;;  %v1484_v13 = vmul.f32 %v1483_v3, %v1223_v35  ;;  %v4660_v4 = vcvt.f32.s32 %v2315_v8  ;;  %v1548_v29 = vsub.f32 %v4509_v33, %v4638_v23 }
 0x19f   : > { %2541 = vrcp.f32 %v5417_v56  ;;  %v945_v44 = vsub.f32 %v4666_v37, %v4671_v17  ;;  %v1480_v21 = vadd.f32 %v1479_v46, %v1478_v62  ;;  %v1549_v52 = vsub.f32 %v4512_v22, %v4638_v23 }
 0x1a0   : > { %v1224_v27 = vsub.f32 %v4114_v2, %v4260_v48  ;;  %v1485_v20 = vadd.f32 %v1484_v13, %v1218_v61  ;;  %v1560_v25 = vmul.f32 1.442695, %v1544_v32  ;;  %v1562_v40 = vmul.f32 1.442695, %v1545_v54 }
 0x1a1   : > { %v1482_v24 = vadd.f32 %v1481_v53, %v1480_v21  ;;  %v1550_v5 = vsub.f32 %v4527_v60, %v4638_v23  ;;  %v1564_v12 = vmul.f32 1.442695, %v1546_v1  ;;  %v1566_v30 = vmul.f32 1.442695, %v1547_v7 }
 0x1a2   : > { %v4681_v43 = vsub.f32 %v893_v63, %v928_v57  ;;  %2543 = vpow2.f32 %v1560_v25  ;;  %v1568_v38 = vmul.f32 1.442695, %v1548_v29  ;;  %vm1626_vm10 = vcmp.eq.s32.totalorder %v4660_v4, 0 }
 0x1a3   : > { %v1486_v26 = vsub.f32 %v1355_v9, %v1482_v24  ;;  %v1551_v19 = vsub.f32 %v4530_v51, %v4638_v23  ;;  %2545 = vpow2.f32 %v1562_v40  ;;  %v1570_v2 = vmul.f32 1.442695, %v1549_v52 }
 0x1a4   : > { %v1552_v48 = vsub.f32 %v4538_v47, %v4638_v23  ;;  %2547 = vpow2.f32 %v1564_v12  ;;  %vm1627_vm12 = vcmp.eq.s32.totalorder %v4660_v4, 1  ;;  %vm1628_vm6 = vcmp.eq.s32.totalorder %v4660_v4, 2 }
 0x1a5   : > { %v1487_v14 = vmul.f32 %v1486_v26, %v1224_v27  ;;  %2549 = vpow2.f32 %v1566_v30  ;;  %v1572_v50 = vmul.f32 1.442695, %v1550_v5  ;;  %vm1629_vm13 = vcmp.eq.s32.totalorder %v4660_v4, 3 }
 0x1a6   : > { %v1553_v45 = vsub.f32 %v4550_v28, %v4638_v23  ;;  %2551 = vpow2.f32 %v1568_v38  ;;  %vm1630_vm7 = vcmp.eq.s32.totalorder %v4660_v4, 4  ;;  %vm1631_vm14 = vcmp.eq.s32.totalorder %v4660_v4, 5 }
 0x1a7   : > { %v4695_v10 = vadd.f32 %v1487_v14, %v1485_v20  ;;  %v1554_v35 = vsub.f32 %v4562_v58, %v4638_v23  ;;  %2553 = vpow2.f32 %v1570_v2  ;;  %v1574_v9 = vmul.f32 1.442695, %v1551_v19 }
 0x1a8   : > { %v1555_v11 = vsub.f32 %v4565_v6, %v4638_v23  ;;  %v1576_v8 = vmul.f32 1.442695, %v1552_v48  ;;  %vm1632_vm15 = vcmp.eq.s32.totalorder %v4660_v4, 6  ;;  %vm1633_vm1 = vcmp.eq.s32.totalorder %v4660_v4, 7 }
 0x1a9   : > { %v4703_v63 = vpop.eup %2541  ;;  %2555 = vpow2.f32 %v1572_v50  ;;  %v1642_v61 = vsel %vm1626_vm10, %v4446_v39, 0.0  ;;  %v1643_v18 = vsel %vm1627_vm12, %v4491_v31, 0.0  ;;  %v1644_v59 = vsel %vm1628_vm6, %v4502_v41, 0.0 }
 0x1aa   : > { %v1556_v46 = vsub.f32 %v4571_v42, %v4638_v23  ;;  %v1557_v3 = vsub.f32 %v4574_v49, %v4638_v23  ;;  %v1558_v32 = vsub.f32 %v4587_v15, %v4638_v23  ;;  %vm1634_vm2 = vcmp.eq.s32.totalorder %v4660_v4, 8 }
 0x1ab   : > { %2557 = vpow2.f32 %v1574_v9  ;;  %v1578_v54 = vmul.f32 1.442695, %v1553_v45  ;;  %v1580_v57 = vmul.f32 1.442695, %v1554_v35  ;;  %v1645_v62 = vsel %vm1629_vm13, %v4523_v0, 0.0 }
 0x1ac   : > { %v2544_v1 = vpop.eup %2543  ;;  %v1582_v7 = vmul.f32 1.442695, %v1555_v11  ;;  %vm1635_vm11 = vcmp.eq.s32.totalorder %v4660_v4, 9  ;;  %v1658_v53 = vsel %vm707_vm0, %v1642_v61, 0.0  ;;  %v1659_v13 = vsel %vm707_vm0, %v1643_v18, 0.0 }
 0x1ad   : > { %v1661_v29 = vsel %vm707_vm0, %v1644_v59, 0.0  ;;  %v2546_v56 = vpop.eup %2545  ;;  %2559 = vpow2.f32 %v1576_v8  ;;  %v1592_v21 = vsel %vm707_vm0, %v2544_v1, 0.0  ;;  %vm1636_vm8 = vcmp.eq.s32.totalorder %v4660_v4, 10 }
 0x1ae   : > { %vm1637_vm9 = vcmp.eq.s32.totalorder %v4660_v4, 11  ;;  %v1646_v52 = vsel %vm1630_vm7, %v4509_v33, 0.0  ;;  %v1660_v27 = vadd.f32 %v1659_v13, %v1658_v53  ;;  %v2548_v20 = vpop.eup %2547  ;;  %v1584_v25 = vmul.f32 1.442695, %v1556_v46 }
 0x1af   : > { %v1593_v40 = vsel %vm707_vm0, %v2546_v56, 0.0  ;;  %vm1638_vm10 = vcmp.eq.s32.totalorder %v4660_v4, 12  ;;  %v1647_v24 = vsel %vm1631_vm14, %v4512_v22, 0.0  ;;  %v1663_v5 = vsel %vm707_vm0, %v1645_v62, 0.0  ;;  %v2550_v12 = vpop.eup %2549 }
 0x1b0   : > { %2561 = vpow2.f32 %v1578_v54  ;;  %v1594_v30 = vadd.f32 %v1593_v40, %v1592_v21  ;;  %v1595_v38 = vsel %vm707_vm0, %v2548_v20, 0.0  ;;  %v1662_v26 = vadd.f32 %v1661_v29, %v1660_v27  ;;  %v2552_v19 = vpop.eup %2551 }
 0x1b1   : > { %v1559_v2 = vsub.f32 %v4590_v55, %v4638_v23  ;;  %v1586_v48 = vmul.f32 1.442695, %v1557_v3  ;;  %v1597_v14 = vsel %vm707_vm0, %v2550_v12, 0.0  ;;  %v1665_v50 = vsel %vm707_vm0, %v1646_v52, 0.0  ;;  %v2554_v45 = vpop.eup %2553 }
 0x1b2   : > { %2563 = vpow2.f32 %v1580_v57  ;;  %v1596_v35 = vadd.f32 %v1595_v38, %v1594_v30  ;;  %v1648_v9 = vsel %vm1632_vm15, %v4527_v60, 0.0  ;;  %v1664_v11 = vadd.f32 %v1663_v5, %v1662_v26 }
 0x1b3   : > { %2565 = vpow2.f32 %v1582_v7  ;;  %v1588_v8 = vmul.f32 1.442695, %v1558_v32  ;;  %v1599_v61 = vsel %vm707_vm0, %v2552_v19, 0.0  ;;  %v1667_v18 = vsel %vm707_vm0, %v1647_v24, 0.0  ;;  %v2556_v59 = vpop.eup %2555 }
 0x1b4   : > { %2567 = vpow2.f32 %v1584_v25  ;;  %v1598_v46 = vadd.f32 %v1597_v14, %v1596_v35  ;;  %v1649_v3 = vsel %vm1633_vm1, %v4530_v51, 0.0  ;;  %v1666_v54 = vadd.f32 %v1665_v50, %v1664_v11 }
 0x1b5   : > { %v1601_v57 = vsel %vm707_vm0, %v2554_v45, 0.0  ;;  %vm1639_vm12 = vcmp.eq.s32.totalorder %v4660_v4, 13  ;;  %vm1640_vm6 = vcmp.eq.s32.totalorder %v4660_v4, 14  ;;  %v1669_v32 = vsel %vm707_vm0, %v1648_v9, 0.0  ;;  %v2558_v62 = vpop.eup %2557 }
 0x1b6   : > { %2569 = vpow2.f32 %v1586_v48  ;;  %v1600_v1 = vadd.f32 %v1599_v61, %v1598_v46  ;;  %v1650_v7 = vsel %vm1634_vm2, %v4538_v47, 0.0  ;;  %v1668_v53 = vadd.f32 %v1667_v18, %v1666_v54  ;;  %v4801_v54 = vld [vmem:[%s3662_s23 + $0x31] sm:$0x1] }
 0x1b7   : > { %2571 = vpow2.f32 %v1588_v8  ;;  %v1603_v13 = vsel %vm707_vm0, %v2556_v59, 0.0  ;;  %vm1641_vm13 = vcmp.eq.s32.totalorder %v4660_v4, 15  ;;  %v1671_v29 = vsel %vm707_vm0, %v1649_v3, 0.0  ;;  %v2560_v56 = vpop.eup %2559  ;;  %v4794_v8 = vld [vmem:[%s3662_s23 + $0x30] sm:$0x1] }
 0x1b8   : > { %v1590_v21 = vmul.f32 1.442695, %v1559_v2  ;;  %v1602_v52 = vadd.f32 %v1601_v57, %v1600_v1  ;;  %v1651_v27 = vsel %vm1635_vm11, %v4550_v28, 0.0  ;;  %v1670_v20 = vadd.f32 %v1669_v32, %v1668_v53 }
 0x1b9   : > { %v1605_v25 = vsel %vm707_vm0, %v2558_v62, 0.0  ;;  %v1652_v40 = vsel %vm1636_vm8, %v4562_v58, 0.0  ;;  %v1653_v24 = vsel %vm1637_vm9, %v4565_v6, 0.0  ;;  %v1673_v5 = vsel %vm707_vm0, %v1650_v7, 0.0 }
 0x1ba   : > { %v2562_v12 = vpop.eup %2561  ;;  %v1604_v30 = vadd.f32 %v1603_v13, %v1602_v52  ;;  %v1654_v38 = vsel %vm1638_vm10, %v4571_v42, 0.0  ;;  %v1672_v26 = vadd.f32 %v1671_v29, %v1670_v20  ;;  %v4778_v19 = vadd.s32 1, %v4660_v4 }
 0x1bb   : > { %v1607_v2 = vsel %vm707_vm0, %v2560_v56, 0.0  ;;  %v1655_v48 = vsel %vm1639_vm12, %v4574_v49, 0.0  ;;  %v1656_v14 = vsel %vm1640_vm6, %v4587_v15, 0.0  ;;  %v1675_v50 = vsel %vm707_vm0, %v1651_v27, 0.0 }
 0x1bc   : > { %v2564_v45 = vpop.eup %2563  ;;  %2573 = vpow2.f32 %v1590_v21  ;;  %v1606_v35 = vadd.f32 %v1605_v25, %v1604_v30  ;;  %v4791_v9 = vsel %vm1641_vm13, %v4590_v55, 0.0  ;;  %v1674_v11 = vadd.f32 %v1673_v5, %v1672_v26 }
 0x1bd   : > { %v2566_v61 = vpop.eup %2565  ;;  %v1609_v18 = vsel %vm707_vm0, %v2562_v12, 0.0  ;;  %v1677_v59 = vsel %vm707_vm0, %v1652_v40, 0.0  ;;  %v1679_v46 = vsel %vm707_vm0, %v1653_v24, 0.0  ;;  %v1681_v3 = vsel %vm707_vm0, %v1654_v38, 0.0 }
 0x1be   : > { %v2568_v57 = vpop.eup %2567  ;;  %v1608_v32 = vadd.f32 %v1607_v2, %v1606_v35  ;;  %v1676_v62 = vadd.f32 %v1675_v50, %v1674_v11  ;;  %v4804_v4 = vsel %vm707_vm0, %v1655_v48, 0.0  ;;  %vm1690_vm7 = vcmp.eq.s32.totalorder %v4778_v19, 0  ;;  %v4853_v11 = vld [vmem:[%s3662_s23 + $0x32] sm:$0x1] }
 0x1bf   : > { %v1611_v1 = vsel %vm707_vm0, %v2564_v45, 0.0  ;;  %v4809_v7 = vsel %vm707_vm0, %v1656_v14, 0.0  ;;  %vm1691_vm14 = vcmp.eq.s32.totalorder %v4778_v19, 1  ;;  %vm1692_vm15 = vcmp.eq.s32.totalorder %v4778_v19, 2 }
 0x1c0   : > { %v2570_v53 = vpop.eup %2569  ;;  %v1610_v13 = vadd.f32 %v1609_v18, %v1608_v32  ;;  %v4816_v29 = vmax.f32 %v945_v44, 0.0  ;;  %v1783_v56 = vsel %vm3716_vm5, %v4794_v8, -inf  ;;  %v1784_v21 = vsel %vm3716_vm5, %v4801_v54, -inf }
 0x1c1   : > { %v2572_v52 = vpop.eup %2571  ;;  %v1613_v27 = vsel %vm707_vm0, %v2566_v61, 0.0  ;;  %v1615_v20 = vsel %vm707_vm0, %v2568_v57, 0.0  ;;  %vm1693_vm1 = vcmp.eq.s32.totalorder %v4778_v19, 3  ;;  %v1706_v25 = vsel %vm1690_vm7, %v4446_v39, 0.0  ;;  %v4856_v61 = vld [vmem:[%s3662_s23 + $0x33] sm:$0x1] }
 0x1c2   : > { %v1612_v37 = vadd.f32 %v1611_v1, %v1610_v13  ;;  %v1678_v17 = vadd.f32 %v1677_v59, %v1676_v62  ;;  %v1707_v44 = vsel %vm1691_vm14, %v4491_v31, 0.0  ;;  %v1708_v40 = vsel %vm1692_vm15, %v4502_v41, 0.0 }
 0x1c3   : > { %v1617_v24 = vsel %vm707_vm0, %v2570_v53, 0.0  ;;  %vm1694_vm2 = vcmp.eq.s32.totalorder %v4778_v19, 4  ;;  %vm1695_vm11 = vcmp.eq.s32.totalorder %v4778_v19, 5  ;;  %vm1696_vm8 = vcmp.eq.s32.totalorder %v4778_v19, 6  ;;  %v4873_v53 = vld [vmem:[%s3662_s23 + $0x35] sm:$0x1] }
 0x1c4   : > { %v1614_v5 = vadd.f32 %v1613_v27, %v1612_v37  ;;  %v1619_v12 = vsel %vm707_vm0, %v2572_v52, 0.0  ;;  %vm1697_vm9 = vcmp.eq.s32.totalorder %v4778_v19, 7  ;;  %v1709_v39 = vsel %vm1693_vm1, %v4523_v0, 0.0  ;;  %v4901_v37 = vld [vmem:[%s3662_s23 + $0x39] sm:$0x1] }
 0x1c5   : > { %vm1698_vm10 = vcmp.eq.s32.totalorder %v4778_v19, 8  ;;  %v1722_v31 = vsel %vm707_vm0, %v1706_v25, 0.0  ;;  %v1723_v41 = vsel %vm707_vm0, %v1707_v44, 0.0  ;;  %v1725_v30 = vsel %vm707_vm0, %v1708_v40, 0.0  ;;  %v4891_v25 = vld [vmem:[%s3662_s23 + $0x38] sm:$0x1] }
 0x1c6   : > { %v2574_v38 = vpop.eup %2573  ;;  %v1616_v26 = vadd.f32 %v1615_v20, %v1614_v5  ;;  %v1680_v2 = vadd.f32 %v1679_v46, %v1678_v17  ;;  %v1710_v48 = vsel %vm1694_vm2, %v4509_v33, 0.0  ;;  %v1724_v14 = vadd.f32 %v1723_v41, %v1722_v31  ;;  %v4888_v20 = vld [vmem:[%s3662_s23 + $0x37] sm:$0x1]  ;;  %v4921_v31 = vld [vmem:[%s3662_s23 + $0x3b] sm:$0x1] }
 0x1c7   : > { %vm1699_vm12 = vcmp.eq.s32.totalorder %v4778_v19, 9  ;;  %vm1700_vm6 = vcmp.eq.s32.totalorder %v4778_v19, 10  ;;  %vm1701_vm13 = vcmp.eq.s32.totalorder %v4778_v19, 11  ;;  %v1727_v0 = vsel %vm707_vm0, %v1709_v39, 0.0  ;;  %v4918_v39 = vld [vmem:[%s3662_s23 + $0x3a] sm:$0x1] }
 0x1c8   : > { %v1618_v50 = vadd.f32 %v1617_v24, %v1616_v26  ;;  %v1711_v45 = vsel %vm1695_vm11, %v4512_v22, 0.0  ;;  %v1712_v33 = vsel %vm1696_vm8, %v4527_v60, 0.0  ;;  %v1726_v35 = vadd.f32 %v1725_v30, %v1724_v14  ;;  %v4867_v60 = vld [vmem:[%s3662_s23 + $0x34] sm:$0x1]  ;;  %v4939_v14 = vld [vmem:[%s3662_s23 + $0x3e] sm:$0x1] }
 0x1c9   : > { %v1621_v18 = vsel %vm707_vm0, %v2574_v38, 0.0  ;;  %v1713_v59 = vsel %vm1697_vm9, %v4530_v51, 0.0  ;;  %v1714_v46 = vsel %vm1698_vm10, %v4538_v47, 0.0  ;;  %v1729_v22 = vsel %vm707_vm0, %v1710_v48, 0.0  ;;  %v4876_v51 = vld [vmem:[%s3662_s23 + $0x36] sm:$0x1] }
 0x1ca   : > { %v1620_v57 = vadd.f32 %v1619_v12, %v1618_v50  ;;  %v1682_v32 = vadd.f32 %v1681_v3, %v1680_v2  ;;  %v1715_v62 = vsel %vm1699_vm12, %v4550_v28, 0.0  ;;  %v1728_v1 = vadd.f32 %v1727_v0, %v1726_v35  ;;  %v4930_v38 = vld [vmem:[%s3662_s23 + $0x3c] sm:$0x1]  ;;  %v4936_v48 = vld [vmem:[%s3662_s23 + $0x3d] sm:$0x1] }
 0x1cb   : > { %vm1702_vm7 = vcmp.eq.s32.totalorder %v4778_v19, 12  ;;  %v1716_v47 = vsel %vm1700_vm6, %v4562_v58, 0.0  ;;  %v1717_v3 = vsel %vm1701_vm13, %v4565_v6, 0.0  ;;  %v1731_v13 = vsel %vm707_vm0, %v1711_v45, 0.0  ;;  %v4952_v35 = vld [vmem:[%s3662_s23 + $0x3f] sm:$0x1] }
 0x1cc   : > { %v1733_v28 = vsel %vm707_vm0, %v1712_v33, 0.0  ;;  %v1622_v52 = vadd.f32 %v1621_v18, %v1620_v57  ;;  %v1730_v27 = vadd.f32 %v1729_v22, %v1728_v1  ;;  %v1785_v58 = vsel %vm3716_vm5, %v4853_v11, -inf }
 0x1cd   : > { %v1787_v6 = vsel %vm3716_vm5, %v4867_v60, -inf  ;;  %vm1703_vm14 = vcmp.eq.s32.totalorder %v4778_v19, 13  ;;  %v1786_v17 = vsel %vm3716_vm5, %v4856_v61, -inf  ;;  %v1789_v40 = vsel %vm3716_vm5, %v4873_v53, -inf }
 0x1ce   : > { %v1788_v44 = vmax.f32 %v1783_v56, %v1787_v6  ;;  %v1791_v24 = vsel %vm3716_vm5, %v4876_v51, -inf  ;;  %2575 = vlog2.f32 %v1622_v52  ;;  %v1684_v5 = vadd.f32 %v4804_v4, %v1682_v32 }
 0x1cf   : > { %v1732_v12 = vadd.f32 %v1731_v13, %v1730_v27  ;;  %v1790_v56 = vmax.f32 %v1784_v21, %v1789_v40  ;;  %v1735_v41 = vsel %vm707_vm0, %v1713_v59, 0.0  ;;  %v1737_v30 = vsel %vm707_vm0, %v1714_v46, 0.0 }
 0x1d0   : > { %v1792_v26 = vmax.f32 %v1785_v58, %v1791_v24  ;;  %v1793_v4 = vsel %vm3716_vm5, %v4888_v20, -inf  ;;  %v1795_v21 = vsel %vm3716_vm5, %v4891_v25, -inf  ;;  %v1797_v50 = vsel %vm3716_vm5, %v4901_v37, -inf }
 0x1d1   : > { %v1734_v2 = vadd.f32 %v1733_v28, %v1732_v12  ;;  %v1794_v0 = vmax.f32 %v1786_v17, %v1793_v4  ;;  %v1739_v45 = vsel %vm707_vm0, %v1715_v62, 0.0  ;;  %v4949_v33 = vmin.f32 %v4816_v29, 14.99 }
 0x1d2   : > { %v1796_v18 = vmax.f32 %v1788_v44, %v1795_v21  ;;  %v1798_v59 = vmax.f32 %v1790_v56, %v1797_v50  ;;  %v1799_v22 = vsel %vm3716_vm5, %v4918_v39, -inf  ;;  %v1801_v57 = vsel %vm3716_vm5, %v4921_v31, -inf  ;;  %v5418_v21 = vld [vmem:[#allocation35_spill] sm:$0xff] }
 0x1d3   : > { %v1736_v46 = vadd.f32 %v1735_v41, %v1734_v2  ;;  %v1803_v32 = vsel %vm3716_vm5, %v4930_v38, -inf  ;;  %v1800_v62 = vmax.f32 %v1792_v26, %v1799_v22  ;;  %v1802_v29 = vmax.f32 %v1794_v0, %v1801_v57 }
 0x1d4   : > { %v1804_v1 = vmax.f32 %v1796_v18, %v1803_v32  ;;  %v1805_v13 = vsel %vm3716_vm5, %v4936_v48, -inf  ;;  %v1807_v27 = vsel %vm3716_vm5, %v4939_v14, -inf  ;;  %v1809_v58 = vsel %vm3716_vm5, %v4952_v35, -inf }
 0x1d5   : > { %v1738_v28 = vadd.f32 %v1737_v30, %v1736_v46  ;;  %v1806_v52 = vmax.f32 %v1798_v59, %v1805_v13  ;;  %v1686_v6 = vadd.f32 %v4809_v7, %v1684_v5  ;;  %v1741_v17 = vsel %vm707_vm0, %v1716_v47, 0.0 }
 0x1d6   : > { %v1808_v44 = vmax.f32 %v1800_v62, %v1807_v27  ;;  %v1810_v40 = vmax.f32 %v1802_v29, %v1809_v58  ;;  %v1687_v24 = vsel %vm707_vm0, %v4791_v9, 0.0  ;;  %v1718_v12 = vsel %vm1702_vm7, %v4571_v42, 0.0 }
 0x1d7   : > { %v1740_v56 = vadd.f32 %v1739_v45, %v1738_v28  ;;  %v1811_v41 = vmax.f32 %v1804_v1, %v1806_v52  ;;  %v1492_v30 = vadd.f32 1.0, %v4622_v36  ;;  %vm1704_vm15 = vcmp.eq.s32.totalorder %v4778_v19, 14  ;;  %v5420_v28 = vld [vmem:[#allocation37_spill] sm:$0xff] }
 0x1d8   : > { %v1743_v16 = vsel %vm707_vm0, %v1717_v3, 0.0  ;;  %v1812_v7 = vmax.f32 %v1808_v44, %v1810_v40  ;;  %v2576_v5 = vpop.eup %2575  ;;  %vm1705_vm5 = vcmp.eq.s32.totalorder %v4778_v19, 15  ;;  %v1719_v9 = vsel %vm1703_vm14, %v4574_v49, 0.0 }
 0x1d9   : > { %v1742_v47 = vadd.f32 %v1741_v17, %v1740_v56  ;;  %v4987_v26 = vfloor.f32 %v4949_v33  ;;  %v1624_v42 = vmul.f32 0.6931472, %v2576_v5  ;;  %v1688_v4 = vadd.f32 %v1687_v24, %v1686_v6 }
 0x1da   : > { %v1745_v2 = vsel %vm707_vm0, %v1718_v12, 0.0  ;;  %v4990_v0 = vmax.f32 %v1811_v41, %v1812_v7  ;;  %v852_v3 = vmul.f32 %v5418_v21, %v5418_v21  ;;  %v930_v50 = vmul.f32 0.40528473, %v4681_v43 }
 0x1db   : > { %v1720_v45 = vsel %vm1704_vm15, %v4587_v15, 0.0  ;;  %v1744_v18 = vadd.f32 %v1743_v16, %v1742_v47  ;;  %v1493_v49 = vsub.f32 %v1492_v30, %v4584_v34  ;;  %v1625_v19 = vadd.f32 %v1624_v42, %v4638_v23  ;;  %v5419_v23 = vld [vmem:[#allocation36_spill] sm:$0xff]  ;;  %v5421_v47 = vld [vmem:[#allocation34_spill] sm:$0xff]  ;;  %v5422_v42 = vld [vmem:[#allocation33_spill] sm:$0xff] }
 0x1dc   : > { %v1721_v59 = vsel %vm1705_vm5, %v4590_v55, 0.0  ;;  %v1747_v46 = vsel %vm707_vm0, %v1719_v9, 0.0  ;;  %v2317_v57 = vtrunc.f32 %v4987_v26  ;;  %v1814_v32 = vsub.f32 %v4794_v8, %v4990_v0 }
 0x1dd   : > { %v1746_v22 = vadd.f32 %v1745_v2, %v1744_v18  ;;  %v1815_v62 = vsub.f32 %v4801_v54, %v4990_v0  ;;  %v1749_v15 = vsel %vm707_vm0, %v1720_v45, 0.0  ;;  %v1753_v29 = vsub.f32 %v1625_v19, %v1688_v4 }
 0x1de   : > { %v1816_v1 = vsub.f32 %v4853_v11, %v4990_v0  ;;  %v1817_v55 = vsub.f32 %v4856_v61, %v4990_v0  ;;  %v5012_v13 = vmul.f32 %v4703_v63, %v5419_v23  ;;  %v853_v52 = vmul.f32 %v5420_v28, %v5420_v28 }
 0x1df   : > { %v1748_v27 = vadd.f32 %v1747_v46, %v1746_v22  ;;  %v1818_v58 = vsub.f32 %v4867_v60, %v4990_v0  ;;  %v5019_v6 = vmul.f32 %v930_v50, %v4681_v43  ;;  %v1751_v17 = vsel %vm707_vm0, %v1721_v59, 0.0 }
 0x1e0   : > { %v1754_v44 = vmul.f32 %v1753_v29, %v1493_v49  ;;  %v1819_v40 = vsub.f32 %v4873_v53, %v4990_v0  ;;  %v5024_v12 = vcvt.f32.s32 %v2317_v57  ;;  %v1830_v63 = vmul.f32 1.442695, %v1814_v32 }
 0x1e1   : > { %v1750_v24 = vadd.f32 %v1749_v15, %v1748_v27  ;;  %v1832_v56 = vmul.f32 1.442695, %v1815_v62  ;;  %v1820_v30 = vsub.f32 %v4876_v51, %v4990_v0  ;;  %v1834_v16 = vmul.f32 1.442695, %v1816_v1 }
 0x1e2   : > { %v1755_v41 = vadd.f32 %v1754_v44, %v4695_v10  ;;  %v1836_v7 = vmul.f32 1.442695, %v1817_v55  ;;  %v1494_v43 = vsub.f32 %v4584_v34, %v4622_v36  ;;  %2577 = vpow2.f32 %v1830_v63 }
 0x1e3   : > { %v1752_v5 = vadd.f32 %v1751_v17, %v1750_v24  ;;  %v1838_v9 = vmul.f32 1.442695, %v1818_v58  ;;  %v837_v4 = vsub.f32 %v5422_v42, %v5421_v47  ;;  %v1821_v2 = vsub.f32 %v4888_v20, %v4990_v0 }
 0x1e4   : > { %2579 = vpow2.f32 %v1832_v56  ;;  %v1840_v21 = vmul.f32 1.442695, %v1819_v40  ;;  %v5035_v10 = vadd.f32 %v853_v52, %v852_v3  ;;  %v932_v50 = vsub.f32 %v5019_v6, %v5012_v13 }
 0x1e5   : > { %v1756_v45 = vsub.f32 %v1625_v19, %v1752_v5  ;;  %2581 = vpow2.f32 %v1834_v16  ;;  %v1822_v34 = vsub.f32 %v4891_v25, %v4990_v0  ;;  %v1842_v36 = vmul.f32 1.442695, %v1820_v30 }
 0x1e6   : > { %2583 = vpow2.f32 %v1836_v7  ;;  %vm1896_vm1 = vcmp.eq.s32.totalorder %v5024_v12, 0  ;;  %vm1897_vm2 = vcmp.eq.s32.totalorder %v5024_v12, 1  ;;  %vm1898_vm11 = vcmp.eq.s32.totalorder %v5024_v12, 2 }
 0x1e7   : > { %v1757_v18 = vmul.f32 %v1756_v45, %v1494_v43  ;;  %2585 = vpow2.f32 %v1838_v9  ;;  %v1823_v3 = vsub.f32 %v4901_v37, %v4990_v0  ;;  %v1844_v49 = vmul.f32 1.442695, %v1821_v2 }
 0x1e8   : > { %2587 = vpow2.f32 %v1840_v21  ;;  %vm1899_vm8 = vcmp.eq.s32.totalorder %v5024_v12, 3  ;;  %v1824_v59 = vsub.f32 %v4918_v39, %v4990_v0  ;;  %vm1900_vm9 = vcmp.eq.s32.totalorder %v5024_v12, 4 }
 0x1e9   : > { %v5047_v19 = vadd.f32 %v1757_v18, %v1755_v41  ;;  %vm1901_vm10 = vcmp.eq.s32.totalorder %v5024_v12, 5  ;;  %2589 = vpow2.f32 %v1842_v36  ;;  %v1846_v46 = vmul.f32 1.442695, %v1822_v34 }
 0x1ea   : > { %vm1902_vm12 = vcmp.eq.s32.totalorder %v5024_v12, 6  ;;  %v1912_v22 = vsel %vm1896_vm1, %v4794_v8, 0.0  ;;  %v1825_v57 = vsub.f32 %v4921_v31, %v4990_v0  ;;  %vm1903_vm6 = vcmp.eq.s32.totalorder %v5024_v12, 7 }
 0x1eb   : > { %v1913_v32 = vsel %vm1897_vm2, %v4801_v54, 0.0  ;;  %v1914_v62 = vsel %vm1898_vm11, %v4853_v11, 0.0  ;;  %v1826_v15 = vsub.f32 %v4930_v38, %v4990_v0  ;;  %2591 = vpow2.f32 %v1844_v49 }
 0x1ec   : > { %v1848_v29 = vmul.f32 1.442695, %v1823_v3  ;;  %vm1904_vm13 = vcmp.eq.s32.totalorder %v5024_v12, 8  ;;  %v2578_v1 = vpop.eup %2577  ;;  %v1827_v55 = vsub.f32 %v4936_v48, %v4990_v0  ;;  %v1850_v23 = vmul.f32 1.442695, %v1824_v59 }
 0x1ed   : > { %v1915_v28 = vsel %vm1899_vm8, %v4856_v61, 0.0  ;;  %v1928_v52 = vsel %vm707_vm0, %v1912_v22, 0.0  ;;  %2593 = vpow2.f32 %v1846_v46  ;;  %v1862_v58 = vsel %vm707_vm0, %v2578_v1, 0.0 }
 0x1ee   : > { %v2580_v27 = vpop.eup %2579  ;;  %v1929_v17 = vsel %vm707_vm0, %v1913_v32, 0.0  ;;  %v1931_v44 = vsel %vm707_vm0, %v1914_v62, 0.0  ;;  %v1852_v24 = vmul.f32 1.442695, %v1825_v57  ;;  %v1916_v56 = vsel %vm1900_vm9, %v4867_v60, 0.0 }
 0x1ef   : > { %v2582_v40 = vpop.eup %2581  ;;  %v1863_v63 = vsel %vm707_vm0, %v2580_v27, 0.0  ;;  %v1930_v41 = vadd.f32 %v1929_v17, %v1928_v52  ;;  %2595 = vpow2.f32 %v1848_v29  ;;  %v1933_v43 = vsel %vm707_vm0, %v1915_v28, 0.0 }
 0x1f0   : > { %v2584_v30 = vpop.eup %2583  ;;  %v1864_v16 = vadd.f32 %v1863_v63, %v1862_v58  ;;  %v1865_v7 = vsel %vm707_vm0, %v2582_v40, 0.0  ;;  %v1828_v9 = vsub.f32 %v4939_v14, %v4990_v0  ;;  %v1917_v21 = vsel %vm1901_vm10, %v4873_v53, 0.0 }
 0x1f1   : > { %v2586_v5 = vpop.eup %2585  ;;  %v1867_v2 = vsel %vm707_vm0, %v2584_v30, 0.0  ;;  %v1932_v45 = vadd.f32 %v1931_v44, %v1930_v41  ;;  %2597 = vpow2.f32 %v1850_v23  ;;  %v1854_v36 = vmul.f32 1.442695, %v1826_v15 }
 0x1f2   : > { %v2588_v34 = vpop.eup %2587  ;;  %v1866_v18 = vadd.f32 %v1865_v7, %v1864_v16  ;;  %v1935_v3 = vsel %vm707_vm0, %v1916_v56, 0.0  ;;  %v1856_v49 = vmul.f32 1.442695, %v1827_v55  ;;  %v1869_v59 = vsel %vm707_vm0, %v2586_v5, 0.0 }
 0x1f3   : > { %v1918_v46 = vsel %vm1902_vm12, %v4876_v51, 0.0  ;;  %v1934_v22 = vadd.f32 %v1933_v43, %v1932_v45  ;;  %v2590_v57 = vpop.eup %2589  ;;  %v1829_v32 = vsub.f32 %v4952_v35, %v4990_v0  ;;  %2599 = vpow2.f32 %v1852_v24 }
 0x1f4   : > { %v1868_v62 = vadd.f32 %v1867_v2, %v1866_v18  ;;  %v1937_v29 = vsel %vm707_vm0, %v1917_v21, 0.0  ;;  %v933_v15 = vadd.f32 1.0, %v932_v50  ;;  %v1871_v1 = vsel %vm707_vm0, %v2588_v34, 0.0 }
 0x1f5   : > { %v1919_v55 = vsel %vm1903_vm6, %v4888_v20, 0.0  ;;  %v1936_v23 = vadd.f32 %v1935_v3, %v1934_v22  ;;  %v2592_v28 = vpop.eup %2591  ;;  %2601 = vpow2.f32 %v1854_v36  ;;  %v1858_v52 = vmul.f32 1.442695, %v1828_v9  ;;  %v5423_v36 = vld [vmem:[#allocation31_spill] sm:$0xff] }
 0x1f6   : > { %v1870_v27 = vadd.f32 %v1869_v59, %v1868_v62  ;;  %v1939_v58 = vsel %vm707_vm0, %v1918_v46, 0.0  ;;  %2603 = vpow2.f32 %v1856_v49  ;;  %v1873_v17 = vsel %vm707_vm0, %v2590_v57, 0.0 }
 0x1f7   : > { %v1920_v50 = vsel %vm1904_vm13, %v4891_v25, 0.0  ;;  %v1938_v44 = vadd.f32 %v1937_v29, %v1936_v23  ;;  %v2594_v40 = vpop.eup %2593  ;;  %v1860_v24 = vmul.f32 1.442695, %v1829_v32  ;;  %vm1905_vm7 = vcmp.eq.s32.totalorder %v5024_v12, 9 }
 0x1f8   : > { %v1872_v63 = vadd.f32 %v1871_v1, %v1870_v27  ;;  %v1941_v56 = vsel %vm707_vm0, %v1919_v55, 0.0  ;;  %v838_v41 = vmul.f32 0.5, %v837_v4  ;;  %v1875_v30 = vsel %vm707_vm0, %v2592_v28, 0.0 }
 0x1f9   : > { %v1940_v16 = vadd.f32 %v1939_v58, %v1938_v44  ;;  %v2596_v7 = vpop.eup %2595  ;;  %v855_v43 = vadd.f32 1e-09, %v5035_v10  ;;  %2605 = vpow2.f32 %v1858_v52  ;;  %v1943_v9 = vsel %vm707_vm0, %v1920_v50, 0.0  ;;  %v5424_v10 = vld [vmem:[#allocation32_spill] sm:$0xff] }
 0x1fa   : > { %v1874_v5 = vadd.f32 %v1873_v17, %v1872_v63  ;;  %v1877_v2 = vsel %vm707_vm0, %v2594_v40, 0.0  ;;  %v1921_v21 = vsel %vm1905_vm7, %v4901_v37, 0.0  ;;  %v5121_v34 = vadd.s32 1, %v5024_v12 }
 0x1fb   : > { %v1942_v45 = vadd.f32 %v1941_v56, %v1940_v16  ;;  %v2598_v47 = vpop.eup %2597  ;;  %v934_v42 = vadd.f32 1e-09, %v933_v15  ;;  %2607 = vpow2.f32 %v1860_v24  ;;  %vm1906_vm14 = vcmp.eq.s32.totalorder %v5024_v12, 10 }
 0x1fc   : > { %v1876_v4 = vadd.f32 %v1875_v30, %v1874_v5  ;;  %v5425_v18 = vsub.f32 %v5423_v36, %v5424_v10  ;;  %v1879_v49 = vsel %vm707_vm0, %v2596_v7, 0.0  ;;  %2609 = vrcp.f32 %v855_v43 }
 0x1fd   : > { %v1944_v59 = vadd.f32 %v1943_v9, %v1942_v45  ;;  %v2600_v46 = vpop.eup %2599  ;;  %vm1907_vm15 = vcmp.eq.s32.totalorder %v5024_v12, 11  ;;  %v1945_v57 = vsel %vm707_vm0, %v1921_v21, 0.0  ;;  %v1881_v32 = vsel %vm707_vm0, %v2598_v47, 0.0 }
 0x1fe   : > { %v843_v3 = vmul.f32 0.5, %v5425_v18  ;;  %v1878_v22 = vadd.f32 %v1877_v2, %v1876_v4  ;;  %v1922_v62 = vsel %vm1906_vm14, %v4918_v39, 0.0  ;;  %vm1960_vm5 = vcmp.eq.s32.totalorder %v5121_v34, 0 }
 0x1ff   : > { %vm1961_vm1 = vcmp.eq.s32.totalorder %v5121_v34, 1  ;;  %v2602_v29 = vpop.eup %2601  ;;  %v5134_v15 = vmul.f32 %v838_v41, %v838_v41  ;;  %2611 = vrcp.f32 %v934_v42  ;;  %vm1962_vm2 = vcmp.eq.s32.totalorder %v5121_v34, 2 }
 0x200   : > { %v1880_v1 = vadd.f32 %v1879_v49, %v1878_v22  ;;  %v2604_v55 = vpop.eup %2603  ;;  %v1883_v23 = vsel %vm707_vm0, %v2600_v46, 0.0  ;;  %v1923_v28 = vsel %vm1907_vm15, %v4921_v31, 0.0  ;;  %v1946_v52 = vadd.f32 %v1945_v57, %v1944_v59 }
 0x201   : > { %vm1963_vm11 = vcmp.eq.s32.totalorder %v5121_v34, 3  ;;  %v1947_v58 = vsel %vm707_vm0, %v1922_v62, 0.0  ;;  %v1976_v17 = vsel %vm1960_vm5, %v4794_v8, 0.0  ;;  %v1977_v50 = vsel %vm1961_vm1, %v4801_v54, 0.0 }
 0x202   : > { %v1882_v27 = vadd.f32 %v1881_v32, %v1880_v1  ;;  %v1885_v44 = vsel %vm707_vm0, %v2602_v29, 0.0  ;;  %vm1908_vm8 = vcmp.eq.s32.totalorder %v5024_v12, 12  ;;  %vm1964_vm9 = vcmp.eq.s32.totalorder %v5121_v34, 4 }
 0x203   : > { %v1978_v40 = vsel %vm1962_vm2, %v4853_v11, 0.0  ;;  %v2606_v24 = vpop.eup %2605  ;;  %v1887_v56 = vsel %vm707_vm0, %v2604_v55, 0.0  ;;  %v1949_v41 = vsel %vm707_vm0, %v1923_v28, 0.0  ;;  %v1979_v30 = vsel %vm1963_vm11, %v4856_v61, 0.0 }
 0x204   : > { %v1884_v63 = vadd.f32 %v1883_v23, %v1882_v27  ;;  %v1948_v16 = vadd.f32 %v1947_v58, %v1946_v52  ;;  %vm1965_vm10 = vcmp.eq.s32.totalorder %v5121_v34, 5  ;;  %v1992_v8 = vsel %vm707_vm0, %v1976_v17, 0.0 }
 0x205   : > { %v1993_v54 = vsel %vm707_vm0, %v1977_v50, 0.0  ;;  %v2608_v7 = vpop.eup %2607  ;;  %v1980_v5 = vsel %vm1964_vm9, %v4867_v60, 0.0  ;;  %v1995_v9 = vsel %vm707_vm0, %v1978_v40, 0.0  ;;  %v1889_v2 = vsel %vm707_vm0, %v2606_v24, 0.0 }
 0x206   : > { %v1886_v43 = vadd.f32 %v1885_v44, %v1884_v63  ;;  %v1994_v11 = vadd.f32 %v1993_v54, %v1992_v8  ;;  %v1924_v61 = vsel %vm1908_vm8, %v4930_v38, 0.0  ;;  %vm1966_vm12 = vcmp.eq.s32.totalorder %v5121_v34, 6  ;;  %v2610_v45 = vpop.eup %2609 }
 0x207   : > { %v1997_v21 = vsel %vm707_vm0, %v1979_v30, 0.0  ;;  %vm1909_vm6 = vcmp.eq.s32.totalorder %v5024_v12, 13  ;;  %v1981_v42 = vsel %vm1965_vm10, %v4873_v53, 0.0  ;;  %v1891_v4 = vsel %vm707_vm0, %v2608_v7, 0.0 }
 0x208   : > { %v1888_v47 = vadd.f32 %v1887_v56, %v1886_v43  ;;  %v1996_v60 = vadd.f32 %v1995_v9, %v1994_v11  ;;  %v1950_v36 = vadd.f32 %v1949_v41, %v1948_v16  ;;  %vm1967_vm13 = vcmp.eq.s32.totalorder %v5121_v34, 7 }
 0x209   : > { %v1999_v10 = vsel %vm707_vm0, %v1980_v5, 0.0  ;;  %v2612_v18 = vpop.eup %2611  ;;  %v1951_v59 = vsel %vm707_vm0, %v1924_v61, 0.0  ;;  %v1982_v46 = vsel %vm1966_vm12, %v4876_v51, 0.0  ;;  %v844_v57 = vmul.f32 %v843_v3, %v843_v3 }
 0x20a   : > { %v1890_v49 = vadd.f32 %v1889_v2, %v1888_v47  ;;  %v1998_v22 = vadd.f32 %v1997_v21, %v1996_v60  ;;  %v1925_v32 = vsel %vm1909_vm6, %v4936_v48, 0.0  ;;  %vm1968_vm7 = vcmp.eq.s32.totalorder %v5121_v34, 8 }
 0x20b   : > { %v2001_v53 = vsel %vm707_vm0, %v1981_v42, 0.0  ;;  %vm1910_vm14 = vcmp.eq.s32.totalorder %v5024_v12, 14  ;;  %v1983_v29 = vsel %vm1967_vm13, %v4888_v20, 0.0  ;;  %v1952_v55 = vadd.f32 %v1951_v59, %v1950_v36 }
 0x20c   : > { %v1892_v62 = vadd.f32 %v1891_v4, %v1890_v49  ;;  %v2000_v1 = vadd.f32 %v1999_v10, %v1998_v22  ;;  %vm1969_vm15 = vcmp.eq.s32.totalorder %v5121_v34, 9  ;;  %v2003_v23 = vsel %vm707_vm0, %v1982_v46, 0.0  ;;  %v5426_v46 = vld [vmem:[#allocation26_spill] sm:$0xff] }
 0x20d   : > { %v1953_v51 = vsel %vm707_vm0, %v1925_v32, 0.0  ;;  %v1984_v3 = vsel %vm1968_vm7, %v4891_v25, 0.0  ;;  %v1926_v52 = vsel %vm1910_vm14, %v4939_v14, 0.0  ;;  %vm1970_vm5 = vcmp.eq.s32.totalorder %v5121_v34, 10 }
 0x20e   : > { %2613 = vlog2.f32 %v1892_v62  ;;  %v2002_v28 = vadd.f32 %v2001_v53, %v2000_v1  ;;  %v2005_v27 = vsel %vm707_vm0, %v1983_v29, 0.0  ;;  %v845_v20 = vadd.f32 %v844_v57, %v5134_v15  ;;  %v5427_v29 = vld [vmem:[#allocation18_spill] sm:$0xff] }
 0x20f   : > { %vm1911_vm1 = vcmp.eq.s32.totalorder %v5024_v12, 15  ;;  %v1985_v58 = vsel %vm1969_vm15, %v4901_v37, 0.0  ;;  %v1954_v50 = vadd.f32 %v1953_v51, %v1952_v55  ;;  %vm1971_vm2 = vcmp.eq.s32.totalorder %v5121_v34, 11 }
 0x210   : > { %v2004_v17 = vadd.f32 %v2003_v23, %v2002_v28  ;;  %v2007_v44 = vsel %vm707_vm0, %v1984_v3, 0.0  ;;  %v1955_v25 = vsel %vm707_vm0, %v1926_v52, 0.0  ;;  %v1986_v40 = vsel %vm1970_vm5, %v4918_v39, 0.0  ;;  %v5428_v52 = vld [vmem:[#allocation29_spill] sm:$0xff] }
 0x211   : > { %v1927_v63 = vsel %vm1911_vm1, %v4952_v35, 0.0  ;;  %vm1972_vm11 = vcmp.eq.s32.totalorder %v5121_v34, 12  ;;  %v2009_v15 = vsel %vm707_vm0, %v1985_v58, 0.0  ;;  %v857_v12 = vmul.f32 %v2610_v45, %v845_v20 }
 0x212   : > { %v2006_v24 = vadd.f32 %v2005_v27, %v2004_v17  ;;  %v936_v37 = vmul.f32 %v2612_v18, %v5019_v6  ;;  %v1987_v56 = vsel %vm1971_vm2, %v4921_v31, 0.0  ;;  %v1956_v30 = vadd.f32 %v1955_v25, %v1954_v50  ;;  %v2247_v18 = vld [vmem:[%s3094_s24 + $0x8] sm:$0x1] }
 0x213   : > { %vm1973_vm8 = vcmp.eq.s32.totalorder %v5121_v34, 13  ;;  %v2011_v16 = vsel %vm707_vm0, %v1986_v40, 0.0  ;;  %v1957_v39 = vsel %vm707_vm0, %v1927_v63, 0.0  ;;  %v1988_v8 = vsel %vm1972_vm11, %v4930_v38, 0.0 }
 0x214   : > { %v2008_v41 = vadd.f32 %v2007_v44, %v2006_v24  ;;  %v1762_v7 = vadd.f32 1.0, %v4987_v26  ;;  %vm1974_vm9 = vcmp.eq.s32.totalorder %v5121_v34, 14  ;;  %v2013_v43 = vsel %vm707_vm0, %v1987_v56, 0.0 }
 0x215   : > { %v858_v31 = vsub.f32 %v5012_v13, %v857_v12  ;;  %v937_v11 = vmul.f32 %v936_v37, %v5019_v6  ;;  %v1989_v9 = vsel %vm1973_vm8, %v4936_v48, 0.0  ;;  %v1958_v21 = vadd.f32 %v1957_v39, %v1956_v30 }
 0x216   : > { %v2010_v54 = vadd.f32 %v2009_v15, %v2008_v41  ;;  %vm1975_vm10 = vcmp.eq.s32.totalorder %v5121_v34, 15  ;;  %v2015_v38 = vsel %vm707_vm0, %v1988_v8, 0.0  ;;  %v1990_v45 = vsel %vm1974_vm9, %v4939_v14, 0.0 }
 0x217   : > { %v1763_v42 = vsub.f32 %v1762_v7, %v4949_v33  ;;  %v2017_v13 = vsel %vm707_vm0, %v1989_v9, 0.0  ;;  %v1991_v6 = vsel %vm1975_vm10, %v4952_v35, 0.0  ;;  %v938_v4 = vsub.f32 %v858_v31, %v937_v11 }
 0x218   : > { %v2614_v5 = vpop.eup %2613  ;;  %v2012_v2 = vadd.f32 %v2011_v16, %v2010_v54  ;;  %v2019_v36 = vsel %vm707_vm0, %v1990_v45, 0.0  ;;  %v2021_v49 = vsel %vm707_vm0, %v1991_v6, 0.0  ;;  %v814_v22 = vmul.f32 %v2247_v18, %v5426_v46 }
 0x219   : > { %v1894_v61 = vmul.f32 0.6931472, %v2614_v5  ;;  %v939_v57 = vsub.f32 1.0, %v938_v4  ;;  %v1764_v35 = vsub.f32 %v4949_v33, %v4987_v26  ;;  %v2035_v1 = vsub.s32 0, %v5427_v29 }
 0x21a   : > { %v2014_v47 = vadd.f32 %v2013_v43, %v2012_v2 }
 0x21b   : > { %v1895_v60 = vadd.f32 %v1894_v61, %v4990_v0  ;;  %v940_v62 = vmul.f32 %v939_v57, %v814_v22 }
 0x21c   : > { %v2016_v48 = vadd.f32 %v2015_v38, %v2014_v47 }
 0x21d   : > { %v2023_v10 = vsub.f32 %v1895_v60, %v1958_v21  ;;  %v2036_v51 = vrot.slane %v940_v62, %v2035_v1 }
 0x21e   : > { %v2018_v34 = vadd.f32 %v2017_v13, %v2016_v48 }
 0x21f   : > { %v2024_v59 = vmul.f32 %v2023_v10, %v1763_v42  ;;  %v2044_v27 = vsel %vm707_vm0, %v5428_v52, %v2036_v51 }
 0x220   : > { %v2020_v14 = vadd.f32 %v2019_v36, %v2018_v34 }
 0x221   : > { %v2025_v0 = vadd.f32 %v2024_v59, %v5047_v19  ;;  %v5429_v19 = vrot.slane %v5426_v46, 5 }
 0x222   : > { %v2022_v32 = vadd.f32 %v2021_v49, %v2020_v14 }
 0x224   : > { %v2026_v53 = vsub.f32 %v1895_v60, %v2022_v32 }
 0x226   : > { %v2027_v55 = vmul.f32 %v2026_v53, %v1764_v35 }
 0x228   : > { %v2028_v23 = vadd.f32 %v2027_v55, %v2025_v0 }
 0x22a   : > { %v2029_v3 = vmul.f32 0.25, %v2028_v23 }
 0x22c   : > { %v2030_v28 = vmul.f32 %v2029_v3, %v814_v22 }
 0x22e   : > { %v2042_v20 = vrot.slane %v2030_v28, %v2035_v1 }
 0x230   : > { %v2045_v58 = vsel %vm777_vm3, %v2044_v27, %v2042_v20 }
 0x231   : > { %v2046_v33 = vsel %vm779_vm4, %v2045_v58, %v5429_v19 }
 0x232   : > { %2047 = vst [vmem:[%s3657_s21] sm:$0xf] %v2046_v33 }
 0x233 PF: > { %s2304_s10 = sshll.u32 %s2799_s28, 6  ;;  %s2063_s22 = sshll.u32 %s3657_s21, 4  ;;  %s2064_s22 = int_to_ptr.vmem [resolvable:$true] %s2063_s22 }
 0x234   : > { %s5228_s7 = scalar_lea.hbm %s5278_s6, %s2304_s10  ;;  %s2049_s13 = scalar_lea.sflag [#allocation6], %s3068_s1 }
 0x235   : > { %s2719_s2 = scalar_lea.vmem %s2064_s22, 64  ;;  %p5430_p0 = scmp.ne.s32.totalorder %s5312_s14, 0 }
 0x236   : > { %p2720_p13 = scmp.ne.s32.totalorder %s2064_s22, %s2719_s2  ;;  %s2818_s27 = smov [#allocation10]  }
 0x237   : > { %s2723_s18 = sshll.u32 %s2818_s27, 4  ;;  %s2724_s18 = int_to_ptr.vmem [resolvable:$false] %s2723_s18 }
 0x238   : > { %p2721_p3 = pnand %p2720_p13, %p5430_p0  ;;  %s2725_s24 = scalar_lea.vmem %s2724_s18, 128 }
 0x239   : > { %p2726_p11 = scmp.lt.s32.totalorder %s2064_s22, %s2724_s18  ;;  %p2727_p4 = scmp.lt.s32.totalorder %s2725_s24, %s2719_s2 }
 0x23a   : > { %p2722_p6 = pneg %p2721_p3 }
 0x23b   : > { %p2728_p2 = por %p2727_p4, %p2726_p11 }
 0x23d   : > { %p2729_p7 = pnand %p2728_p2, %p2722_p6 }
 0x23f   : > { %2732 = shalt.err (!%p2729_p7)
}
 0x240   : > { %s2733_s28 = scalar_lea.hbm %s5228_s7, 64  ;;  %s2737_s21 = scalar_lea.hbm %s5278_s6, 128 }
 0x241   : > { %p2734_p10 = scmp.ne.s32.totalorder %s5228_s7, %s2733_s28  ;;  %p2738_p8 = scmp.lt.u32.totalorder %s5228_s7, %s5278_s6 }
 0x242   : > { %p2739_p5 = scmp.lt.u32.totalorder %s2737_s21, %s2733_s28  ;;  %p2741_p13 = scmp.lt.u32.totalorder %s2733_s28, %s5228_s7 }
 0x243   : > { %p2735_p12 = pnand %p2734_p10, %p5430_p0 }
 0x244   : > { %p2740_p1 = por %p2739_p5, %p2738_p8 }
 0x245   : > { %p2736_p9 = pneg %p2735_p12 }
 0x246   : > { %p2742_p3 = por %p2741_p13, %p2740_p1 }
 0x248   : > { %p2743_p6 = pnand %p2742_p3, %p2736_p9 }
 0x24a   : > { %2746 = shalt.err (!%p2743_p6)
}
 0x24b   : > { %2325 = dma.vmem_to_hbm [thread:$0]  (%p5430_p0), %s2064_s22, 64, %s5228_s7, %s2049_s13  }
 0x24c PF: > { %s2075_s11 = sand.u32 1, %s2787_s0   ;;  %p5431_p11 = scmp.ne.s32.totalorder %s5314_s16, 0 }
 0x24d   : > { %p5432_p4 = scmp.ge.s32.totalorder %s2807_s30, 2  ;;  %s2076_s12 = scalar_lea.sflag [#allocation6], %s2075_s11 }
 0x24f   : > { %p2338_p2 = pnand %p5432_p4, %p5431_p11 }
 0x251   : > { %2782 = dma.done.wait (!%p2338_p2), %s2076_s12, 64  }
 0x252   : > { %2784 = vsyncadd (!%p2338_p2), %s2076_s12, 4294967232  ;;  %s31_s30 = sadd.s32 1, %s2807_s30   ;;  %s5433_s15 = sld [smem:[#allocation15_spill]] }
 0x253   : > { %p28_p7 = scmp.ge.s32.totalorder %s31_s30, 4   ;;  %s5434_s27 = sld [smem:[#allocation17_spill]] }
 0x254   : > { %s5435_s14 = sld [smem:[#allocation16_spill]]  ;;  %s5436_s0 = smov %s2791_s26 }
 0x255   : > { %s5438_s28 = smov %s2803_s29  ;;  %30 = sbr.rel (!%p28_p7) target bundleno = 24 (0x18), region = 131 }
 0x258   : > { %s5437_s26 = smov %s5433_s15 }
 0x25a   : > { %s5439_s29 = smov %s5435_s14 }
 0x25c   :  { %2081 = vsyncpa [#allocation5], 1 }
 0x25d   :  { %2083 = vsyncpa [#allocation5 + $0x1], 1 }
 0x25e   :  { %2084 = vsyncpa [#allocation8], 1 }
 0x25f   :  { %2086 = vsyncpa [#allocation8 + $0x1], 1 }
 0x260   :  { %2087 = vsyncpa [#allocation6], 1 }
 0x261   :  { %2089 = vsyncpa [#allocation6 + $0x1], 1 }

</bundles_post_ra>
